<compile_context>
chip_gen: v7x
topology: tpu7x:2x2x1
jax: 0.10.0
libtpu: 0.0.40
codegen_flags: <defaults>
</compile_context>

<pallas_src>
import functools

import jax
import jax.numpy as jnp
from jax import lax
from jax.experimental import pallas as pl
from jax.experimental.pallas import tpu as pltpu

HIDDEN = 128
FC1_PAD = 512   # fc1 output 400 -> padded to a lane multiple
FC2_PAD = 384   # fc2 output 300 -> padded to a lane multiple


def _cell_ifog(gates, c, hidden):
    """LSTM cell update; gate columns are pre-permuted to [i, f, o, g]."""
    sig = jax.nn.sigmoid(gates[:, :3 * hidden])       # one fused sigmoid (i,f,o)
    i = sig[:, 0 * hidden:1 * hidden]
    f = sig[:, 1 * hidden:2 * hidden]
    o = sig[:, 2 * hidden:3 * hidden]
    g = jnp.tanh(gates[:, 3 * hidden:4 * hidden])
    c_new = f * c + i * g
    h_new = o * jnp.tanh(c_new)
    return h_new, c_new


def _cell_ifog_t0(gates, hidden):
    """Cell update at t=0 where c_prev == 0 (skips the f*c term)."""
    sig = jax.nn.sigmoid(gates[:, :3 * hidden])
    i = sig[:, 0 * hidden:1 * hidden]
    o = sig[:, 2 * hidden:3 * hidden]
    g = jnp.tanh(gates[:, 3 * hidden:4 * hidden])
    c_new = i * g
    h_new = o * jnp.tanh(c_new)
    return h_new, c_new


def actor_kernel(x_ref, wih0_ref, b0_ref, wrec_ref, b1_ref,
                 bf1_ref, bf2_ref, bo_ref,
                 w1_hbm, w2_hbm, wo_hbm,
                 out_ref,
                 w1_v, w2_v, wo_v, sem,
                 *, max_action, hidden, seq_len, batch):
    H, S, B = hidden, seq_len, batch

    # ---- start head-weight DMAs; they hide behind the recurrence -----------
    cp1 = pltpu.make_async_copy(w1_hbm, w1_v, sem.at[0]); cp1.start()
    cp2 = pltpu.make_async_copy(w2_hbm, w2_v, sem.at[1]); cp2.start()
    cp3 = pltpu.make_async_copy(wo_hbm, wo_v, sem.at[2]); cp3.start()

    # ---- layer-0 input projection, hoisted out of the recurrence -----------
    gx = (jnp.dot(x_ref[...], wih0_ref[...],
                  preferred_element_type=jnp.float32)
          + b0_ref[...])                                   # (S*B, 4H) f32
    b1 = b1_ref[...]                                       # (1, 4H) f32, hoisted

    # ---- t = 0 : h1 = h2 = c1 = c2 = 0 --------------------------------------
    h1, c1 = _cell_ifog_t0(gx[0:B, :], H)
    h1b = h1.astype(jnp.bfloat16)

    if S == 1:
        gates1 = jnp.dot(h1b, wrec_ref[:H, 4 * H:],
                         preferred_element_type=jnp.float32) + b1
        h2, _ = _cell_ifog_t0(gates1, H)
    else:
        # only the h1 rows of W_rec matter at t=0 (h2_prev == 0): K = H
        fused = jnp.dot(h1b, wrec_ref[:H, :],
                        preferred_element_type=jnp.float32)    # (B, 8H)
        rec0 = fused[:, :4 * H]                                 # h1_0 @ whh0 (for t=1)
        h2, c2 = _cell_ifog_t0(fused[:, 4 * H:] + b1, H)
        h2b = h2.astype(jnp.bfloat16)

        # ---- t = 1 .. S-2 : one fused (B,2H) @ (2H,8H) dot per step ----------
        for t in range(1, S - 1):
            h1, c1 = _cell_ifog(gx[t * B:(t + 1) * B, :] + rec0, c1, H)
            h1b = h1.astype(jnp.bfloat16)
            hcat = jnp.concatenate([h1b, h2b], axis=1)          # (B, 2H) bf16
            fused = jnp.dot(hcat, wrec_ref[...],
                            preferred_element_type=jnp.float32)  # (B, 8H)
            rec0 = fused[:, :4 * H]                              # layer-0 rec for t+1
            h2, c2 = _cell_ifog(fused[:, 4 * H:] + b1, c2, H)    # layer-1 gates for t
            h2b = h2.astype(jnp.bfloat16)

        # ---- last step: rec0 for step S is dead -> layer-1 columns only ------
        t = S - 1
        h1, c1 = _cell_ifog(gx[t * B:(t + 1) * B, :] + rec0, c1, H)
        h1b = h1.astype(jnp.bfloat16)
        hcat = jnp.concatenate([h1b, h2b], axis=1)
        gates1 = jnp.dot(hcat, wrec_ref[:, 4 * H:],
                         preferred_element_type=jnp.float32) + b1
        h2, _ = _cell_ifog(gates1, c2, H)

    # ---- MLP head (lane-padded) on the top-layer last-timestep hidden -------
    cp1.wait(); cp2.wait(); cp3.wait()
    y = jnp.maximum(
        jnp.dot(h2.astype(jnp.bfloat16), w1_v[...],
                preferred_element_type=jnp.float32) + bf1_ref[...], 0.0)
    y = jnp.maximum(
        jnp.dot(y.astype(jnp.bfloat16), w2_v[...],
                preferred_element_type=jnp.float32) + bf2_ref[...], 0.0)
    y = jnp.tanh(
        jnp.dot(y.astype(jnp.bfloat16), wo_v[...],
                preferred_element_type=jnp.float32) + bo_ref[...])
    out_ref[...] = (y * max_action).astype(out_ref.dtype)


def _perm_ifog(w):
    """Permute PyTorch LSTM gate blocks (i, f, g, o) -> (i, f, o, g)."""
    i, f, g, o = jnp.split(w, 4, axis=-1)
    return jnp.concatenate([i, f, o, g], axis=-1)


def _pad2(a, rows, cols):
    r, c = a.shape
    return jnp.pad(a, ((0, rows - r), (0, cols - c)))


def pack_params(params, weight_dtype=jnp.bfloat16):
    """One-time pre-pack: permute gates, fuse recurrent weights, pad head, cast."""
    H = params["whh0"].shape[0]
    whh0 = _perm_ifog(params["whh0"])
    wih1 = _perm_ifog(params["wih1"])
    whh1 = _perm_ifog(params["whh1"])
    # fused per-step recurrent weight: [h1_t ; h2_{t-1}] @ [[whh0, wih1],[0, whh1]]
    wrec = jnp.concatenate(
        [jnp.concatenate([whh0, wih1], axis=1),
         jnp.concatenate([jnp.zeros_like(whh1), whh1], axis=1)], axis=0)  # (2H, 8H)

    action_dim = params["wo"].shape[1]
    out_pad = max(128, -(-action_dim // 128) * 128)

    return {
        "wih0": _perm_ifog(params["wih0"]).astype(weight_dtype),
        "b0":   _perm_ifog(params["b0"]).astype(jnp.float32),
        "wrec": wrec.astype(weight_dtype),
        "b1":   _perm_ifog(params["b1"]).astype(jnp.float32),
        # lane-padded MLP head (400 -> 512, 300 -> 384, action_dim -> out_pad)
        "w1":  _pad2(params["w1"], H, FC1_PAD).astype(weight_dtype),
        "bf1": _pad2(params["bf1"], 1, FC1_PAD).astype(jnp.float32),
        "w2":  _pad2(params["w2"], FC1_PAD, FC2_PAD).astype(weight_dtype),
        "bf2": _pad2(params["bf2"], 1, FC2_PAD).astype(jnp.float32),
        "wo":  _pad2(params["wo"], FC2_PAD, out_pad).astype(weight_dtype),
        "bo":  _pad2(params["bo"], 1, out_pad).astype(jnp.float32),
    }


def actor_forward(x, packed, max_action, action_dim):
    """Pallas implementation of Actor.forward (eval mode).

    `packed` is the output of pack_params(params).
    """
    x = jnp.asarray(x)
    if x.ndim == 1:
        x = x.reshape(1, -1)
    if x.ndim == 2:
        x = x[:, None, :]                                  # (B, 1, D)
    B, S, D = x.shape
    # time-major rows, pre-cast to bf16 in the wrapper (halves the x DMA)
    x_tm = jnp.transpose(x, (1, 0, 2)).reshape(S * B, D).astype(jnp.bfloat16)

    out_pad = packed["wo"].shape[1]
    kernel = functools.partial(actor_kernel, max_action=float(max_action),
                               hidden=HIDDEN, seq_len=S, batch=B)

    args = (x_tm,
            packed["wih0"], packed["b0"], packed["wrec"], packed["b1"],
            packed["bf1"], packed["bf2"], packed["bo"],
            packed["w1"], packed["w2"], packed["wo"])

    vmem = pl.BlockSpec(memory_space=pltpu.MemorySpace.VMEM)
    hbm = pl.BlockSpec(memory_space=pl.ANY)   # head weights: manual DMA overlap

    # No grid: ~1.3 MiB of weights + tiny activations fit VMEM on every
    # generation, including v7x's 64 MiB.
    # TODO(synk): for large serving batches add grid=(B//TB,) with
    # dimension_semantics=("parallel",) (keep x 3-D and block it (S, TB, D)) so
    # work shards across v7x's two TensorCores, and stage the hoisted gx
    # projection in a pltpu.VMEM((TB*S, 4H), f32) scratch to bound VMEM; a
    # cross-call weight-prefetch (P10) would also remove the per-call weight
    # DMA in tight per-env-step inference loops.
    out = pl.pallas_call(
        kernel,
        out_shape=jax.ShapeDtypeStruct((B, out_pad), jnp.float32),
        in_specs=[vmem] * 8 + [hbm] * 3,
        out_specs=vmem,
        scratch_shapes=[
            pltpu.VMEM(packed["w1"].shape, packed["w1"].dtype),
            pltpu.VMEM(packed["w2"].shape, packed["w2"].dtype),
            pltpu.VMEM(packed["wo"].shape, packed["wo"].dtype),
            pltpu.SemaphoreType.DMA((3,)),
        ],
        compiler_params=pltpu.CompilerParams(vmem_limit_bytes=32 * 1024 * 1024),
    )(*args)
    return out[:, :action_dim]


def init_params(key, state_dim, action_dim, hidden=HIDDEN):
    """Deterministic init mirroring the PyTorch module's parameter shapes.

    LSTM params: uniform(-1/sqrt(hidden), 1/sqrt(hidden)) (PyTorch default).
    Linear params: fan_in_uniform_init -> uniform(-1/sqrt(fan_in), ...).
    Weights are stored pre-transposed as (in, out) in PyTorch gate order
    (i, f, g, o); the two LSTM biases (b_ih + b_hh) are folded per layer.
    """
    ks = jax.random.split(key, 16)
    klstm = 1.0 / jnp.sqrt(hidden)

    def U(k, shape, bound):
        return jax.random.uniform(k, shape, jnp.float32, -bound, bound)

    params = {
        # LSTM layer 0
        "wih0": U(ks[0], (state_dim, 4 * hidden), klstm),
        "whh0": U(ks[1], (hidden, 4 * hidden), klstm),
        "b0":   U(ks[2], (1, 4 * hidden), klstm) + U(ks[3], (1, 4 * hidden), klstm),
        # LSTM layer 1
        "wih1": U(ks[4], (hidden, 4 * hidden), klstm),
        "whh1": U(ks[5], (hidden, 4 * hidden), klstm),
        "b1":   U(ks[6], (1, 4 * hidden), klstm) + U(ks[7], (1, 4 * hidden), klstm),
        # fc1: 128 -> 400
        "w1":  U(ks[8], (hidden, 400), 1.0 / jnp.sqrt(hidden)),
        "bf1": U(ks[9], (1, 400), 1.0 / jnp.sqrt(400.0)),
        # fc2: 400 -> 300
        "w2":  U(ks[10], (400, 300), 1.0 / jnp.sqrt(400.0)),
        "bf2": U(ks[11], (1, 300), 1.0 / jnp.sqrt(300.0)),
        # out: 300 -> action_dim
        "wo": U(ks[12], (300, action_dim), 1.0 / jnp.sqrt(300.0)),
        "bo": U(ks[13], (1, action_dim), 1.0 / jnp.sqrt(float(action_dim))),
    }
    return params


def _lstm_step_ref(x_t, h, c, wih, whh, b, hidden):
    """PyTorch-ordered (i, f, g, o) LSTM step, f32 — reference only."""
    gates = x_t @ wih + h @ whh + b
    i = jax.nn.sigmoid(gates[:, 0 * hidden:1 * hidden])
    f = jax.nn.sigmoid(gates[:, 1 * hidden:2 * hidden])
    g = jnp.tanh(gates[:, 2 * hidden:3 * hidden])
    o = jax.nn.sigmoid(gates[:, 3 * hidden:4 * hidden])
    c_new = f * c + i * g
    h_new = o * jnp.tanh(c_new)
    return h_new, c_new


def actor_reference(x, params, max_action, hidden=HIDDEN):
    """Pure-JAX f32 reference (PyTorch semantics) for correctness checking."""
    x = jnp.asarray(x, jnp.float32)
    if x.ndim == 1:
        x = x.reshape(1, -1)
    if x.ndim == 2:
        x = x[:, None, :]
    B, S, _ = x.shape

    def layer(xs, wih, whh, b):
        def step(carry, x_t):
            h, c = carry
            h, c = _lstm_step_ref(x_t, h, c, wih, whh, b, hidden)
            return (h, c), h
        z = jnp.zeros((B, hidden), jnp.float32)
        _, hs = lax.scan(step, (z, z), xs)
        return hs

    xs = jnp.transpose(x, (1, 0, 2))                       # (S, B, D)
    h1s = layer(xs, params["wih0"], params["whh0"], params["b0"])
    h2s = layer(h1s, params["wih1"], params["whh1"], params["b1"])
    h = h2s[-1]                                            # last timestep
    y = jax.nn.relu(h @ params["w1"] + params["bf1"])
    y = jax.nn.relu(y @ params["w2"] + params["bf2"])
    return jnp.tanh(y @ params["wo"] + params["bo"]) * max_action


if __name__ == "__main__":
    B, S, STATE_DIM, ACTION_DIM = 2, 8, 16, 4
    MAX_ACTION = 2.0

    key = jax.random.PRNGKey(0)
    kx, kp = jax.random.split(key)
    x = jax.random.normal(kx, (B, S, STATE_DIM), jnp.float32)
    params = init_params(kp, STATE_DIM, ACTION_DIM)
    packed = pack_params(params)

    out = actor_forward(x, packed, MAX_ACTION, ACTION_DIM)
    out = jax.block_until_ready(out)

    ref = jax.block_until_ready(actor_reference(x, params, MAX_ACTION))
    assert out.shape == (B, ACTION_DIM)
    # bf16 weights / activations in the kernel vs. f32 reference -> looser tol.
    assert jnp.allclose(out, ref, atol=5e-2, rtol=5e-2), (out, ref)

    print("KERNEL_OK")
</pallas_src>

<mosaic_0001>
module attributes {stable_mosaic.version = 11 : i64} {
  func.func @actor_kernel(%arg0: memref<16x16xbf16, #tpu.memory_space<vmem>>, %arg1: memref<16x512xbf16, #tpu.memory_space<vmem>>, %arg2: memref<1x512xf32, #tpu.memory_space<vmem>>, %arg3: memref<256x1024xbf16, #tpu.memory_space<vmem>>, %arg4: memref<1x512xf32, #tpu.memory_space<vmem>>, %arg5: memref<1x512xf32, #tpu.memory_space<vmem>>, %arg6: memref<1x384xf32, #tpu.memory_space<vmem>>, %arg7: memref<1x128xf32, #tpu.memory_space<vmem>>, %arg8: memref<128x512xbf16, #tpu.memory_space<any>>, %arg9: memref<512x384xbf16, #tpu.memory_space<any>>, %arg10: memref<384x128xbf16, #tpu.memory_space<any>>, %arg11: memref<2x128xf32, #tpu.memory_space<vmem>>, %arg12: memref<128x512xbf16, #tpu.memory_space<vmem>>, %arg13: memref<512x384xbf16, #tpu.memory_space<vmem>>, %arg14: memref<384x128xbf16, #tpu.memory_space<vmem>>, %arg15: memref<3x!tpu.dma_semaphore, #tpu.memory_space<semaphore_mem>>) attributes {dimension_semantics = [], scalar_prefetch = 0 : i64, scratch_operands = 4 : i64, tpu.core_type = #tpu.core_type<tc>} {
    %c0_i32 = arith.constant 0 : i32
    %0 = tpu.memref_slice %arg15[%c0_i32] : memref<3x!tpu.dma_semaphore, #tpu.memory_space<semaphore_mem>> -> memref<1x!tpu.dma_semaphore, #tpu.memory_space<semaphore_mem>>
    %1 = tpu.memref_squeeze %0 : memref<1x!tpu.dma_semaphore, #tpu.memory_space<semaphore_mem>> -> memref<!tpu.dma_semaphore, #tpu.memory_space<semaphore_mem>>
    tpu.enqueue_dma source(%arg8 : memref<128x512xbf16, #tpu.memory_space<any>>) target(%arg12 : memref<128x512xbf16, #tpu.memory_space<vmem>>) target_semaphore(%1 : memref<!tpu.dma_semaphore, #tpu.memory_space<semaphore_mem>>)
    %c1_i32 = arith.constant 1 : i32
    %2 = tpu.memref_slice %arg15[%c1_i32] : memref<3x!tpu.dma_semaphore, #tpu.memory_space<semaphore_mem>> -> memref<1x!tpu.dma_semaphore, #tpu.memory_space<semaphore_mem>>
    %3 = tpu.memref_squeeze %2 : memref<1x!tpu.dma_semaphore, #tpu.memory_space<semaphore_mem>> -> memref<!tpu.dma_semaphore, #tpu.memory_space<semaphore_mem>>
    tpu.enqueue_dma source(%arg9 : memref<512x384xbf16, #tpu.memory_space<any>>) target(%arg13 : memref<512x384xbf16, #tpu.memory_space<vmem>>) target_semaphore(%3 : memref<!tpu.dma_semaphore, #tpu.memory_space<semaphore_mem>>)
    %c2_i32 = arith.constant 2 : i32
    %4 = tpu.memref_slice %arg15[%c2_i32] : memref<3x!tpu.dma_semaphore, #tpu.memory_space<semaphore_mem>> -> memref<1x!tpu.dma_semaphore, #tpu.memory_space<semaphore_mem>>
    %5 = tpu.memref_squeeze %4 : memref<1x!tpu.dma_semaphore, #tpu.memory_space<semaphore_mem>> -> memref<!tpu.dma_semaphore, #tpu.memory_space<semaphore_mem>>
    tpu.enqueue_dma source(%arg10 : memref<384x128xbf16, #tpu.memory_space<any>>) target(%arg14 : memref<384x128xbf16, #tpu.memory_space<vmem>>) target_semaphore(%5 : memref<!tpu.dma_semaphore, #tpu.memory_space<semaphore_mem>>)
    %c0 = arith.constant 0 : index
    %c0_0 = arith.constant 0 : index
    %6 = vector.load %arg0[%c0, %c0_0] : memref<16x16xbf16, #tpu.memory_space<vmem>>, vector<16x16xbf16>
    %c0_1 = arith.constant 0 : index
    %c0_2 = arith.constant 0 : index
    %7 = vector.load %arg1[%c0_1, %c0_2] : memref<16x512xbf16, #tpu.memory_space<vmem>>, vector<16x512xbf16>
    %cst = arith.constant dense<0.000000e+00> : vector<16x512xf32>
    %8 = tpu.matmul %6, %7, %cst {dimension_numbers = #tpu.dot_dimension_numbers<[1], [0], [0], [1], [0, 0, 1, 1], [], []>} : vector<16x16xbf16>, vector<16x512xbf16>, vector<16x512xf32> -> vector<16x512xf32>
    %c0_3 = arith.constant 0 : index
    %c0_4 = arith.constant 0 : index
    %9 = vector.load %arg2[%c0_3, %c0_4] : memref<1x512xf32, #tpu.memory_space<vmem>>, vector<1x512xf32>
    %10 = vector.broadcast %9 : vector<1x512xf32> to vector<16x512xf32>
    %11 = arith.addf %8, %10 : vector<16x512xf32>
    %c0_5 = arith.constant 0 : index
    %c0_6 = arith.constant 0 : index
    %12 = vector.load %arg4[%c0_5, %c0_6] : memref<1x512xf32, #tpu.memory_space<vmem>>, vector<1x512xf32>
    %13 = vector.extract_strided_slice %11 {offsets = [0, 0], sizes = [2, 512], strides = [1, 1]} : vector<16x512xf32> to vector<2x512xf32>
    %14 = vector.extract_strided_slice %13 {offsets = [0, 0], sizes = [2, 384], strides = [1, 1]} : vector<2x512xf32> to vector<2x384xf32>
    %15 = arith.negf %14 : vector<2x384xf32>
    %16 = math.exp %15 : vector<2x384xf32>
    %cst_7 = arith.constant 1.000000e+00 : f32
    %17 = vector.broadcast %cst_7 : f32 to vector<2x384xf32>
    %18 = arith.addf %17, %16 : vector<2x384xf32>
    %19 = arith.divf %17, %18 : vector<2x384xf32>
    %20 = vector.extract_strided_slice %19 {offsets = [0, 0], sizes = [2, 128], strides = [1, 1]} : vector<2x384xf32> to vector<2x128xf32>
    %21 = vector.extract_strided_slice %19 {offsets = [0, 256], sizes = [2, 128], strides = [1, 1]} : vector<2x384xf32> to vector<2x128xf32>
    %22 = vector.extract_strided_slice %13 {offsets = [0, 384], sizes = [2, 128], strides = [1, 1]} : vector<2x512xf32> to vector<2x128xf32>
    %23 = math.tanh %22 : vector<2x128xf32>
    %24 = arith.mulf %20, %23 : vector<2x128xf32>
    %25 = math.tanh %24 : vector<2x128xf32>
    %26 = arith.mulf %21, %25 : vector<2x128xf32>
    %27 = arith.truncf %26 : vector<2x128xf32> to vector<2x128xbf16>
    %c0_8 = arith.constant 0 : index
    %c0_9 = arith.constant 0 : index
    %28 = vector.load %arg3[%c0_8, %c0_9] : memref<256x1024xbf16, #tpu.memory_space<vmem>>, vector<128x1024xbf16>
    %cst_10 = arith.constant dense<0.000000e+00> : vector<2x1024xf32>
    %29 = tpu.matmul %27, %28, %cst_10 {dimension_numbers = #tpu.dot_dimension_numbers<[1], [0], [0], [1], [0, 0, 1, 1], [], []>} : vector<2x128xbf16>, vector<128x1024xbf16>, vector<2x1024xf32> -> vector<2x1024xf32>
    %30 = vector.extract_strided_slice %29 {offsets = [0, 0], sizes = [2, 512], strides = [1, 1]} : vector<2x1024xf32> to vector<2x512xf32>
    %31 = vector.extract_strided_slice %29 {offsets = [0, 512], sizes = [2, 512], strides = [1, 1]} : vector<2x1024xf32> to vector<2x512xf32>
    %32 = vector.broadcast %12 : vector<1x512xf32> to vector<2x512xf32>
    %33 = arith.addf %31, %32 : vector<2x512xf32>
    %34 = vector.extract_strided_slice %33 {offsets = [0, 0], sizes = [2, 384], strides = [1, 1]} : vector<2x512xf32> to vector<2x384xf32>
    %35 = arith.negf %34 : vector<2x384xf32>
    %36 = math.exp %35 : vector<2x384xf32>
    %cst_11 = arith.constant 1.000000e+00 : f32
    %37 = vector.broadcast %cst_11 : f32 to vector<2x384xf32>
    %38 = arith.addf %37, %36 : vector<2x384xf32>
    %39 = arith.divf %37, %38 : vector<2x384xf32>
    %40 = vector.extract_strided_slice %39 {offsets = [0, 0], sizes = [2, 128], strides = [1, 1]} : vector<2x384xf32> to vector<2x128xf32>
    %41 = vector.extract_strided_slice %39 {offsets = [0, 256], sizes = [2, 128], strides = [1, 1]} : vector<2x384xf32> to vector<2x128xf32>
    %42 = vector.extract_strided_slice %33 {offsets = [0, 384], sizes = [2, 128], strides = [1, 1]} : vector<2x512xf32> to vector<2x128xf32>
    %43 = math.tanh %42 : vector<2x128xf32>
    %44 = arith.mulf %40, %43 : vector<2x128xf32>
    %45 = math.tanh %44 : vector<2x128xf32>
    %46 = arith.mulf %41, %45 : vector<2x128xf32>
    %47 = arith.truncf %46 : vector<2x128xf32> to vector<2x128xbf16>
    %48 = vector.extract_strided_slice %11 {offsets = [2, 0], sizes = [2, 512], strides = [1, 1]} : vector<16x512xf32> to vector<2x512xf32>
    %49 = arith.addf %48, %30 : vector<2x512xf32>
    %50 = vector.extract_strided_slice %49 {offsets = [0, 0], sizes = [2, 384], strides = [1, 1]} : vector<2x512xf32> to vector<2x384xf32>
    %51 = arith.negf %50 : vector<2x384xf32>
    %52 = math.exp %51 : vector<2x384xf32>
    %cst_12 = arith.constant 1.000000e+00 : f32
    %53 = vector.broadcast %cst_12 : f32 to vector<2x384xf32>
    %54 = arith.addf %53, %52 : vector<2x384xf32>
    %55 = arith.divf %53, %54 : vector<2x384xf32>
    %56 = vector.extract_strided_slice %55 {offsets = [0, 0], sizes = [2, 128], strides = [1, 1]} : vector<2x384xf32> to vector<2x128xf32>
    %57 = vector.extract_strided_slice %55 {offsets = [0, 128], sizes = [2, 128], strides = [1, 1]} : vector<2x384xf32> to vector<2x128xf32>
    %58 = vector.extract_strided_slice %55 {offsets = [0, 256], sizes = [2, 128], strides = [1, 1]} : vector<2x384xf32> to vector<2x128xf32>
    %59 = vector.extract_strided_slice %49 {offsets = [0, 384], sizes = [2, 128], strides = [1, 1]} : vector<2x512xf32> to vector<2x128xf32>
    %60 = math.tanh %59 : vector<2x128xf32>
    %61 = arith.mulf %57, %24 : vector<2x128xf32>
    %62 = arith.mulf %56, %60 : vector<2x128xf32>
    %63 = arith.addf %61, %62 : vector<2x128xf32>
    %64 = math.tanh %63 : vector<2x128xf32>
    %65 = arith.mulf %58, %64 : vector<2x128xf32>
    %66 = arith.truncf %65 : vector<2x128xf32> to vector<2x128xbf16>
    %67 = tpu.concatenate %66, %47 in 1 : vector<2x128xbf16>, vector<2x128xbf16> -> vector<2x256xbf16>
    %c0_13 = arith.constant 0 : index
    %c0_14 = arith.constant 0 : index
    %68 = vector.load %arg3[%c0_13, %c0_14] : memref<256x1024xbf16, #tpu.memory_space<vmem>>, vector<256x1024xbf16>
    %cst_15 = arith.constant dense<0.000000e+00> : vector<2x1024xf32>
    %69 = tpu.matmul %67, %68, %cst_15 {dimension_numbers = #tpu.dot_dimension_numbers<[1], [0], [0], [1], [0, 0, 1, 1], [], []>} : vector<2x256xbf16>, vector<256x1024xbf16>, vector<2x1024xf32> -> vector<2x1024xf32>
    %70 = vector.extract_strided_slice %69 {offsets = [0, 0], sizes = [2, 512], strides = [1, 1]} : vector<2x1024xf32> to vector<2x512xf32>
    %71 = vector.extract_strided_slice %69 {offsets = [0, 512], sizes = [2, 512], strides = [1, 1]} : vector<2x1024xf32> to vector<2x512xf32>
    %72 = vector.broadcast %12 : vector<1x512xf32> to vector<2x512xf32>
    %73 = arith.addf %71, %72 : vector<2x512xf32>
    %74 = vector.extract_strided_slice %73 {offsets = [0, 0], sizes = [2, 384], strides = [1, 1]} : vector<2x512xf32> to vector<2x384xf32>
    %75 = arith.negf %74 : vector<2x384xf32>
    %76 = math.exp %75 : vector<2x384xf32>
    %cst_16 = arith.constant 1.000000e+00 : f32
    %77 = vector.broadcast %cst_16 : f32 to vector<2x384xf32>
    %78 = arith.addf %77, %76 : vector<2x384xf32>
    %79 = arith.divf %77, %78 : vector<2x384xf32>
    %80 = vector.extract_strided_slice %79 {offsets = [0, 0], sizes = [2, 128], strides = [1, 1]} : vector<2x384xf32> to vector<2x128xf32>
    %81 = vector.extract_strided_slice %79 {offsets = [0, 128], sizes = [2, 128], strides = [1, 1]} : vector<2x384xf32> to vector<2x128xf32>
    %82 = vector.extract_strided_slice %79 {offsets = [0, 256], sizes = [2, 128], strides = [1, 1]} : vector<2x384xf32> to vector<2x128xf32>
    %83 = vector.extract_strided_slice %73 {offsets = [0, 384], sizes = [2, 128], strides = [1, 1]} : vector<2x512xf32> to vector<2x128xf32>
    %84 = math.tanh %83 : vector<2x128xf32>
    %85 = arith.mulf %81, %44 : vector<2x128xf32>
    %86 = arith.mulf %80, %84 : vector<2x128xf32>
    %87 = arith.addf %85, %86 : vector<2x128xf32>
    %88 = math.tanh %87 : vector<2x128xf32>
    %89 = arith.mulf %82, %88 : vector<2x128xf32>
    %90 = arith.truncf %89 : vector<2x128xf32> to vector<2x128xbf16>
    %91 = vector.extract_strided_slice %11 {offsets = [4, 0], sizes = [2, 512], strides = [1, 1]} : vector<16x512xf32> to vector<2x512xf32>
    %92 = arith.addf %91, %70 : vector<2x512xf32>
    %93 = vector.extract_strided_slice %92 {offsets = [0, 0], sizes = [2, 384], strides = [1, 1]} : vector<2x512xf32> to vector<2x384xf32>
    %94 = arith.negf %93 : vector<2x384xf32>
    %95 = math.exp %94 : vector<2x384xf32>
    %cst_17 = arith.constant 1.000000e+00 : f32
    %96 = vector.broadcast %cst_17 : f32 to vector<2x384xf32>
    %97 = arith.addf %96, %95 : vector<2x384xf32>
    %98 = arith.divf %96, %97 : vector<2x384xf32>
    %99 = vector.extract_strided_slice %98 {offsets = [0, 0], sizes = [2, 128], strides = [1, 1]} : vector<2x384xf32> to vector<2x128xf32>
    %100 = vector.extract_strided_slice %98 {offsets = [0, 128], sizes = [2, 128], strides = [1, 1]} : vector<2x384xf32> to vector<2x128xf32>
    %101 = vector.extract_strided_slice %98 {offsets = [0, 256], sizes = [2, 128], strides = [1, 1]} : vector<2x384xf32> to vector<2x128xf32>
    %102 = vector.extract_strided_slice %92 {offsets = [0, 384], sizes = [2, 128], strides = [1, 1]} : vector<2x512xf32> to vector<2x128xf32>
    %103 = math.tanh %102 : vector<2x128xf32>
    %104 = arith.mulf %100, %63 : vector<2x128xf32>
    %105 = arith.mulf %99, %103 : vector<2x128xf32>
    %106 = arith.addf %104, %105 : vector<2x128xf32>
    %107 = math.tanh %106 : vector<2x128xf32>
    %108 = arith.mulf %101, %107 : vector<2x128xf32>
    %109 = arith.truncf %108 : vector<2x128xf32> to vector<2x128xbf16>
    %110 = tpu.concatenate %109, %90 in 1 : vector<2x128xbf16>, vector<2x128xbf16> -> vector<2x256xbf16>
    %c0_18 = arith.constant 0 : index
    %c0_19 = arith.constant 0 : index
    %111 = vector.load %arg3[%c0_18, %c0_19] : memref<256x1024xbf16, #tpu.memory_space<vmem>>, vector<256x1024xbf16>
    %cst_20 = arith.constant dense<0.000000e+00> : vector<2x1024xf32>
    %112 = tpu.matmul %110, %111, %cst_20 {dimension_numbers = #tpu.dot_dimension_numbers<[1], [0], [0], [1], [0, 0, 1, 1], [], []>} : vector<2x256xbf16>, vector<256x1024xbf16>, vector<2x1024xf32> -> vector<2x1024xf32>
    %113 = vector.extract_strided_slice %112 {offsets = [0, 0], sizes = [2, 512], strides = [1, 1]} : vector<2x1024xf32> to vector<2x512xf32>
    %114 = vector.extract_strided_slice %112 {offsets = [0, 512], sizes = [2, 512], strides = [1, 1]} : vector<2x1024xf32> to vector<2x512xf32>
    %115 = vector.broadcast %12 : vector<1x512xf32> to vector<2x512xf32>
    %116 = arith.addf %114, %115 : vector<2x512xf32>
    %117 = vector.extract_strided_slice %116 {offsets = [0, 0], sizes = [2, 384], strides = [1, 1]} : vector<2x512xf32> to vector<2x384xf32>
    %118 = arith.negf %117 : vector<2x384xf32>
    %119 = math.exp %118 : vector<2x384xf32>
    %cst_21 = arith.constant 1.000000e+00 : f32
    %120 = vector.broadcast %cst_21 : f32 to vector<2x384xf32>
    %121 = arith.addf %120, %119 : vector<2x384xf32>
    %122 = arith.divf %120, %121 : vector<2x384xf32>
    %123 = vector.extract_strided_slice %122 {offsets = [0, 0], sizes = [2, 128], strides = [1, 1]} : vector<2x384xf32> to vector<2x128xf32>
    %124 = vector.extract_strided_slice %122 {offsets = [0, 128], sizes = [2, 128], strides = [1, 1]} : vector<2x384xf32> to vector<2x128xf32>
    %125 = vector.extract_strided_slice %122 {offsets = [0, 256], sizes = [2, 128], strides = [1, 1]} : vector<2x384xf32> to vector<2x128xf32>
    %126 = vector.extract_strided_slice %116 {offsets = [0, 384], sizes = [2, 128], strides = [1, 1]} : vector<2x512xf32> to vector<2x128xf32>
    %127 = math.tanh %126 : vector<2x128xf32>
    %128 = arith.mulf %124, %87 : vector<2x128xf32>
    %129 = arith.mulf %123, %127 : vector<2x128xf32>
    %130 = arith.addf %128, %129 : vector<2x128xf32>
    %131 = math.tanh %130 : vector<2x128xf32>
    %132 = arith.mulf %125, %131 : vector<2x128xf32>
    %133 = arith.truncf %132 : vector<2x128xf32> to vector<2x128xbf16>
    %134 = vector.extract_strided_slice %11 {offsets = [6, 0], sizes = [2, 512], strides = [1, 1]} : vector<16x512xf32> to vector<2x512xf32>
    %135 = arith.addf %134, %113 : vector<2x512xf32>
    %136 = vector.extract_strided_slice %135 {offsets = [0, 0], sizes = [2, 384], strides = [1, 1]} : vector<2x512xf32> to vector<2x384xf32>
    %137 = arith.negf %136 : vector<2x384xf32>
    %138 = math.exp %137 : vector<2x384xf32>
    %cst_22 = arith.constant 1.000000e+00 : f32
    %139 = vector.broadcast %cst_22 : f32 to vector<2x384xf32>
    %140 = arith.addf %139, %138 : vector<2x384xf32>
    %141 = arith.divf %139, %140 : vector<2x384xf32>
    %142 = vector.extract_strided_slice %141 {offsets = [0, 0], sizes = [2, 128], strides = [1, 1]} : vector<2x384xf32> to vector<2x128xf32>
    %143 = vector.extract_strided_slice %141 {offsets = [0, 128], sizes = [2, 128], strides = [1, 1]} : vector<2x384xf32> to vector<2x128xf32>
    %144 = vector.extract_strided_slice %141 {offsets = [0, 256], sizes = [2, 128], strides = [1, 1]} : vector<2x384xf32> to vector<2x128xf32>
    %145 = vector.extract_strided_slice %135 {offsets = [0, 384], sizes = [2, 128], strides = [1, 1]} : vector<2x512xf32> to vector<2x128xf32>
    %146 = math.tanh %145 : vector<2x128xf32>
    %147 = arith.mulf %143, %106 : vector<2x128xf32>
    %148 = arith.mulf %142, %146 : vector<2x128xf32>
    %149 = arith.addf %147, %148 : vector<2x128xf32>
    %150 = math.tanh %149 : vector<2x128xf32>
    %151 = arith.mulf %144, %150 : vector<2x128xf32>
    %152 = arith.truncf %151 : vector<2x128xf32> to vector<2x128xbf16>
    %153 = tpu.concatenate %152, %133 in 1 : vector<2x128xbf16>, vector<2x128xbf16> -> vector<2x256xbf16>
    %c0_23 = arith.constant 0 : index
    %c0_24 = arith.constant 0 : index
    %154 = vector.load %arg3[%c0_23, %c0_24] : memref<256x1024xbf16, #tpu.memory_space<vmem>>, vector<256x1024xbf16>
    %cst_25 = arith.constant dense<0.000000e+00> : vector<2x1024xf32>
    %155 = tpu.matmul %153, %154, %cst_25 {dimension_numbers = #tpu.dot_dimension_numbers<[1], [0], [0], [1], [0, 0, 1, 1], [], []>} : vector<2x256xbf16>, vector<256x1024xbf16>, vector<2x1024xf32> -> vector<2x1024xf32>
    %156 = vector.extract_strided_slice %155 {offsets = [0, 0], sizes = [2, 512], strides = [1, 1]} : vector<2x1024xf32> to vector<2x512xf32>
    %157 = vector.extract_strided_slice %155 {offsets = [0, 512], sizes = [2, 512], strides = [1, 1]} : vector<2x1024xf32> to vector<2x512xf32>
    %158 = vector.broadcast %12 : vector<1x512xf32> to vector<2x512xf32>
    %159 = arith.addf %157, %158 : vector<2x512xf32>
    %160 = vector.extract_strided_slice %159 {offsets = [0, 0], sizes = [2, 384], strides = [1, 1]} : vector<2x512xf32> to vector<2x384xf32>
    %161 = arith.negf %160 : vector<2x384xf32>
    %162 = math.exp %161 : vector<2x384xf32>
    %cst_26 = arith.constant 1.000000e+00 : f32
    %163 = vector.broadcast %cst_26 : f32 to vector<2x384xf32>
    %164 = arith.addf %163, %162 : vector<2x384xf32>
    %165 = arith.divf %163, %164 : vector<2x384xf32>
    %166 = vector.extract_strided_slice %165 {offsets = [0, 0], sizes = [2, 128], strides = [1, 1]} : vector<2x384xf32> to vector<2x128xf32>
    %167 = vector.extract_strided_slice %165 {offsets = [0, 128], sizes = [2, 128], strides = [1, 1]} : vector<2x384xf32> to vector<2x128xf32>
    %168 = vector.extract_strided_slice %165 {offsets = [0, 256], sizes = [2, 128], strides = [1, 1]} : vector<2x384xf32> to vector<2x128xf32>
    %169 = vector.extract_strided_slice %159 {offsets = [0, 384], sizes = [2, 128], strides = [1, 1]} : vector<2x512xf32> to vector<2x128xf32>
    %170 = math.tanh %169 : vector<2x128xf32>
    %171 = arith.mulf %167, %130 : vector<2x128xf32>
    %172 = arith.mulf %166, %170 : vector<2x128xf32>
    %173 = arith.addf %171, %172 : vector<2x128xf32>
    %174 = math.tanh %173 : vector<2x128xf32>
    %175 = arith.mulf %168, %174 : vector<2x128xf32>
    %176 = arith.truncf %175 : vector<2x128xf32> to vector<2x128xbf16>
    %177 = vector.extract_strided_slice %11 {offsets = [8, 0], sizes = [2, 512], strides = [1, 1]} : vector<16x512xf32> to vector<2x512xf32>
    %178 = arith.addf %177, %156 : vector<2x512xf32>
    %179 = vector.extract_strided_slice %178 {offsets = [0, 0], sizes = [2, 384], strides = [1, 1]} : vector<2x512xf32> to vector<2x384xf32>
    %180 = arith.negf %179 : vector<2x384xf32>
    %181 = math.exp %180 : vector<2x384xf32>
    %cst_27 = arith.constant 1.000000e+00 : f32
    %182 = vector.broadcast %cst_27 : f32 to vector<2x384xf32>
    %183 = arith.addf %182, %181 : vector<2x384xf32>
    %184 = arith.divf %182, %183 : vector<2x384xf32>
    %185 = vector.extract_strided_slice %184 {offsets = [0, 0], sizes = [2, 128], strides = [1, 1]} : vector<2x384xf32> to vector<2x128xf32>
    %186 = vector.extract_strided_slice %184 {offsets = [0, 128], sizes = [2, 128], strides = [1, 1]} : vector<2x384xf32> to vector<2x128xf32>
    %187 = vector.extract_strided_slice %184 {offsets = [0, 256], sizes = [2, 128], strides = [1, 1]} : vector<2x384xf32> to vector<2x128xf32>
    %188 = vector.extract_strided_slice %178 {offsets = [0, 384], sizes = [2, 128], strides = [1, 1]} : vector<2x512xf32> to vector<2x128xf32>
    %189 = math.tanh %188 : vector<2x128xf32>
    %190 = arith.mulf %186, %149 : vector<2x128xf32>
    %191 = arith.mulf %185, %189 : vector<2x128xf32>
    %192 = arith.addf %190, %191 : vector<2x128xf32>
    %193 = math.tanh %192 : vector<2x128xf32>
    %194 = arith.mulf %187, %193 : vector<2x128xf32>
    %195 = arith.truncf %194 : vector<2x128xf32> to vector<2x128xbf16>
    %196 = tpu.concatenate %195, %176 in 1 : vector<2x128xbf16>, vector<2x128xbf16> -> vector<2x256xbf16>
    %c0_28 = arith.constant 0 : index
    %c0_29 = arith.constant 0 : index
    %197 = vector.load %arg3[%c0_28, %c0_29] : memref<256x1024xbf16, #tpu.memory_space<vmem>>, vector<256x1024xbf16>
    %cst_30 = arith.constant dense<0.000000e+00> : vector<2x1024xf32>
    %198 = tpu.matmul %196, %197, %cst_30 {dimension_numbers = #tpu.dot_dimension_numbers<[1], [0], [0], [1], [0, 0, 1, 1], [], []>} : vector<2x256xbf16>, vector<256x1024xbf16>, vector<2x1024xf32> -> vector<2x1024xf32>
    %199 = vector.extract_strided_slice %198 {offsets = [0, 0], sizes = [2, 512], strides = [1, 1]} : vector<2x1024xf32> to vector<2x512xf32>
    %200 = vector.extract_strided_slice %198 {offsets = [0, 512], sizes = [2, 512], strides = [1, 1]} : vector<2x1024xf32> to vector<2x512xf32>
    %201 = vector.broadcast %12 : vector<1x512xf32> to vector<2x512xf32>
    %202 = arith.addf %200, %201 : vector<2x512xf32>
    %203 = vector.extract_strided_slice %202 {offsets = [0, 0], sizes = [2, 384], strides = [1, 1]} : vector<2x512xf32> to vector<2x384xf32>
    %204 = arith.negf %203 : vector<2x384xf32>
    %205 = math.exp %204 : vector<2x384xf32>
    %cst_31 = arith.constant 1.000000e+00 : f32
    %206 = vector.broadcast %cst_31 : f32 to vector<2x384xf32>
    %207 = arith.addf %206, %205 : vector<2x384xf32>
    %208 = arith.divf %206, %207 : vector<2x384xf32>
    %209 = vector.extract_strided_slice %208 {offsets = [0, 0], sizes = [2, 128], strides = [1, 1]} : vector<2x384xf32> to vector<2x128xf32>
    %210 = vector.extract_strided_slice %208 {offsets = [0, 128], sizes = [2, 128], strides = [1, 1]} : vector<2x384xf32> to vector<2x128xf32>
    %211 = vector.extract_strided_slice %208 {offsets = [0, 256], sizes = [2, 128], strides = [1, 1]} : vector<2x384xf32> to vector<2x128xf32>
    %212 = vector.extract_strided_slice %202 {offsets = [0, 384], sizes = [2, 128], strides = [1, 1]} : vector<2x512xf32> to vector<2x128xf32>
    %213 = math.tanh %212 : vector<2x128xf32>
    %214 = arith.mulf %210, %173 : vector<2x128xf32>
    %215 = arith.mulf %209, %213 : vector<2x128xf32>
    %216 = arith.addf %214, %215 : vector<2x128xf32>
    %217 = math.tanh %216 : vector<2x128xf32>
    %218 = arith.mulf %211, %217 : vector<2x128xf32>
    %219 = arith.truncf %218 : vector<2x128xf32> to vector<2x128xbf16>
    %220 = vector.extract_strided_slice %11 {offsets = [10, 0], sizes = [2, 512], strides = [1, 1]} : vector<16x512xf32> to vector<2x512xf32>
    %221 = arith.addf %220, %199 : vector<2x512xf32>
    %222 = vector.extract_strided_slice %221 {offsets = [0, 0], sizes = [2, 384], strides = [1, 1]} : vector<2x512xf32> to vector<2x384xf32>
    %223 = arith.negf %222 : vector<2x384xf32>
    %224 = math.exp %223 : vector<2x384xf32>
    %cst_32 = arith.constant 1.000000e+00 : f32
    %225 = vector.broadcast %cst_32 : f32 to vector<2x384xf32>
    %226 = arith.addf %225, %224 : vector<2x384xf32>
    %227 = arith.divf %225, %226 : vector<2x384xf32>
    %228 = vector.extract_strided_slice %227 {offsets = [0, 0], sizes = [2, 128], strides = [1, 1]} : vector<2x384xf32> to vector<2x128xf32>
    %229 = vector.extract_strided_slice %227 {offsets = [0, 128], sizes = [2, 128], strides = [1, 1]} : vector<2x384xf32> to vector<2x128xf32>
    %230 = vector.extract_strided_slice %227 {offsets = [0, 256], sizes = [2, 128], strides = [1, 1]} : vector<2x384xf32> to vector<2x128xf32>
    %231 = vector.extract_strided_slice %221 {offsets = [0, 384], sizes = [2, 128], strides = [1, 1]} : vector<2x512xf32> to vector<2x128xf32>
    %232 = math.tanh %231 : vector<2x128xf32>
    %233 = arith.mulf %229, %192 : vector<2x128xf32>
    %234 = arith.mulf %228, %232 : vector<2x128xf32>
    %235 = arith.addf %233, %234 : vector<2x128xf32>
    %236 = math.tanh %235 : vector<2x128xf32>
    %237 = arith.mulf %230, %236 : vector<2x128xf32>
    %238 = arith.truncf %237 : vector<2x128xf32> to vector<2x128xbf16>
    %239 = tpu.concatenate %238, %219 in 1 : vector<2x128xbf16>, vector<2x128xbf16> -> vector<2x256xbf16>
    %c0_33 = arith.constant 0 : index
    %c0_34 = arith.constant 0 : index
    %240 = vector.load %arg3[%c0_33, %c0_34] : memref<256x1024xbf16, #tpu.memory_space<vmem>>, vector<256x1024xbf16>
    %cst_35 = arith.constant dense<0.000000e+00> : vector<2x1024xf32>
    %241 = tpu.matmul %239, %240, %cst_35 {dimension_numbers = #tpu.dot_dimension_numbers<[1], [0], [0], [1], [0, 0, 1, 1], [], []>} : vector<2x256xbf16>, vector<256x1024xbf16>, vector<2x1024xf32> -> vector<2x1024xf32>
    %242 = vector.extract_strided_slice %241 {offsets = [0, 0], sizes = [2, 512], strides = [1, 1]} : vector<2x1024xf32> to vector<2x512xf32>
    %243 = vector.extract_strided_slice %241 {offsets = [0, 512], sizes = [2, 512], strides = [1, 1]} : vector<2x1024xf32> to vector<2x512xf32>
    %244 = vector.broadcast %12 : vector<1x512xf32> to vector<2x512xf32>
    %245 = arith.addf %243, %244 : vector<2x512xf32>
    %246 = vector.extract_strided_slice %245 {offsets = [0, 0], sizes = [2, 384], strides = [1, 1]} : vector<2x512xf32> to vector<2x384xf32>
    %247 = arith.negf %246 : vector<2x384xf32>
    %248 = math.exp %247 : vector<2x384xf32>
    %cst_36 = arith.constant 1.000000e+00 : f32
    %249 = vector.broadcast %cst_36 : f32 to vector<2x384xf32>
    %250 = arith.addf %249, %248 : vector<2x384xf32>
    %251 = arith.divf %249, %250 : vector<2x384xf32>
    %252 = vector.extract_strided_slice %251 {offsets = [0, 0], sizes = [2, 128], strides = [1, 1]} : vector<2x384xf32> to vector<2x128xf32>
    %253 = vector.extract_strided_slice %251 {offsets = [0, 128], sizes = [2, 128], strides = [1, 1]} : vector<2x384xf32> to vector<2x128xf32>
    %254 = vector.extract_strided_slice %251 {offsets = [0, 256], sizes = [2, 128], strides = [1, 1]} : vector<2x384xf32> to vector<2x128xf32>
    %255 = vector.extract_strided_slice %245 {offsets = [0, 384], sizes = [2, 128], strides = [1, 1]} : vector<2x512xf32> to vector<2x128xf32>
    %256 = math.tanh %255 : vector<2x128xf32>
    %257 = arith.mulf %253, %216 : vector<2x128xf32>
    %258 = arith.mulf %252, %256 : vector<2x128xf32>
    %259 = arith.addf %257, %258 : vector<2x128xf32>
    %260 = math.tanh %259 : vector<2x128xf32>
    %261 = arith.mulf %254, %260 : vector<2x128xf32>
    %262 = arith.truncf %261 : vector<2x128xf32> to vector<2x128xbf16>
    %263 = vector.extract_strided_slice %11 {offsets = [12, 0], sizes = [2, 512], strides = [1, 1]} : vector<16x512xf32> to vector<2x512xf32>
    %264 = arith.addf %263, %242 : vector<2x512xf32>
    %265 = vector.extract_strided_slice %264 {offsets = [0, 0], sizes = [2, 384], strides = [1, 1]} : vector<2x512xf32> to vector<2x384xf32>
    %266 = arith.negf %265 : vector<2x384xf32>
    %267 = math.exp %266 : vector<2x384xf32>
    %cst_37 = arith.constant 1.000000e+00 : f32
    %268 = vector.broadcast %cst_37 : f32 to vector<2x384xf32>
    %269 = arith.addf %268, %267 : vector<2x384xf32>
    %270 = arith.divf %268, %269 : vector<2x384xf32>
    %271 = vector.extract_strided_slice %270 {offsets = [0, 0], sizes = [2, 128], strides = [1, 1]} : vector<2x384xf32> to vector<2x128xf32>
    %272 = vector.extract_strided_slice %270 {offsets = [0, 128], sizes = [2, 128], strides = [1, 1]} : vector<2x384xf32> to vector<2x128xf32>
    %273 = vector.extract_strided_slice %270 {offsets = [0, 256], sizes = [2, 128], strides = [1, 1]} : vector<2x384xf32> to vector<2x128xf32>
    %274 = vector.extract_strided_slice %264 {offsets = [0, 384], sizes = [2, 128], strides = [1, 1]} : vector<2x512xf32> to vector<2x128xf32>
    %275 = math.tanh %274 : vector<2x128xf32>
    %276 = arith.mulf %272, %235 : vector<2x128xf32>
    %277 = arith.mulf %271, %275 : vector<2x128xf32>
    %278 = arith.addf %276, %277 : vector<2x128xf32>
    %279 = math.tanh %278 : vector<2x128xf32>
    %280 = arith.mulf %273, %279 : vector<2x128xf32>
    %281 = arith.truncf %280 : vector<2x128xf32> to vector<2x128xbf16>
    %282 = tpu.concatenate %281, %262 in 1 : vector<2x128xbf16>, vector<2x128xbf16> -> vector<2x256xbf16>
    %c0_38 = arith.constant 0 : index
    %c0_39 = arith.constant 0 : index
    %283 = vector.load %arg3[%c0_38, %c0_39] : memref<256x1024xbf16, #tpu.memory_space<vmem>>, vector<256x1024xbf16>
    %cst_40 = arith.constant dense<0.000000e+00> : vector<2x1024xf32>
    %284 = tpu.matmul %282, %283, %cst_40 {dimension_numbers = #tpu.dot_dimension_numbers<[1], [0], [0], [1], [0, 0, 1, 1], [], []>} : vector<2x256xbf16>, vector<256x1024xbf16>, vector<2x1024xf32> -> vector<2x1024xf32>
    %285 = vector.extract_strided_slice %284 {offsets = [0, 0], sizes = [2, 512], strides = [1, 1]} : vector<2x1024xf32> to vector<2x512xf32>
    %286 = vector.extract_strided_slice %284 {offsets = [0, 512], sizes = [2, 512], strides = [1, 1]} : vector<2x1024xf32> to vector<2x512xf32>
    %287 = vector.broadcast %12 : vector<1x512xf32> to vector<2x512xf32>
    %288 = arith.addf %286, %287 : vector<2x512xf32>
    %289 = vector.extract_strided_slice %288 {offsets = [0, 0], sizes = [2, 384], strides = [1, 1]} : vector<2x512xf32> to vector<2x384xf32>
    %290 = arith.negf %289 : vector<2x384xf32>
    %291 = math.exp %290 : vector<2x384xf32>
    %cst_41 = arith.constant 1.000000e+00 : f32
    %292 = vector.broadcast %cst_41 : f32 to vector<2x384xf32>
    %293 = arith.addf %292, %291 : vector<2x384xf32>
    %294 = arith.divf %292, %293 : vector<2x384xf32>
    %295 = vector.extract_strided_slice %294 {offsets = [0, 0], sizes = [2, 128], strides = [1, 1]} : vector<2x384xf32> to vector<2x128xf32>
    %296 = vector.extract_strided_slice %294 {offsets = [0, 128], sizes = [2, 128], strides = [1, 1]} : vector<2x384xf32> to vector<2x128xf32>
    %297 = vector.extract_strided_slice %294 {offsets = [0, 256], sizes = [2, 128], strides = [1, 1]} : vector<2x384xf32> to vector<2x128xf32>
    %298 = vector.extract_strided_slice %288 {offsets = [0, 384], sizes = [2, 128], strides = [1, 1]} : vector<2x512xf32> to vector<2x128xf32>
    %299 = math.tanh %298 : vector<2x128xf32>
    %300 = arith.mulf %296, %259 : vector<2x128xf32>
    %301 = arith.mulf %295, %299 : vector<2x128xf32>
    %302 = arith.addf %300, %301 : vector<2x128xf32>
    %303 = math.tanh %302 : vector<2x128xf32>
    %304 = arith.mulf %297, %303 : vector<2x128xf32>
    %305 = arith.truncf %304 : vector<2x128xf32> to vector<2x128xbf16>
    %306 = vector.extract_strided_slice %11 {offsets = [14, 0], sizes = [2, 512], strides = [1, 1]} : vector<16x512xf32> to vector<2x512xf32>
    %307 = arith.addf %306, %285 : vector<2x512xf32>
    %308 = vector.extract_strided_slice %307 {offsets = [0, 0], sizes = [2, 384], strides = [1, 1]} : vector<2x512xf32> to vector<2x384xf32>
    %309 = arith.negf %308 : vector<2x384xf32>
    %310 = math.exp %309 : vector<2x384xf32>
    %cst_42 = arith.constant 1.000000e+00 : f32
    %311 = vector.broadcast %cst_42 : f32 to vector<2x384xf32>
    %312 = arith.addf %311, %310 : vector<2x384xf32>
    %313 = arith.divf %311, %312 : vector<2x384xf32>
    %314 = vector.extract_strided_slice %313 {offsets = [0, 0], sizes = [2, 128], strides = [1, 1]} : vector<2x384xf32> to vector<2x128xf32>
    %315 = vector.extract_strided_slice %313 {offsets = [0, 128], sizes = [2, 128], strides = [1, 1]} : vector<2x384xf32> to vector<2x128xf32>
    %316 = vector.extract_strided_slice %313 {offsets = [0, 256], sizes = [2, 128], strides = [1, 1]} : vector<2x384xf32> to vector<2x128xf32>
    %317 = vector.extract_strided_slice %307 {offsets = [0, 384], sizes = [2, 128], strides = [1, 1]} : vector<2x512xf32> to vector<2x128xf32>
    %318 = math.tanh %317 : vector<2x128xf32>
    %319 = arith.mulf %315, %278 : vector<2x128xf32>
    %320 = arith.mulf %314, %318 : vector<2x128xf32>
    %321 = arith.addf %319, %320 : vector<2x128xf32>
    %322 = math.tanh %321 : vector<2x128xf32>
    %323 = arith.mulf %316, %322 : vector<2x128xf32>
    %324 = arith.truncf %323 : vector<2x128xf32> to vector<2x128xbf16>
    %325 = tpu.concatenate %324, %305 in 1 : vector<2x128xbf16>, vector<2x128xbf16> -> vector<2x256xbf16>
    %c0_43 = arith.constant 0 : index
    %c512 = arith.constant 512 : index
    %326 = vector.load %arg3[%c0_43, %c512] : memref<256x1024xbf16, #tpu.memory_space<vmem>>, vector<256x512xbf16>
    %cst_44 = arith.constant dense<0.000000e+00> : vector<2x512xf32>
    %327 = tpu.matmul %325, %326, %cst_44 {dimension_numbers = #tpu.dot_dimension_numbers<[1], [0], [0], [1], [0, 0, 1, 1], [], []>} : vector<2x256xbf16>, vector<256x512xbf16>, vector<2x512xf32> -> vector<2x512xf32>
    %328 = vector.broadcast %12 : vector<1x512xf32> to vector<2x512xf32>
    %329 = arith.addf %327, %328 : vector<2x512xf32>
    %330 = vector.extract_strided_slice %329 {offsets = [0, 0], sizes = [2, 384], strides = [1, 1]} : vector<2x512xf32> to vector<2x384xf32>
    %331 = arith.negf %330 : vector<2x384xf32>
    %332 = math.exp %331 : vector<2x384xf32>
    %cst_45 = arith.constant 1.000000e+00 : f32
    %333 = vector.broadcast %cst_45 : f32 to vector<2x384xf32>
    %334 = arith.addf %333, %332 : vector<2x384xf32>
    %335 = arith.divf %333, %334 : vector<2x384xf32>
    %336 = vector.extract_strided_slice %335 {offsets = [0, 0], sizes = [2, 128], strides = [1, 1]} : vector<2x384xf32> to vector<2x128xf32>
    %337 = vector.extract_strided_slice %335 {offsets = [0, 128], sizes = [2, 128], strides = [1, 1]} : vector<2x384xf32> to vector<2x128xf32>
    %338 = vector.extract_strided_slice %335 {offsets = [0, 256], sizes = [2, 128], strides = [1, 1]} : vector<2x384xf32> to vector<2x128xf32>
    %339 = vector.extract_strided_slice %329 {offsets = [0, 384], sizes = [2, 128], strides = [1, 1]} : vector<2x512xf32> to vector<2x128xf32>
    %340 = math.tanh %339 : vector<2x128xf32>
    %341 = arith.mulf %337, %302 : vector<2x128xf32>
    %342 = arith.mulf %336, %340 : vector<2x128xf32>
    %343 = arith.addf %341, %342 : vector<2x128xf32>
    %344 = math.tanh %343 : vector<2x128xf32>
    %345 = arith.mulf %338, %344 : vector<2x128xf32>
    %c0_i32_46 = arith.constant 0 : i32
    %346 = tpu.memref_slice %arg15[%c0_i32_46] : memref<3x!tpu.dma_semaphore, #tpu.memory_space<semaphore_mem>> -> memref<1x!tpu.dma_semaphore, #tpu.memory_space<semaphore_mem>>
    %347 = tpu.memref_squeeze %346 : memref<1x!tpu.dma_semaphore, #tpu.memory_space<semaphore_mem>> -> memref<!tpu.dma_semaphore, #tpu.memory_space<semaphore_mem>>
    tpu.wait_dma2 semaphore(%347 : memref<!tpu.dma_semaphore, #tpu.memory_space<semaphore_mem>>) src(%arg8 : memref<128x512xbf16, #tpu.memory_space<any>>) dst(%arg12 : memref<128x512xbf16, #tpu.memory_space<vmem>>)
    %c1_i32_47 = arith.constant 1 : i32
    %348 = tpu.memref_slice %arg15[%c1_i32_47] : memref<3x!tpu.dma_semaphore, #tpu.memory_space<semaphore_mem>> -> memref<1x!tpu.dma_semaphore, #tpu.memory_space<semaphore_mem>>
    %349 = tpu.memref_squeeze %348 : memref<1x!tpu.dma_semaphore, #tpu.memory_space<semaphore_mem>> -> memref<!tpu.dma_semaphore, #tpu.memory_space<semaphore_mem>>
    tpu.wait_dma2 semaphore(%349 : memref<!tpu.dma_semaphore, #tpu.memory_space<semaphore_mem>>) src(%arg9 : memref<512x384xbf16, #tpu.memory_space<any>>) dst(%arg13 : memref<512x384xbf16, #tpu.memory_space<vmem>>)
    %c2_i32_48 = arith.constant 2 : i32
    %350 = tpu.memref_slice %arg15[%c2_i32_48] : memref<3x!tpu.dma_semaphore, #tpu.memory_space<semaphore_mem>> -> memref<1x!tpu.dma_semaphore, #tpu.memory_space<semaphore_mem>>
    %351 = tpu.memref_squeeze %350 : memref<1x!tpu.dma_semaphore, #tpu.memory_space<semaphore_mem>> -> memref<!tpu.dma_semaphore, #tpu.memory_space<semaphore_mem>>
    tpu.wait_dma2 semaphore(%351 : memref<!tpu.dma_semaphore, #tpu.memory_space<semaphore_mem>>) src(%arg10 : memref<384x128xbf16, #tpu.memory_space<any>>) dst(%arg14 : memref<384x128xbf16, #tpu.memory_space<vmem>>)
    %352 = arith.truncf %345 : vector<2x128xf32> to vector<2x128xbf16>
    %c0_49 = arith.constant 0 : index
    %c0_50 = arith.constant 0 : index
    %353 = vector.load %arg12[%c0_49, %c0_50] : memref<128x512xbf16, #tpu.memory_space<vmem>>, vector<128x512xbf16>
    %cst_51 = arith.constant dense<0.000000e+00> : vector<2x512xf32>
    %354 = tpu.matmul %352, %353, %cst_51 {dimension_numbers = #tpu.dot_dimension_numbers<[1], [0], [0], [1], [0, 0, 1, 1], [], []>} : vector<2x128xbf16>, vector<128x512xbf16>, vector<2x512xf32> -> vector<2x512xf32>
    %c0_52 = arith.constant 0 : index
    %c0_53 = arith.constant 0 : index
    %355 = vector.load %arg5[%c0_52, %c0_53] : memref<1x512xf32, #tpu.memory_space<vmem>>, vector<1x512xf32>
    %356 = vector.broadcast %355 : vector<1x512xf32> to vector<2x512xf32>
    %357 = arith.addf %354, %356 : vector<2x512xf32>
    %cst_54 = arith.constant 0.000000e+00 : f32
    %358 = vector.broadcast %cst_54 : f32 to vector<2x512xf32>
    %359 = arith.maximumf %357, %358 : vector<2x512xf32>
    %360 = arith.truncf %359 : vector<2x512xf32> to vector<2x512xbf16>
    %c0_55 = arith.constant 0 : index
    %c0_56 = arith.constant 0 : index
    %361 = vector.load %arg13[%c0_55, %c0_56] : memref<512x384xbf16, #tpu.memory_space<vmem>>, vector<512x384xbf16>
    %cst_57 = arith.constant dense<0.000000e+00> : vector<2x384xf32>
    %362 = tpu.matmul %360, %361, %cst_57 {dimension_numbers = #tpu.dot_dimension_numbers<[1], [0], [0], [1], [0, 0, 1, 1], [], []>} : vector<2x512xbf16>, vector<512x384xbf16>, vector<2x384xf32> -> vector<2x384xf32>
    %c0_58 = arith.constant 0 : index
    %c0_59 = arith.constant 0 : index
    %363 = vector.load %arg6[%c0_58, %c0_59] : memref<1x384xf32, #tpu.memory_space<vmem>>, vector<1x384xf32>
    %364 = vector.broadcast %363 : vector<1x384xf32> to vector<2x384xf32>
    %365 = arith.addf %362, %364 : vector<2x384xf32>
    %cst_60 = arith.constant 0.000000e+00 : f32
    %366 = vector.broadcast %cst_60 : f32 to vector<2x384xf32>
    %367 = arith.maximumf %365, %366 : vector<2x384xf32>
    %368 = arith.truncf %367 : vector<2x384xf32> to vector<2x384xbf16>
    %c0_61 = arith.constant 0 : index
    %c0_62 = arith.constant 0 : index
    %369 = vector.load %arg14[%c0_61, %c0_62] : memref<384x128xbf16, #tpu.memory_space<vmem>>, vector<384x128xbf16>
    %cst_63 = arith.constant dense<0.000000e+00> : vector<2x128xf32>
    %370 = tpu.matmul %368, %369, %cst_63 {dimension_numbers = #tpu.dot_dimension_numbers<[1], [0], [0], [1], [0, 0, 1, 1], [], []>} : vector<2x384xbf16>, vector<384x128xbf16>, vector<2x128xf32> -> vector<2x128xf32>
    %c0_64 = arith.constant 0 : index
    %c0_65 = arith.constant 0 : index
    %371 = vector.load %arg7[%c0_64, %c0_65] : memref<1x128xf32, #tpu.memory_space<vmem>>, vector<1x128xf32>
    %372 = vector.broadcast %371 : vector<1x128xf32> to vector<2x128xf32>
    %373 = arith.addf %370, %372 : vector<2x128xf32>
    %374 = math.tanh %373 : vector<2x128xf32>
    %cst_66 = arith.constant 2.000000e+00 : f32
    %375 = vector.broadcast %cst_66 : f32 to vector<2x128xf32>
    %376 = arith.mulf %374, %375 : vector<2x128xf32>
    %c0_67 = arith.constant 0 : index
    %c0_68 = arith.constant 0 : index
    %377 = vector.load %arg11[%c0_67, %c0_68] : memref<2x128xf32, #tpu.memory_space<vmem>>, vector<2x128xf32>
    tpu.vector_store %arg11[%c0_67, %c0_68], %376 {strides = array<i32>} : memref<2x128xf32, #tpu.memory_space<vmem>>, vector<2x128xf32>,
    return
  }
}

</mosaic_0001>

<bundles_post_ra>
// kernel: tpu_custom_call.1
= control target key start
LH: loop header
LB: loop body
LE: loop exit
PB: predicated region body
PF: predicated region fallthrough
CT: control target
= control target key end

     0   :  { %16 = vsyncpa [#allocation7], 0  ;;  %s6193_s0 = inlined_call_operand.hbm [shape: bf16[16,16], index: 0, kind: input, shape index: {}]   ;;  %s6194_s1 = inlined_call_operand.hbm [shape: bf16[16,512], index: 1, kind: input, shape index: {}]   ;;  %s6195_s2 = inlined_call_operand.vmem [shape: f32[1,512], index: 2, kind: input, shape index: {}]   ;;  %s6196_s3 = inlined_call_operand.hbm [shape: bf16[256,1024], index: 3, kind: input, shape index: {}]   ;;  %s6197_s4 = inlined_call_operand.vmem [shape: f32[1,512], index: 4, kind: input, shape index: {}]   ;;  %s6198_s5 = inlined_call_operand.vmem [shape: f32[1,512], index: 5, kind: input, shape index: {}]   ;;  %s6199_s6 = inlined_call_operand.vmem [shape: f32[1,384], index: 6, kind: input, shape index: {}]   ;;  %s6200_s7 = inlined_call_operand.vmem [shape: f32[1,128], index: 7, kind: input, shape index: {}]   ;;  %s6201_s8 = inlined_call_operand.hbm [shape: bf16[128,512], index: 8, kind: input, shape index: {}]   ;;  %s6202_s9 = inlined_call_operand.hbm [shape: bf16[512,384], index: 9, kind: input, shape index: {}]   ;;  %s6203_s10 = inlined_call_operand.hbm [shape: bf16[384,128], index: 10, kind: input, shape index: {}]   ;;  %s6204_s11 = inlined_call_operand.hbm [shape: f32[2,128], index: 11, kind: output, shape index: {}]  }
   0x1   :  { %17 = vsyncpa [#allocation10], 0 }
   0x2   :  { %18 = vsyncpa [#allocation8], 0  ;;  %s4622_s17 = smov [#allocation9]   ;;  %s4500_s21 = scalar_lea.hbm %s6194_s1, 512 }
   0x3   :  { %s36_s18 = sshll.u32 %s4622_s17, 4  ;;  %p4501_p0 = scmp.ne.s32.totalorder %s6194_s1, %s4500_s21  ;;  %s37_s18 = int_to_ptr.vmem [resolvable:$true] %s36_s18 }
   0x4   :  { %p4504_p1 = scmp.lt.u32.totalorder %s4500_s21, %s6194_s1 }
   0x6   :  { %p4506_p2 = pnand %p4504_p1, %p4501_p0 }
   0x8   :  { %4509 = shalt.err (!%p4506_p2)
}
   0x9   :  { %s4510_s26 = scalar_lea.vmem %s37_s18, 512  ;;  %p4515_p4 = scmp.lt.s32.totalorder %s37_s18, %s37_s18 }
   0xa   :  { %p4511_p3 = scmp.ne.s32.totalorder %s37_s18, %s4510_s26  ;;  %p4516_p5 = scmp.lt.s32.totalorder %s4510_s26, %s4510_s26 }
   0xc   :  { %p4517_p6 = por %p4516_p5, %p4515_p4 }
   0xe   :  { %p4518_p7 = pnand %p4517_p6, %p4511_p3 }
  0x10   :  { %4521 = shalt.err (!%p4518_p7)
}
  0x11   :  { %s4623_s27 = smov 256   ;;  %s4624_s28 = smov 16  }
  0x12   :  { %42 = dma.hbm_to_vmem [thread:$0]  %s6194_s1, 512, %s37_s18, [#allocation10], %s4623_s27, %s4623_s27, %s4624_s28  }
  0x13   :  { %s4625_s12 = smov [#allocation6]   ;;  %s4522_s16 = scalar_lea.hbm %s6193_s0, 128 }
  0x14   :  { %s24_s13 = sshll.u32 %s4625_s12, 4  ;;  %p4523_p8 = scmp.ne.s32.totalorder %s6193_s0, %s4522_s16  ;;  %s25_s13 = int_to_ptr.vmem [resolvable:$true] %s24_s13 }
  0x15   :  { %p4526_p9 = scmp.lt.u32.totalorder %s4522_s16, %s6193_s0 }
  0x17   :  { %p4528_p10 = pnand %p4526_p9, %p4523_p8 }
  0x19   :  { %4531 = shalt.err (!%p4528_p10)
}
  0x1a   :  { %s4532_s22 = scalar_lea.vmem %s25_s13, 128  ;;  %p4537_p12 = scmp.lt.s32.totalorder %s25_s13, %s25_s13 }
  0x1b   :  { %p4533_p11 = scmp.ne.s32.totalorder %s25_s13, %s4532_s22  ;;  %p4538_p13 = scmp.lt.s32.totalorder %s4532_s22, %s4532_s22 }
  0x1d   :  { %p4539_p0 = por %p4538_p13, %p4537_p12 }
  0x1f   :  { %p4540_p1 = pnand %p4539_p0, %p4533_p11 }
  0x21   :  { %4543 = shalt.err (!%p4540_p1)
}
  0x22   :  { %s4626_s1 = smov 64   ;;  %s4627_s18 = smov 4  }
  0x23   :  { %30 = dma.hbm_to_vmem [thread:$0]  %s6193_s0, 128, %s25_s13, [#allocation7], %s4626_s1, %s4626_s1, %s4627_s18  }
  0x24   :  { %s4628_s25 = smov [#allocation11]   ;;  %s4544_s30 = scalar_lea.hbm %s6196_s3, 16384 }
  0x25   :  { %s50_s26 = sshll.u32 %s4628_s25, 4  ;;  %p4545_p2 = scmp.ne.s32.totalorder %s6196_s3, %s4544_s30  ;;  %s51_s26 = int_to_ptr.vmem [resolvable:$true] %s50_s26 }
  0x26   :  { %p4548_p3 = scmp.lt.u32.totalorder %s4544_s30, %s6196_s3 }
  0x28   :  { %p4550_p4 = pnand %p4548_p3, %p4545_p2 }
  0x2a   :  { %4553 = shalt.err (!%p4550_p4)
}
  0x2b   :  { %s4554_s17 = scalar_lea.vmem %s51_s26, 16384  ;;  %p4559_p6 = scmp.lt.s32.totalorder %s51_s26, %s51_s26 }
  0x2c   :  { %p4555_p5 = scmp.ne.s32.totalorder %s51_s26, %s4554_s17  ;;  %p4560_p7 = scmp.lt.s32.totalorder %s4554_s17, %s4554_s17 }
  0x2e   :  { %p4561_p8 = por %p4560_p7, %p4559_p6 }
  0x30   :  { %p4562_p9 = pnand %p4561_p8, %p4555_p5 }
  0x32   :  { %4565 = shalt.err (!%p4562_p9)
}
  0x33   :  { %s4629_s0 = smov 512   ;;  %s4630_s13 = smov 32  }
  0x34   :  { %56 = dma.hbm_to_vmem [thread:$0]  %s6196_s3, 16384, %s51_s26, [#allocation10], %s4629_s0, %s4629_s0, %s4630_s13  }
  0x35   :  { %4610 = dma.done.wait [#allocation7], 128  }
  0x36   :  { %4611 = vsyncadd [#allocation7], 4294967168 }
  0x37   :  { %4612 = dma.done.wait [#allocation10], 16896  }
  0x38   :  { %4613 = vsyncadd [#allocation10], 4294950400  ;;  %s79_s21 = sld [smem:[#allocation0]]   ;;  %91 = sst [smem:[#allocation14]] %s4629_s0  ;;  %v6205_v0 = vmov 0   ;;  %vm210_vm0 = vcmask 130048   ;;  %v165_v6 = vlaneseq }
  0x39   :  { %246 = vmatprep.mubr.bf16.mxu0 %v6205_v0  ;;  %289 = vmatprep.mubr.bf16.mxu1 %v6205_v0  ;;  %93 = sst [smem:[#allocation14 + $0x1]] %s4629_s0  ;;  %s4632_s22 = smov [#allocation2]  }
  0x3a   :  { %s87_s23 = sshll.u32 %s4632_s22, 4  ;;  %95 = sst [smem:[#allocation14 + $0x2]] %s4627_s18  ;;  %v4768_v12 = vshrl.u32 %v165_v6, 7  ;;  %s88_s23 = int_to_ptr.vmem [resolvable:$true] %s87_s23 }
  0x3b   :  { %97 = sst [smem:[#allocation14 + $0x3]] %s4626_s1  ;;  %s4633_s25 = smov 128  }
  0x3c   :  { %103 = sst [smem:[#allocation14 + $0x6]] %s4623_s27  ;;  %s4634_s26 = smov 2   ;;  %v4782_v21 = vsub.s32 1, %v4768_v12 }
  0x3d   :  { %105 = sst [smem:[#allocation14 + $0x7]] %s4626_s1  ;;  %s4635_s28 = smov [#allocation5]  }
  0x3e   :  { %s3864_s3 = sshll.u32 %s79_s21, 26  ;;  %107 = sst [smem:[#allocation14 + $0x8]] %s4627_s18 }
  0x3f   :  { %s3865_s24 = sadd.s32 134217728, %s3864_s3  ;;  %99 = sst [smem:[#allocation14 + $0x4]] %s4633_s25 }
  0x40   :  { %101 = sst [smem:[#allocation14 + $0x5]] %s4634_s26  ;;  %s4636_s29 = smov [#allocation13]  }
  0x41   :  { %109 = dma.general %s6201_s8, 4096, %s88_s23, %s4635_s28, %s4636_s29, [#allocation14], %s3865_s24, 0  }
  0x42   :  { %s4637_s14 = smov 384   ;;  %s4638_s27 = smov 3  }
  0x43   :  { %126 = sst [smem:[#allocation16]] %s4637_s14  ;;  %s4639_s15 = smov [#allocation3]  }
  0x44   :  { %128 = sst [smem:[#allocation16 + $0x1]] %s4637_s14  ;;  %s122_s16 = sshll.u32 %s4639_s15, 4  ;;  %s123_s16 = int_to_ptr.vmem [resolvable:$true] %s122_s16 }
  0x45   :  { %130 = sst [smem:[#allocation16 + $0x2]] %s4638_s27  ;;  %s4640_s17 = smov 192  }
  0x46   :  { %132 = sst [smem:[#allocation16 + $0x3]] %s4626_s1  ;;  %s4641_s0 = smov [#allocation5 + $0x1]  }
  0x47   :  { %134 = sst [smem:[#allocation16 + $0x4]] %s4633_s25  ;;  %s4642_s8 = smov [#allocation15]  }
  0x48   :  { %136 = sst [smem:[#allocation16 + $0x5]] %s4634_s26  ;;  %s4566_s23 = scalar_lea.hbm %s6203_s10, 3072 }
  0x49   :  { %138 = sst [smem:[#allocation16 + $0x6]] %s4640_s17  ;;  %p4567_p10 = scmp.ne.s32.totalorder %s6203_s10, %s4566_s23 }
  0x4a   :  { %140 = sst [smem:[#allocation16 + $0x7]] %s4626_s1  ;;  %p4570_p11 = scmp.lt.u32.totalorder %s4566_s23, %s6203_s10 }
  0x4b   :  { %142 = sst [smem:[#allocation16 + $0x8]] %s4627_s18 }
  0x4c   :  { %144 = dma.general %s6202_s9, 12288, %s123_s16, %s4641_s0, %s4642_s8, [#allocation16], %s3865_s24, 0  }
  0x4d   :  { %v4243_v1 = vld [vmem:[#allocation9 + $0x4] ss:$16 sps:$4 sm:$0xff]   ;;  %v4245_v2 = vld [vmem:[#allocation9] ss:$16 sps:$4 sm:$0xff]   ;;  %v4246_v3 = vld [vmem:[#allocation6] sm:$0xff]   ;;  %6510 = vst [vmem:[#allocation32_spill] sm:$0xff] %v4782_v21  ;;  %p4572_p12 = pnand %p4570_p11, %p4567_p10 }
  0x4e   :  { %214 = vmatprep.subr.bf16.mxu0 %v4243_v1  ;;  %v4247_v4 = vld [vmem:[#allocation9 + $0xc] ss:$16 sps:$4 sm:$0xff]   ;;  %v4249_v5 = vld [vmem:[#allocation9 + $0x8] ss:$16 sps:$4 sm:$0xff]   ;;  %v318_v7 = vld [vmem:[#allocation11] sm:$0xff] }
  0x4f   :  { %215 = vmatpush1.bf16.msra.mxu0 %v4245_v2  ;;  %257 = vmatprep.subr.bf16.mxu1 %v4247_v4  ;;  %v322_v8 = vld [vmem:[#allocation11 + $0x20] sm:$0xff]  ;;  %v319_v9 = vld [vmem:[#allocation11 + $0x8] sm:$0xff]  ;;  %v4794_v25 = vld [vmem:[%s6197_s4] sm:$0xf] }
  0x50   :  { %258 = vmatpush1.bf16.msra.mxu1 %v4249_v5  ;;  %v4766_v10 = vcombine.high %v318_v7, %v322_v8  ;;  %v323_v11 = vld [vmem:[#allocation11 + $0x28] sm:$0xff]  ;;  %v4770_v13 = vcombine.low %v318_v7, %v322_v8  ;;  %v326_v16 = vld [vmem:[#allocation11 + $0x40] sm:$0xff]  ;;  %v4799_v26 = vrot.slane %v4794_v25, %v4782_v21  ;;  %v320_v4 = vld [vmem:[#allocation11 + $0x10] sm:$0xff] }
  0x51   :  { %v4772_v14 = vcombine.low %v319_v9, %v323_v11  ;;  %v4775_v15 = vcombine.high %v319_v9, %v323_v11  ;;  %v330_v17 = vld [vmem:[#allocation11 + $0x60] sm:$0xff]  ;;  %v327_v18 = vld [vmem:[#allocation11 + $0x48] sm:$0xff]  ;;  %v324_v5 = vld [vmem:[#allocation11 + $0x30] sm:$0xff] }
  0x52   :  { %3873 = vmatmul.mubr.msk.bf16.vlgmr.msra.gmra.mrb[0].mxu0 %vm210_vm0, %v4246_v3  ;;  %6505 = vst [vmem:[#allocation27_spill] sm:$0xff] %v4766_v10  ;;  %6506 = vst [vmem:[#allocation28_spill] sm:$0xff] %v4770_v13  ;;  %702 = vmatprep.subr.bf16.mxu0 %v4766_v10  ;;  %v4779_v19 = vcombine.high %v326_v16, %v330_v17  ;;  %v331_v20 = vld [vmem:[#allocation11 + $0x68] sm:$0xff]  ;;  %v4785_v22 = vcombine.low %v326_v16, %v330_v17  ;;  %v334_v27 = vld [vmem:[#allocation11 + $0x80] sm:$0xff] }
  0x53   :  { %734 = vmatprep.mubr.bf16.mxu0 %v6205_v0  ;;  %3874 = vmatmul.mubr.msk.bf16.vlgmr.msra.gmra.mrb[0].mxu1 %vm210_vm0, %v4246_v3  ;;  %6507 = vst [vmem:[#allocation29_spill] sm:$0xff] %v4772_v14  ;;  %6508 = vst [vmem:[#allocation30_spill] sm:$0xff] %v4775_v15  ;;  %v4787_v23 = vcombine.low %v327_v18, %v331_v20  ;;  %v4789_v24 = vcombine.high %v327_v18, %v331_v20  ;;  %v338_v28 = vld [vmem:[#allocation11 + $0xa0] sm:$0xff]  ;;  %v335_v29 = vld [vmem:[#allocation11 + $0x88] sm:$0xff] }
  0x54   :  { %775 = vmatprep.mubr.bf16.mxu1 %v6205_v0  ;;  %703 = vmatpush1.bf16.msra.mxu0 %v4770_v13  ;;  %6509 = vst [vmem:[#allocation31_spill] sm:$0xff] %v4779_v19  ;;  %6511 = vst [vmem:[#allocation33_spill] sm:$0xff] %v4785_v22  ;;  %v4803_v30 = vcombine.high %v334_v27, %v338_v28  ;;  %v339_v31 = vld [vmem:[#allocation11 + $0xa8] sm:$0xff]  ;;  %v4806_v32 = vcombine.low %v334_v27, %v338_v28  ;;  %v342_v35 = vld [vmem:[#allocation11 + $0xc0] sm:$0xff] }
  0x55   :  { %743 = vmatprep.subr.bf16.mxu1 %v4775_v15  ;;  %6512 = vst [vmem:[#allocation34_spill] sm:$0xff] %v4787_v23  ;;  %6513 = vst [vmem:[#allocation35_spill] sm:$0xff] %v4789_v24  ;;  %704 = vmatprep.subr.bf16.mxu0 %v4779_v19  ;;  %v4808_v33 = vcombine.low %v335_v29, %v339_v31  ;;  %v4810_v34 = vcombine.high %v335_v29, %v339_v31  ;;  %v346_v36 = vld [vmem:[#allocation11 + $0xe0] sm:$0xff]  ;;  %v343_v37 = vld [vmem:[#allocation11 + $0xc8] sm:$0xff] }
  0x56   :  { %744 = vmatpush1.bf16.msra.mxu1 %v4772_v14  ;;  %6514 = vst [vmem:[#allocation36_spill] sm:$0xff] %v4799_v26  ;;  %6515 = vst [vmem:[#allocation37_spill] sm:$0xff] %v4803_v30  ;;  %v4815_v38 = vcombine.high %v342_v35, %v346_v36  ;;  %v347_v39 = vld [vmem:[#allocation11 + $0xe8] sm:$0xff]  ;;  %v4818_v40 = vcombine.low %v342_v35, %v346_v36  ;;  %v350_v43 = vld [vmem:[#allocation11 + $0x100] sm:$0xff]  ;;  %v4857_v11 = vcombine.low %v320_v4, %v324_v5 }
  0x57   :  { %745 = vmatprep.subr.bf16.mxu1 %v4789_v24  ;;  %6516 = vst [vmem:[#allocation38_spill] sm:$0xff] %v4806_v32  ;;  %6517 = vst [vmem:[#allocation39_spill] sm:$0xff] %v4808_v33  ;;  %v4820_v41 = vcombine.low %v343_v37, %v347_v39  ;;  %v4822_v42 = vcombine.high %v343_v37, %v347_v39  ;;  %v354_v44 = vld [vmem:[#allocation11 + $0x120] sm:$0xff]  ;;  %v351_v45 = vld [vmem:[#allocation11 + $0x108] sm:$0xff]  ;;  %v4874_v29 = vcombine.high %v320_v4, %v324_v5 }
  0x58   :  { %705 = vmatpush1.bf16.msra.mxu0 %v4785_v22  ;;  %6518 = vst [vmem:[#allocation40_spill] sm:$0xff] %v4810_v34  ;;  %6519 = vst [vmem:[#allocation41_spill] sm:$0xff] %v4815_v38  ;;  %v4827_v46 = vcombine.high %v350_v43, %v354_v44  ;;  %v355_v47 = vld [vmem:[#allocation11 + $0x128] sm:$0xff]  ;;  %v4830_v48 = vcombine.low %v350_v43, %v354_v44  ;;  %v358_v51 = vld [vmem:[#allocation11 + $0x140] sm:$0xff]  ;;  %v4887_v36 = vsub.s32 0, %v4768_v12  ;;  %v4893_v39 = vsub.s32 2, %v4768_v12 }
  0x59   :  { %706 = vmatprep.subr.bf16.mxu0 %v4803_v30  ;;  %6520 = vst [vmem:[#allocation42_spill] sm:$0xff] %v4818_v40  ;;  %6521 = vst [vmem:[#allocation43_spill] sm:$0xff] %v4820_v41  ;;  %v4832_v49 = vcombine.low %v351_v45, %v355_v47  ;;  %v4834_v50 = vcombine.high %v351_v45, %v355_v47  ;;  %v362_v52 = vld [vmem:[#allocation11 + $0x160] sm:$0xff]  ;;  %v359_v53 = vld [vmem:[#allocation11 + $0x148] sm:$0xff]  ;;  %v4897_v44 = vsub.s32 3, %v4768_v12 }
  0x5a   :  { %746 = vmatpush1.bf16.msra.mxu1 %v4787_v23  ;;  %6522 = vst [vmem:[#allocation44_spill] sm:$0xff] %v4822_v42  ;;  %6523 = vst [vmem:[#allocation45_spill] sm:$0xff] %v4827_v46  ;;  %v4839_v54 = vcombine.low %v358_v51, %v362_v52  ;;  %v4841_v55 = vcombine.high %v358_v51, %v362_v52  ;;  %v363_v56 = vld [vmem:[#allocation11 + $0x168] sm:$0xff]  ;;  %v366_v57 = vld [vmem:[#allocation11 + $0x180] sm:$0xff] }
  0x5b   :  { %747 = vmatprep.subr.bf16.mxu1 %v4810_v34  ;;  %6524 = vst [vmem:[#allocation46_spill] sm:$0xff] %v4830_v48  ;;  %6525 = vst [vmem:[#allocation47_spill] sm:$0xff] %v4832_v49  ;;  %v370_v58 = vld [vmem:[#allocation11 + $0x1a0] sm:$0xff]  ;;  %v4843_v59 = vcombine.high %v359_v53, %v363_v56  ;;  %v367_v61 = vld [vmem:[#allocation11 + $0x188] sm:$0xff]  ;;  %v4849_v63 = vcombine.low %v359_v53, %v363_v56 }
  0x5c   :  { %707 = vmatpush1.bf16.msra.mxu0 %v4806_v32  ;;  %6526 = vst [vmem:[#allocation48_spill] sm:$0xff] %v4834_v50  ;;  %6527 = vst [vmem:[#allocation49_spill] sm:$0xff] %v4839_v54  ;;  %v4845_v60 = vcombine.high %v366_v57, %v370_v58  ;;  %v371_v62 = vld [vmem:[#allocation11 + $0x1a8] sm:$0xff]  ;;  %v374_v1 = vld [vmem:[#allocation11 + $0x1c0] sm:$0xff]  ;;  %v4855_v7 = vcombine.low %v366_v57, %v370_v58 }
  0x5d   :  { %708 = vmatprep.subr.bf16.mxu0 %v4815_v38  ;;  %6528 = vst [vmem:[#allocation50_spill] sm:$0xff] %v4841_v55  ;;  %6529 = vst [vmem:[#allocation51_spill] sm:$0xff] %v4843_v59  ;;  %v378_v2 = vld [vmem:[#allocation11 + $0x1e0] sm:$0xff]  ;;  %v4852_v3 = vcombine.high %v367_v61, %v371_v62  ;;  %v321_v6 = vld [vmem:[#allocation11 + $0x18] sm:$0xff]  ;;  %v4865_v20 = vcombine.low %v367_v61, %v371_v62 }
  0x5e   :  { %748 = vmatpush1.bf16.msra.mxu1 %v4808_v33  ;;  %6530 = vst [vmem:[#allocation52_spill] sm:$0xff] %v4845_v60  ;;  %6531 = vst [vmem:[#allocation53_spill] sm:$0xff] %v4849_v63  ;;  %v375_v8 = vld [vmem:[#allocation11 + $0x1c8] sm:$0xff]  ;;  %v325_v16 = vld [vmem:[#allocation11 + $0x38] sm:$0xff]  ;;  %v4860_v17 = vcombine.high %v374_v1, %v378_v2  ;;  %v4871_v28 = vcombine.low %v374_v1, %v378_v2 }
  0x5f   :  { %749 = vmatprep.subr.bf16.mxu1 %v4822_v42  ;;  %6532 = vst [vmem:[#allocation54_spill] sm:$0xff] %v4852_v3  ;;  %6533 = vst [vmem:[#allocation55_spill] sm:$0xff] %v4855_v7  ;;  %v379_v9 = vld [vmem:[#allocation11 + $0x1e8] sm:$0xff]  ;;  %v4862_v18 = vcombine.low %v321_v6, %v325_v16  ;;  %v4880_v35 = vcombine.high %v321_v6, %v325_v16  ;;  %v163_v37 = vld [vmem:[%s6195_s2] sm:$0xf]  ;;  %s4643_s2 = smov [#allocation4]  }
  0x60   :  { %709 = vmatpush1.bf16.msra.mxu0 %v4818_v40  ;;  %6534 = vst [vmem:[#allocation56_spill] sm:$0xff] %v4860_v17  ;;  %6536 = vst [vmem:[#allocation58_spill] sm:$0xff] %v4865_v20  ;;  %v4868_v27 = vcombine.high %v375_v8, %v379_v9  ;;  %v4877_v31 = vcombine.low %v375_v8, %v379_v9  ;;  %v168_v43 = vrot.slane %v163_v37, %v4887_v36  ;;  %v345_v26 = vld [vmem:[#allocation11 + $0xd8] sm:$0xff]  ;;  %s153_s20 = sshll.u32 %s4643_s2, 4  ;;  %s154_s20 = int_to_ptr.vmem [resolvable:$true] %s153_s20 }
  0x61   :  { %710 = vmatprep.subr.bf16.mxu0 %v4827_v46  ;;  %6535 = vst [vmem:[#allocation57_spill] sm:$0xff] %v4862_v18  ;;  %6538 = vst [vmem:[#allocation60_spill] sm:$0xff] %v4871_v28  ;;  %v176_v47 = vrot.slane %v163_v37, %v4893_v39  ;;  %v4905_v53 = vrot.slane %v163_v37, %v4782_v21  ;;  %v180_v12 = vrot.slane %v163_v37, %v4897_v44 }
  0x62   :  { %750 = vmatpush1.bf16.msra.mxu1 %v4820_v41  ;;  %6537 = vst [vmem:[#allocation59_spill] sm:$0xff] %v4868_v27  ;;  %6539 = vst [vmem:[#allocation61_spill] sm:$0xff] %v4874_v29 }
  0x63   :  { %751 = vmatprep.subr.bf16.mxu1 %v4834_v50  ;;  %6540 = vst [vmem:[#allocation62_spill] sm:$0xff] %v4877_v31  ;;  %6541 = vst [vmem:[#allocation63_spill] sm:$0xff] %v4880_v35 }
  0x64   :  { %711 = vmatpush1.bf16.msra.mxu0 %v4830_v48  ;;  %6542 = vst [vmem:[#allocation64_spill] sm:$0xff] %v4887_v36  ;;  %6543 = vst [vmem:[#allocation65_spill] sm:$0xff] %v4893_v39  ;;  %v6556_v39 = vmov 0  }
  0x65   :  { %712 = vmatprep.subr.bf16.mxu0 %v4841_v55  ;;  %6544 = vst [vmem:[#allocation66_spill] sm:$0xff] %v4897_v44  ;;  %v349_v44 = vld [vmem:[#allocation11 + $0xf8] sm:$0xff] }
  0x66   :  { %752 = vmatpush1.bf16.msra.mxu1 %v4832_v49 }
  0x67   :  { %753 = vmatprep.subr.bf16.mxu1 %v4843_v59 }
  0x68   :  { %713 = vmatpush1.bf16.msra.mxu0 %v4839_v54 }
  0x69   :  { %714 = vmatprep.subr.bf16.mxu0 %v4845_v60 }
  0x6a   :  { %754 = vmatpush1.bf16.msra.mxu1 %v4849_v63 }
  0x6b   :  { %755 = vmatprep.subr.bf16.mxu1 %v4852_v3 }
  0x6c   :  { %715 = vmatpush1.bf16.msra.mxu0 %v4855_v7 }
  0x6d   :  { %716 = vmatprep.subr.bf16.mxu0 %v4860_v17 }
  0x6e   :  { %756 = vmatpush1.bf16.msra.mxu1 %v4865_v20 }
  0x6f   :  { %757 = vmatprep.subr.bf16.mxu1 %v4868_v27 }
  0x70   :  { %717 = vmatpush1.bf16.msra.mxu0 %v4871_v28 }
  0x71   :  { %784 = vmatprep.subr.bf16.mxu0 %v4874_v29 }
  0x72   :  { %758 = vmatpush1.bf16.msra.mxu1 %v4877_v31 }
  0x73   :  { %824 = vmatprep.subr.bf16.mxu1 %v4880_v35 }
 0x125   :  { %v248_v45 = vpop.f32.mrb[0].mxu0 }
 0x126   :  { %v4900_v51 = vadd.f32 %v248_v45, %v168_v43  ;;  %v4902_v52 = vpop.f32.mrb[1].mxu0  ;;  %v291_v62 = vpop.f32.mrb[0].mxu1 }
 0x127   :  { %v252_v56 = vpop.f32.mrb[2].mxu0  ;;  %v4914_v2 = vadd.f32 %v291_v62, %v176_v47  ;;  %v293_v4 = vpop.f32.mrb[1].mxu1 }
 0x128   :  { %v3875_v57 = vmul.f32 -1.442695, %v4900_v51  ;;  %v4908_v58 = vadd.f32 %v252_v56, %v168_v43  ;;  %v254_v61 = vpop.f32.mrb[3].mxu0  ;;  %v295_v5 = vpop.f32.mrb[2].mxu1  ;;  %v4921_v43 = vadd.f32 %v293_v4, %v180_v12  ;;  %v333_v4 = vld [vmem:[#allocation11 + $0x78] sm:$0xff] }
 0x129   :  { %v4912_v1 = vadd.f32 %v254_v61, %v4905_v53  ;;  %v4916_v6 = vadd.f32 %v295_v5, %v176_v47  ;;  %v297_v8 = vpop.f32.mrb[3].mxu1  ;;  %v3876_v16 = vmul.f32 -1.442695, %v4914_v2 }
 0x12a   :  { %6545 = vst [vmem:[#allocation67_spill] sm:$0xff] %v4908_v58  ;;  %4250 = vpow2.f32 %v3875_v57  ;;  %v4918_v9 = vadd.f32 %v297_v8, %v180_v12  ;;  %6549 = vst [vmem:[#allocation71_spill] sm:$0xff] %v4921_v43  ;;  %v328_v8 = vld [vmem:[#allocation11 + $0x50] sm:$0xff]  ;;  %v329_v12 = vld [vmem:[#allocation11 + $0x58] sm:$0xff] }
 0x12b   :  { %6546 = vst [vmem:[#allocation68_spill] sm:$0xff] %v4912_v1  ;;  %6547 = vst [vmem:[#allocation69_spill] sm:$0xff] %v4916_v6  ;;  %4252 = vpow2.f32 %v3876_v16  ;;  %v332_v16 = vld [vmem:[#allocation11 + $0x70] sm:$0xff] }
 0x12c   :  { %6548 = vst [vmem:[#allocation70_spill] sm:$0xff] %v4918_v9  ;;  %4254 = vtanh.f32 %v4921_v43  ;;  %v4929_v9 = vcombine.high %v328_v8, %v332_v16  ;;  %v340_v6 = vld [vmem:[#allocation11 + $0xb0] sm:$0xff] }
 0x12d   :  { %v344_v1 = vld [vmem:[#allocation11 + $0xd0] sm:$0xff] }
 0x12e   :  { %6550 = vst [vmem:[#allocation72_spill] sm:$0xff] %v4929_v9  ;;  %v348_v58 = vld [vmem:[#allocation11 + $0xf0] sm:$0xff] }
 0x134   :  { %v4251_v45 = vpop.eup %4250 }
 0x135   :  { %v307_v37 = vadd.f32 1.0, %v4251_v45  ;;  %v4253_v56 = vpop.eup %4252 }
 0x136   :  { %v308_v61 = vadd.f32 1.0, %v4253_v56  ;;  %v4255_v62 = vpop.eup %4254  ;;  %v336_v56 = vld [vmem:[#allocation11 + $0x90] sm:$0xff] }
 0x137   :  { %4256 = vrcp.f32 %v307_v37  ;;  %v4931_v37 = vcombine.high %v329_v12, %v333_v4 }
 0x138   :  { %4258 = vrcp.f32 %v308_v61  ;;  %v337_v61 = vld [vmem:[#allocation11 + $0x98] sm:$0xff] }
 0x139   :  { %6551 = vst [vmem:[#allocation73_spill] sm:$0xff] %v4931_v37 }
 0x141   :  { %v4257_v57 = vpop.eup %4256 }
 0x142   :  { %v4924_v47 = vmul.f32 %v4257_v57, %v4255_v62  ;;  %v4259_v5 = vpop.eup %4258  ;;  %v341_v62 = vld [vmem:[#allocation11 + $0xb8] sm:$0xff]  ;;  %v4937_v57 = vcombine.low %v328_v8, %v332_v16  ;;  %v4951_v8 = vcombine.low %v336_v56, %v340_v6 }
 0x143   :  { %v4953_v16 = vcombine.low %v337_v61, %v341_v62 }
 0x144   :  { %4260 = vtanh.f32 %v4924_v47  ;;  %6552 = vst [vmem:[#allocation74_spill] sm:$0xff] %v4937_v57  ;;  %6557 = vst [vmem:[#allocation78_spill] sm:$0xff] %v4951_v8 }
 0x145   :  { %6558 = vst [vmem:[#allocation79_spill] sm:$0xff] %v4953_v16 }
 0x14e   :  { %v4261_v0 = vpop.eup %4260 }
 0x14f   :  { %v316_v21 = vmul.f32 %v4261_v0, %v4259_v5  ;;  %v4939_v0 = vcombine.low %v329_v12, %v333_v4  ;;  %v4945_v5 = vcombine.high %v337_v61, %v341_v62  ;;  %v4957_v12 = vcombine.high %v344_v1, %v348_v58 }
 0x150   :  { %v4959_v4 = vcombine.high %v345_v26, %v349_v44 }
 0x151   :  { %v4927_v45 = vpack.c.bf16 %v316_v21, %v316_v21  ;;  %6553 = vst [vmem:[#allocation75_spill] sm:$0xff] %v4939_v0  ;;  %v4943_v21 = vcombine.high %v336_v56, %v340_v6  ;;  %6555 = vst [vmem:[#allocation77_spill] sm:$0xff] %v4945_v5  ;;  %v4963_v6 = vcombine.low %v344_v1, %v348_v58 }
 0x152   :  { %6559 = vst [vmem:[#allocation80_spill] sm:$0xff] %v4957_v12  ;;  %6560 = vst [vmem:[#allocation81_spill] sm:$0xff] %v4959_v4  ;;  %v4965_v56 = vcombine.low %v345_v26, %v349_v44 }
 0x153   :  { %735 = vmatmul.mubr.bf16.vlgmr.msra.gmra.mrb[4].mxu0 %v4927_v45  ;;  %776 = vmatmul.mubr.bf16.vlgmr.msra.gmra.mrb[4].mxu1 %v4927_v45  ;;  %6554 = vst [vmem:[#allocation76_spill] sm:$0xff] %v4943_v21  ;;  %6561 = vst [vmem:[#allocation82_spill] sm:$0xff] %v4963_v6 }
 0x154   :  { %785 = vmatpush1.bf16.msra.mxu0 %v4857_v11  ;;  %825 = vmatpush1.bf16.msra.mxu1 %v4862_v18  ;;  %v353_v18 = vld [vmem:[#allocation11 + $0x118] sm:$0xff]  ;;  %6562 = vst [vmem:[#allocation83_spill] sm:$0xff] %v4965_v56 }
 0x155   :  { %786 = vmatprep.subr.bf16.mxu0 %v4929_v9  ;;  %826 = vmatprep.subr.bf16.mxu1 %v4931_v37  ;;  %v352_v37 = vld [vmem:[#allocation11 + $0x110] sm:$0xff] }
 0x156   :  { %816 = vmatprep.mubr.bf16.mxu0 %v6556_v39  ;;  %856 = vmatprep.mubr.bf16.mxu1 %v6556_v39  ;;  %v356_v9 = vld [vmem:[#allocation11 + $0x130] sm:$0xff]  ;;  %v357_v39 = vld [vmem:[#allocation11 + $0x138] sm:$0xff] }
 0x157   :  { %v4969_v61 = vcombine.high %v352_v37, %v356_v9  ;;  %v4971_v62 = vcombine.high %v353_v18, %v357_v39  ;;  %v4975_v58 = vcombine.low %v352_v37, %v356_v9  ;;  %v4977_v26 = vcombine.low %v353_v18, %v357_v39 }
 0x158   :  { %787 = vmatpush1.bf16.msra.mxu0 %v4937_v57  ;;  %827 = vmatpush1.bf16.msra.mxu1 %v4939_v0  ;;  %v361_v0 = vld [vmem:[#allocation11 + $0x158] sm:$0xff] }
 0x159   :  { %788 = vmatprep.subr.bf16.mxu0 %v4943_v21  ;;  %828 = vmatprep.subr.bf16.mxu1 %v4945_v5  ;;  %6563 = vst [vmem:[#allocation84_spill] sm:$0xff] %v4969_v61  ;;  %6564 = vst [vmem:[#allocation85_spill] sm:$0xff] %v4971_v62  ;;  %v360_v5 = vld [vmem:[#allocation11 + $0x150] sm:$0xff]  ;;  %v365_v57 = vld [vmem:[#allocation11 + $0x178] sm:$0xff] }
 0x15a   :  { %v364_v21 = vld [vmem:[#allocation11 + $0x170] sm:$0xff]  ;;  %6565 = vst [vmem:[#allocation86_spill] sm:$0xff] %v4975_v58  ;;  %6566 = vst [vmem:[#allocation87_spill] sm:$0xff] %v4977_v26  ;;  %v4983_v1 = vcombine.high %v361_v0, %v365_v57  ;;  %v4989_v18 = vcombine.low %v361_v0, %v365_v57 }
 0x15b   :  { %v4981_v44 = vcombine.high %v360_v5, %v364_v21  ;;  %v4987_v9 = vcombine.low %v360_v5, %v364_v21 }
 0x15c   :  { %789 = vmatpush1.bf16.msra.mxu0 %v4951_v8  ;;  %829 = vmatpush1.bf16.msra.mxu1 %v4953_v16  ;;  %6568 = vst [vmem:[#allocation89_spill] sm:$0xff] %v4983_v1  ;;  %v369_v16 = vld [vmem:[#allocation11 + $0x198] sm:$0xff]  ;;  %6570 = vst [vmem:[#allocation91_spill] sm:$0xff] %v4989_v18 }
 0x15d   :  { %790 = vmatprep.subr.bf16.mxu0 %v4957_v12  ;;  %830 = vmatprep.subr.bf16.mxu1 %v4959_v4  ;;  %6567 = vst [vmem:[#allocation88_spill] sm:$0xff] %v4981_v44  ;;  %v368_v4 = vld [vmem:[#allocation11 + $0x190] sm:$0xff]  ;;  %v373_v8 = vld [vmem:[#allocation11 + $0x1b8] sm:$0xff]  ;;  %6569 = vst [vmem:[#allocation90_spill] sm:$0xff] %v4987_v9 }
 0x15e   :  { %v372_v12 = vld [vmem:[#allocation11 + $0x1b0] sm:$0xff]  ;;  %v4995_v37 = vcombine.high %v369_v16, %v373_v8  ;;  %v5001_v57 = vcombine.low %v369_v16, %v373_v8  ;;  %v1020_v8 = vld [vmem:[#allocation11 + $0x220] sm:$0xff]  ;;  %v1017_v16 = vld [vmem:[#allocation11 + $0x208] sm:$0xff] }
 0x15f   :  { %v4993_v39 = vcombine.high %v368_v4, %v372_v12  ;;  %v4999_v21 = vcombine.low %v368_v4, %v372_v12  ;;  %v1021_v4 = vld [vmem:[#allocation11 + $0x228] sm:$0xff] }
 0x160   :  { %791 = vmatpush1.bf16.msra.mxu0 %v4963_v6  ;;  %831 = vmatpush1.bf16.msra.mxu1 %v4965_v56  ;;  %6572 = vst [vmem:[#allocation93_spill] sm:$0xff] %v4995_v37  ;;  %v377_v56 = vld [vmem:[#allocation11 + $0x1d8] sm:$0xff]  ;;  %6574 = vst [vmem:[#allocation95_spill] sm:$0xff] %v5001_v57 }
 0x161   :  { %792 = vmatprep.subr.bf16.mxu0 %v4969_v61  ;;  %832 = vmatprep.subr.bf16.mxu1 %v4971_v62  ;;  %6571 = vst [vmem:[#allocation92_spill] sm:$0xff] %v4993_v39  ;;  %v376_v62 = vld [vmem:[#allocation11 + $0x1d0] sm:$0xff]  ;;  %v381_v6 = vld [vmem:[#allocation11 + $0x1f8] sm:$0xff]  ;;  %6573 = vst [vmem:[#allocation94_spill] sm:$0xff] %v4999_v21 }
 0x162   :  { %v380_v61 = vld [vmem:[#allocation11 + $0x1f0] sm:$0xff]  ;;  %v5007_v5 = vcombine.high %v377_v56, %v381_v6 }
 0x163   :  { %v5005_v0 = vcombine.high %v376_v62, %v380_v61 }
 0x164   :  { %793 = vmatpush1.bf16.msra.mxu0 %v4975_v58  ;;  %833 = vmatpush1.bf16.msra.mxu1 %v4977_v26  ;;  %6576 = vst [vmem:[#allocation97_spill] sm:$0xff] %v5007_v5 }
 0x165   :  { %794 = vmatprep.subr.bf16.mxu0 %v4981_v44  ;;  %834 = vmatprep.subr.bf16.mxu1 %v4983_v1  ;;  %6575 = vst [vmem:[#allocation96_spill] sm:$0xff] %v5005_v0  ;;  %v5011_v1 = vcombine.low %v376_v62, %v380_v61  ;;  %v5059_v61 = vcombine.low %v1017_v16, %v1021_v4  ;;  %v1024_v62 = vld [vmem:[#allocation11 + $0x240] sm:$0xff] }
 0x167   :  { %6577 = vst [vmem:[#allocation98_spill] sm:$0xff] %v5011_v1  ;;  %6582 = vst [vmem:[#allocation103_spill] sm:$0xff] %v5059_v61 }
 0x168   :  { %795 = vmatpush1.bf16.msra.mxu0 %v4987_v9  ;;  %835 = vmatpush1.bf16.msra.mxu1 %v4989_v18  ;;  %v5013_v9 = vcombine.low %v377_v56, %v381_v6  ;;  %v5055_v6 = vcombine.high %v1017_v16, %v1021_v4  ;;  %v1032_v16 = vld [vmem:[#allocation11 + $0x280] sm:$0xff] }
 0x169   :  { %796 = vmatprep.subr.bf16.mxu0 %v4993_v39  ;;  %836 = vmatprep.subr.bf16.mxu1 %v4995_v37  ;;  %v1036_v4 = vld [vmem:[#allocation11 + $0x2a0] sm:$0xff] }
 0x16a   :  { %6578 = vst [vmem:[#allocation99_spill] sm:$0xff] %v5013_v9  ;;  %6580 = vst [vmem:[#allocation101_spill] sm:$0xff] %v5055_v6 }
 0x16c   :  { %797 = vmatpush1.bf16.msra.mxu0 %v4999_v21  ;;  %837 = vmatpush1.bf16.msra.mxu1 %v5001_v57 }
 0x16d   :  { %798 = vmatprep.subr.bf16.mxu0 %v5005_v0  ;;  %838 = vmatprep.subr.bf16.mxu1 %v5007_v5 }
 0x170   :  { %799 = vmatpush1.bf16.msra.mxu0 %v5011_v1  ;;  %839 = vmatpush1.bf16.msra.mxu1 %v5013_v9 }
 0x171   :  { %1725 = vmatprep.subr.bf16.mxu0 %v4766_v10  ;;  %1766 = vmatprep.subr.bf16.mxu1 %v4775_v15 }
 0x173   :  { %817 = vmatmul.mubr.bf16.vlgmr.msra.gmra.mrb[8].mxu0 %v4927_v45  ;;  %857 = vmatmul.mubr.bf16.vlgmr.msra.gmra.mrb[8].mxu1 %v4927_v45  ;;  %v1016_v45 = vld [vmem:[#allocation11 + $0x200] sm:$0xff] }
 0x174   :  { %1726 = vmatpush1.bf16.msra.mxu0 %v4770_v13  ;;  %1767 = vmatpush1.bf16.msra.mxu1 %v4772_v14  ;;  %v5053_v12 = vcombine.high %v1016_v45, %v1020_v8  ;;  %v5057_v56 = vcombine.low %v1016_v45, %v1020_v8 }
 0x175   :  { %1727 = vmatprep.subr.bf16.mxu0 %v4779_v19  ;;  %1768 = vmatprep.subr.bf16.mxu1 %v4789_v24 }
 0x176   :  { %6579 = vst [vmem:[#allocation100_spill] sm:$0xff] %v5053_v12  ;;  %6581 = vst [vmem:[#allocation102_spill] sm:$0xff] %v5057_v56 }
 0x178   :  { %1728 = vmatpush1.bf16.msra.mxu0 %v4785_v22  ;;  %1769 = vmatpush1.bf16.msra.mxu1 %v4787_v23 }
 0x179   :  { %1729 = vmatprep.subr.bf16.mxu0 %v4803_v30  ;;  %1770 = vmatprep.subr.bf16.mxu1 %v4810_v34 }
 0x17c   :  { %1730 = vmatpush1.bf16.msra.mxu0 %v4806_v32  ;;  %1771 = vmatpush1.bf16.msra.mxu1 %v4808_v33 }
 0x17d   :  { %1731 = vmatprep.subr.bf16.mxu0 %v4815_v38  ;;  %1772 = vmatprep.subr.bf16.mxu1 %v4822_v42 }
 0x180   :  { %1732 = vmatpush1.bf16.msra.mxu0 %v4818_v40  ;;  %1773 = vmatpush1.bf16.msra.mxu1 %v4820_v41 }
 0x181   :  { %1733 = vmatprep.subr.bf16.mxu0 %v4827_v46  ;;  %1774 = vmatprep.subr.bf16.mxu1 %v4834_v50 }
 0x184   :  { %1734 = vmatpush1.bf16.msra.mxu0 %v4830_v48  ;;  %1775 = vmatpush1.bf16.msra.mxu1 %v4832_v49 }
 0x185   :  { %1735 = vmatprep.subr.bf16.mxu0 %v4841_v55  ;;  %1776 = vmatprep.subr.bf16.mxu1 %v4843_v59  ;;  %v1077_v59 = vld [vmem:[#allocation11 + $0x3e8] sm:$0xff] }
 0x188   :  { %1736 = vmatpush1.bf16.msra.mxu0 %v4839_v54  ;;  %1777 = vmatpush1.bf16.msra.mxu1 %v4849_v63  ;;  %v1072_v63 = vld [vmem:[#allocation11 + $0x3c0] sm:$0xff]  ;;  %v1073_v54 = vld [vmem:[#allocation11 + $0x3c8] sm:$0xff] }
 0x189   :  { %1737 = vmatprep.subr.bf16.mxu0 %v4845_v60  ;;  %1778 = vmatprep.subr.bf16.mxu1 %v4852_v3  ;;  %v1060_v3 = vld [vmem:[#allocation11 + $0x360] sm:$0xff] }
 0x18a   :  { %v1068_v60 = vld [vmem:[#allocation11 + $0x3a0] sm:$0xff] }
 0x18c   :  { %1738 = vmatpush1.bf16.msra.mxu0 %v4855_v7  ;;  %1779 = vmatpush1.bf16.msra.mxu1 %v4865_v20  ;;  %v1056_v7 = vld [vmem:[#allocation11 + $0x340] sm:$0xff] }
 0x18d   :  { %1739 = vmatprep.subr.bf16.mxu0 %v4860_v17  ;;  %1780 = vmatprep.subr.bf16.mxu1 %v4868_v27  ;;  %v1029_v17 = vld [vmem:[#allocation11 + $0x268] sm:$0xff] }
 0x190   :  { %1740 = vmatpush1.bf16.msra.mxu0 %v4871_v28  ;;  %1781 = vmatpush1.bf16.msra.mxu1 %v4877_v31  ;;  %v1028_v31 = vld [vmem:[#allocation11 + $0x260] sm:$0xff]  ;;  %v1025_v28 = vld [vmem:[#allocation11 + $0x248] sm:$0xff] }
 0x191   :  { %1741 = vmatprep.subr.bf16.mxu0 %v5053_v12  ;;  %1782 = vmatprep.subr.bf16.mxu1 %v5055_v6  ;;  %v5065_v27 = vcombine.high %v1024_v62, %v1028_v31  ;;  %v5067_v20 = vcombine.high %v1025_v28, %v1029_v17  ;;  %v5069_v45 = vcombine.low %v1024_v62, %v1028_v31  ;;  %v1037_v6 = vld [vmem:[#allocation11 + $0x2a8] sm:$0xff]  ;;  %v1044_v62 = vld [vmem:[#allocation11 + $0x2e0] sm:$0xff] }
 0x192   :  { %v5071_v8 = vcombine.low %v1025_v28, %v1029_v17  ;;  %v5081_v31 = vcombine.low %v1032_v16, %v1036_v4  ;;  %v1040_v28 = vld [vmem:[#allocation11 + $0x2c0] sm:$0xff] }
 0x193   :  { %6583 = vst [vmem:[#allocation104_spill] sm:$0xff] %v5065_v27  ;;  %6584 = vst [vmem:[#allocation105_spill] sm:$0xff] %v5067_v20 }
 0x194   :  { %1742 = vmatpush1.bf16.msra.mxu0 %v5057_v56  ;;  %1783 = vmatpush1.bf16.msra.mxu1 %v5059_v61  ;;  %6585 = vst [vmem:[#allocation106_spill] sm:$0xff] %v5069_v45  ;;  %6586 = vst [vmem:[#allocation107_spill] sm:$0xff] %v5071_v8  ;;  %v1033_v56 = vld [vmem:[#allocation11 + $0x288] sm:$0xff]  ;;  %v5077_v61 = vcombine.high %v1032_v16, %v1036_v4  ;;  %v5093_v16 = vcombine.low %v1040_v28, %v1044_v62  ;;  %v1052_v4 = vld [vmem:[#allocation11 + $0x320] sm:$0xff] }
 0x195   :  { %1743 = vmatprep.subr.bf16.mxu0 %v5065_v27  ;;  %1784 = vmatprep.subr.bf16.mxu1 %v5067_v20  ;;  %v5079_v12 = vcombine.high %v1033_v56, %v1037_v6  ;;  %6589 = vst [vmem:[#allocation110_spill] sm:$0xff] %v5081_v31  ;;  %v5083_v17 = vcombine.low %v1033_v56, %v1037_v6  ;;  %v1045_v20 = vld [vmem:[#allocation11 + $0x2e8] sm:$0xff]  ;;  %v1048_v56 = vld [vmem:[#allocation11 + $0x300] sm:$0xff] }
 0x196   :  { %6587 = vst [vmem:[#allocation108_spill] sm:$0xff] %v5077_v61  ;;  %6593 = vst [vmem:[#allocation114_spill] sm:$0xff] %v5093_v16 }
 0x197   :  { %6588 = vst [vmem:[#allocation109_spill] sm:$0xff] %v5079_v12  ;;  %6590 = vst [vmem:[#allocation111_spill] sm:$0xff] %v5083_v17 }
 0x198   :  { %1744 = vmatpush1.bf16.msra.mxu0 %v5069_v45  ;;  %1785 = vmatpush1.bf16.msra.mxu1 %v5071_v8  ;;  %v1041_v45 = vld [vmem:[#allocation11 + $0x2c8] sm:$0xff]  ;;  %v5089_v8 = vcombine.high %v1040_v28, %v1044_v62  ;;  %v5109_v28 = vcombine.high %v1056_v7, %v1060_v3 }
 0x199   :  { %1745 = vmatprep.subr.bf16.mxu0 %v5077_v61  ;;  %1786 = vmatprep.subr.bf16.mxu1 %v5079_v12  ;;  %v5091_v27 = vcombine.high %v1041_v45, %v1045_v20  ;;  %v5095_v6 = vcombine.low %v1041_v45, %v1045_v20  ;;  %v1049_v12 = vld [vmem:[#allocation11 + $0x308] sm:$0xff]  ;;  %v5102_v61 = vcombine.low %v1048_v56, %v1052_v4 }
 0x19a   :  { %6591 = vst [vmem:[#allocation112_spill] sm:$0xff] %v5089_v8  ;;  %6599 = vst [vmem:[#allocation120_spill] sm:$0xff] %v5109_v28  ;;  %v1057_v62 = vld [vmem:[#allocation11 + $0x348] sm:$0xff] }
 0x19b   :  { %6592 = vst [vmem:[#allocation113_spill] sm:$0xff] %v5091_v27  ;;  %6594 = vst [vmem:[#allocation115_spill] sm:$0xff] %v5095_v6 }
 0x19c   :  { %1746 = vmatpush1.bf16.msra.mxu0 %v5081_v31  ;;  %1787 = vmatpush1.bf16.msra.mxu1 %v5083_v17  ;;  %v5100_v31 = vcombine.high %v1048_v56, %v1052_v4  ;;  %v1053_v17 = vld [vmem:[#allocation11 + $0x328] sm:$0xff]  ;;  %6596 = vst [vmem:[#allocation117_spill] sm:$0xff] %v5102_v61 }
 0x19d   :  { %1747 = vmatprep.subr.bf16.mxu0 %v5089_v8  ;;  %1788 = vmatprep.subr.bf16.mxu1 %v5091_v27  ;;  %v5105_v20 = vcombine.high %v1049_v12, %v1053_v17  ;;  %v5107_v45 = vcombine.low %v1049_v12, %v1053_v17  ;;  %v1061_v8 = vld [vmem:[#allocation11 + $0x368] sm:$0xff]  ;;  %v1064_v27 = vld [vmem:[#allocation11 + $0x380] sm:$0xff] }
 0x19e   :  { %6595 = vst [vmem:[#allocation116_spill] sm:$0xff] %v5100_v31  ;;  %v1065_v56 = vld [vmem:[#allocation11 + $0x388] sm:$0xff]  ;;  %v5120_v12 = vcombine.low %v1057_v62, %v1061_v8  ;;  %v5122_v17 = vcombine.high %v1064_v27, %v1068_v60 }
 0x19f   :  { %6597 = vst [vmem:[#allocation118_spill] sm:$0xff] %v5105_v20  ;;  %6598 = vst [vmem:[#allocation119_spill] sm:$0xff] %v5107_v45  ;;  %v1069_v4 = vld [vmem:[#allocation11 + $0x3a8] sm:$0xff] }
 0x1a0   :  { %1748 = vmatpush1.bf16.msra.mxu0 %v5093_v16  ;;  %1789 = vmatpush1.bf16.msra.mxu1 %v5095_v6  ;;  %v5112_v16 = vcombine.high %v1057_v62, %v1061_v8  ;;  %v5116_v6 = vcombine.low %v1056_v7, %v1060_v3  ;;  %6602 = vst [vmem:[#allocation123_spill] sm:$0xff] %v5120_v12  ;;  %6603 = vst [vmem:[#allocation124_spill] sm:$0xff] %v5122_v17 }
 0x1a1   :  { %1749 = vmatprep.subr.bf16.mxu0 %v5100_v31  ;;  %1790 = vmatprep.subr.bf16.mxu1 %v5105_v20  ;;  %v5125_v31 = vcombine.high %v1065_v56, %v1069_v4  ;;  %v1076_v20 = vld [vmem:[#allocation11 + $0x3e0] sm:$0xff]  ;;  %v5128_v3 = vcombine.low %v1064_v27, %v1068_v60  ;;  %v5132_v7 = vcombine.low %v1065_v56, %v1069_v4 }
 0x1a2   :  { %6600 = vst [vmem:[#allocation121_spill] sm:$0xff] %v5112_v16  ;;  %6601 = vst [vmem:[#allocation122_spill] sm:$0xff] %v5116_v6  ;;  %v5134_v8 = vcombine.high %v1072_v63, %v1076_v20  ;;  %v5137_v62 = vcombine.high %v1073_v54, %v1077_v59  ;;  %v5144_v60 = vcombine.low %v1073_v54, %v1077_v59 }
 0x1a3   :  { %6604 = vst [vmem:[#allocation125_spill] sm:$0xff] %v5125_v31  ;;  %6605 = vst [vmem:[#allocation126_spill] sm:$0xff] %v5128_v3 }
 0x1a4   :  { %1750 = vmatpush1.bf16.msra.mxu0 %v5102_v61  ;;  %1791 = vmatpush1.bf16.msra.mxu1 %v5107_v45  ;;  %6606 = vst [vmem:[#allocation127_spill] sm:$0xff] %v5132_v7  ;;  %6607 = vst [vmem:[#allocation128_spill] sm:$0xff] %v5134_v8 }
 0x1a5   :  { %1751 = vmatprep.subr.bf16.mxu0 %v5109_v28  ;;  %1792 = vmatprep.subr.bf16.mxu1 %v5112_v16  ;;  %6608 = vst [vmem:[#allocation129_spill] sm:$0xff] %v5137_v62  ;;  %v5140_v16 = vcombine.low %v1072_v63, %v1076_v20  ;;  %6610 = vst [vmem:[#allocation131_spill] sm:$0xff] %v5144_v60 }
 0x1a7   :  { %6609 = vst [vmem:[#allocation130_spill] sm:$0xff] %v5140_v16 }
 0x1a8   :  { %1752 = vmatpush1.bf16.msra.mxu0 %v5116_v6  ;;  %1793 = vmatpush1.bf16.msra.mxu1 %v5120_v12 }
 0x1a9   :  { %1753 = vmatprep.subr.bf16.mxu0 %v5122_v17  ;;  %1794 = vmatprep.subr.bf16.mxu1 %v5125_v31 }
 0x1ac   :  { %1754 = vmatpush1.bf16.msra.mxu0 %v5128_v3  ;;  %1795 = vmatpush1.bf16.msra.mxu1 %v5132_v7 }
 0x1ad   :  { %1755 = vmatprep.subr.bf16.mxu0 %v5134_v8  ;;  %1796 = vmatprep.subr.bf16.mxu1 %v5137_v62  ;;  %v5153_v8 = vadd.f32 %v4902_v52, %v4905_v53 }
 0x1b0   :  { %1756 = vmatpush1.bf16.msra.mxu0 %v5140_v16  ;;  %1797 = vmatpush1.bf16.msra.mxu1 %v5144_v60 }
 0x1b1   :  { %1807 = vmatprep.subr.bf16.mxu0 %v4874_v29  ;;  %1848 = vmatprep.subr.bf16.mxu1 %v4880_v35 }
 0x226   :  { %v736_v27 = vpop.f32.mrb[4].mxu0  ;;  %v777_v56 = vpop.f32.mrb[4].mxu1 }
 0x227   :  { %v910_v63 = vrot.slane %v736_v27, 6  ;;  %v738_v20 = vpop.f32.mrb[5].mxu0  ;;  %v779_v4 = vpop.f32.mrb[5].mxu1  ;;  %v912_v31 = vrot.slane %v777_v56, 6 }
 0x228   :  { %v911_v54 = vrot.slane %v738_v20, 6  ;;  %v740_v59 = vpop.f32.mrb[6].mxu0  ;;  %v781_v62 = vpop.f32.mrb[6].mxu1  ;;  %v913_v27 = vrot.slane %v779_v4, 6 }
 0x229   :  { %v918_v16 = vadd.f32 %v910_v63, %v4900_v51  ;;  %v741_v7 = vpop.f32.mrb[7].mxu0  ;;  %v782_v60 = vpop.f32.mrb[7].mxu1  ;;  %v920_v17 = vadd.f32 %v912_v31, %v4914_v2  ;;  %v942_v31 = vrot.slane %v4924_v47, 6 }
 0x22a   :  { %v919_v29 = vadd.f32 %v911_v54, %v5153_v8  ;;  %v921_v52 = vadd.f32 %v913_v27, %v4921_v43 }
 0x22b   :  { %v3943_v3 = vmul.f32 -1.442695, %v918_v16  ;;  %v3945_v53 = vmul.f32 -1.442695, %v920_v17 }
 0x22c   :  { %v3944_v35 = vmul.f32 -1.442695, %v919_v29  ;;  %v5161_v29 = vrot.slane %v4794_v25, %v4887_v36 }
 0x22d   :  { %4262 = vpow2.f32 %v3943_v3 }
 0x22e   :  { %4264 = vpow2.f32 %v3944_v35  ;;  %6611 = vst [vmem:[#allocation132_spill] sm:$0xff] %v5161_v29 }
 0x22f   :  { %4266 = vtanh.f32 %v921_v52 }
 0x230   :  { %4268 = vpow2.f32 %v3945_v53 }
 0x237   :  { %v4263_v20 = vpop.eup %4262 }
 0x238   :  { %v931_v59 = vadd.f32 1.0, %v4263_v20  ;;  %v4265_v62 = vpop.eup %4264  ;;  %v6612_v20 = vld [vmem:[#allocation65_spill] sm:$0xff] }
 0x239   :  { %v932_v7 = vadd.f32 1.0, %v4265_v62  ;;  %v4267_v60 = vpop.eup %4266 }
 0x23a   :  { %4270 = vrcp.f32 %v931_v59  ;;  %v4269_v16 = vpop.eup %4268  ;;  %v5167_v59 = vrot.slane %v4794_v25, %v6612_v20 }
 0x23b   :  { %4272 = vrcp.f32 %v932_v7  ;;  %v933_v17 = vadd.f32 1.0, %v4269_v16 }
 0x23c   :  { %6613 = vst [vmem:[#allocation133_spill] sm:$0xff] %v5167_v59 }
 0x23d   :  { %4274 = vrcp.f32 %v933_v17 }
 0x244   :  { %v4271_v35 = vpop.eup %4270 }
 0x245   :  { %v945_v3 = vmul.f32 %v4271_v35, %v4267_v60  ;;  %v4273_v56 = vpop.eup %4272  ;;  %v6614_v35 = vld [vmem:[#allocation66_spill] sm:$0xff] }
 0x246   :  { %v818_v63 = vpop.f32.mrb[8].mxu0  ;;  %v858_v4 = vpop.f32.mrb[8].mxu1  ;;  %v944_v54 = vmul.f32 %v4273_v56, %v942_v31  ;;  %v5175_v31 = vrot.slane %v4794_v25, %v6614_v35 }
 0x247   :  { %v886_v27 = vadd.f32 %v5161_v29, %v818_v63  ;;  %v820_v52 = vpop.f32.mrb[9].mxu0  ;;  %v860_v53 = vpop.f32.mrb[9].mxu1  ;;  %v887_v16 = vadd.f32 %v5167_v59, %v858_v4 }
 0x248   :  { %v821_v62 = vpop.f32.mrb[10].mxu0  ;;  %v862_v7 = vpop.f32.mrb[10].mxu1  ;;  %v5169_v36 = vadd.f32 %v945_v3, %v944_v54  ;;  %6615 = vst [vmem:[#allocation134_spill] sm:$0xff] %v5175_v31  ;;  %v888_v52 = vadd.f32 %v5175_v31, %v860_v53 }
 0x249   :  { %v3941_v43 = vmul.f32 -1.442695, %v886_v27  ;;  %v822_v47 = vpop.f32.mrb[11].mxu0  ;;  %v863_v60 = vpop.f32.mrb[11].mxu1  ;;  %v3942_v56 = vmul.f32 -1.442695, %v887_v16 }
 0x24a   :  { %4276 = vtanh.f32 %v5169_v36  ;;  %v4275_v63 = vpop.eup %4274 }
 0x24b   :  { %4278 = vpow2.f32 %v3941_v43 }
 0x24c   :  { %4280 = vpow2.f32 %v3942_v56 }
 0x24d   :  { %4282 = vtanh.f32 %v888_v52  ;;  %v6616_v52 = vld [vmem:[#allocation57_spill] sm:$0xff] }
 0x254   :  { %v4277_v3 = vpop.eup %4276 }
 0x255   :  { %v4279_v54 = vpop.eup %4278  ;;  %v948_v27 = vmul.f32 %v4277_v3, %v4275_v63  ;;  %v6617_v3 = vld [vmem:[#allocation72_spill] sm:$0xff] }
 0x256   :  { %v895_v62 = vadd.f32 1.0, %v4279_v54  ;;  %v4281_v17 = vpop.eup %4280  ;;  %v6618_v54 = vld [vmem:[#allocation73_spill] sm:$0xff] }
 0x257   :  { %v896_v7 = vadd.f32 1.0, %v4281_v17  ;;  %v4283_v43 = vpop.eup %4282  ;;  %v949_v53 = vpack.c.bf16 %v948_v27, %v948_v27  ;;  %v6619_v27 = vld [vmem:[#allocation74_spill] sm:$0xff]  ;;  %v6622_v17 = vld [vmem:[#allocation77_spill] sm:$0xff] }
 0x258   :  { %4284 = vrcp.f32 %v895_v62  ;;  %v6621_v62 = vld [vmem:[#allocation76_spill] sm:$0xff] }
 0x259   :  { %4286 = vrcp.f32 %v896_v7  ;;  %v5181_v63 = vrot.slane %v949_v53, 1  ;;  %v6623_v7 = vld [vmem:[#allocation78_spill] sm:$0xff]  ;;  %v6631_v53 = vld [vmem:[#allocation89_spill] sm:$0xff] }
 0x262   :  { %v4285_v47 = vpop.eup %4284 }
 0x263   :  { %v5178_v4 = vmul.f32 %v4285_v47, %v4283_v43  ;;  %v4287_v25 = vpop.eup %4286  ;;  %v6624_v43 = vld [vmem:[#allocation79_spill] sm:$0xff]  ;;  %v6625_v47 = vld [vmem:[#allocation80_spill] sm:$0xff] }
 0x265   :  { %4288 = vtanh.f32 %v5178_v4 }
 0x26f   :  { %v4289_v60 = vpop.eup %4288 }
 0x270   :  { %v904_v16 = vmul.f32 %v4289_v60, %v4287_v25  ;;  %v6626_v25 = vld [vmem:[#allocation81_spill] sm:$0xff]  ;;  %v6628_v60 = vld [vmem:[#allocation83_spill] sm:$0xff] }
 0x272   :  { %v905_v56 = vpack.c.bf16 %v904_v16, %v904_v16  ;;  %v6629_v16 = vld [vmem:[#allocation84_spill] sm:$0xff] }
 0x274   :  { %v951_v20 = vrot.slane %v905_v56, 7  ;;  %v6630_v56 = vld [vmem:[#allocation85_spill] sm:$0xff] }
 0x276   :  { %v1082_v35 = vrot.slane %v951_v20, 1  ;;  %v6620_v20 = vld [vmem:[#allocation75_spill] sm:$0xff] }
 0x278   :  { %1757 = vmatprep.mubr.bf16.mxu0 %v1082_v35  ;;  %1798 = vmatprep.mubr.bf16.mxu1 %v1082_v35 }
 0x279   :  { %1758 = vmatmul.mubr.bf16.vlgmr.msra.gmra.mrb[12].mxu0 %v5181_v63  ;;  %1799 = vmatmul.mubr.bf16.vlgmr.msra.gmra.mrb[12].mxu1 %v5181_v63 }
 0x27a   :  { %1808 = vmatpush1.bf16.msra.mxu0 %v4857_v11  ;;  %1849 = vmatpush1.bf16.msra.mxu1 %v6616_v52 }
 0x27b   :  { %1839 = vmatprep.mubr.bf16.mxu0 %v1082_v35  ;;  %1880 = vmatprep.mubr.bf16.mxu1 %v1082_v35  ;;  %v6627_v35 = vld [vmem:[#allocation82_spill] sm:$0xff] }
 0x27c   :  { %1809 = vmatprep.subr.bf16.mxu0 %v6617_v3  ;;  %1850 = vmatprep.subr.bf16.mxu1 %v6618_v54 }
 0x27e   :  { %1810 = vmatpush1.bf16.msra.mxu0 %v6619_v27  ;;  %1851 = vmatpush1.bf16.msra.mxu1 %v6620_v20 }
 0x27f   :  { %1811 = vmatprep.subr.bf16.mxu0 %v6621_v62  ;;  %1852 = vmatprep.subr.bf16.mxu1 %v6622_v17 }
 0x282   :  { %1812 = vmatpush1.bf16.msra.mxu0 %v6623_v7  ;;  %1853 = vmatpush1.bf16.msra.mxu1 %v6624_v43  ;;  %v6632_v43 = vld [vmem:[#allocation90_spill] sm:$0xff] }
 0x283   :  { %1813 = vmatprep.subr.bf16.mxu0 %v6625_v47  ;;  %1854 = vmatprep.subr.bf16.mxu1 %v6626_v25  ;;  %v1035_v25 = vld [vmem:[#allocation11 + $0x298] sm:$0xff] }
 0x284   :  { %v1039_v47 = vld [vmem:[#allocation11 + $0x2b8] sm:$0xff] }
 0x286   :  { %1814 = vmatpush1.bf16.msra.mxu0 %v6627_v35  ;;  %1855 = vmatpush1.bf16.msra.mxu1 %v6628_v60  ;;  %v1018_v60 = vld [vmem:[#allocation11 + $0x210] sm:$0xff]  ;;  %v1019_v35 = vld [vmem:[#allocation11 + $0x218] sm:$0xff] }
 0x287   :  { %1815 = vmatprep.subr.bf16.mxu0 %v6629_v16  ;;  %1856 = vmatprep.subr.bf16.mxu1 %v6630_v56  ;;  %v1022_v16 = vld [vmem:[#allocation11 + $0x230] sm:$0xff]  ;;  %v1023_v56 = vld [vmem:[#allocation11 + $0x238] sm:$0xff] }
 0x28a   :  { %1816 = vmatpush1.bf16.msra.mxu0 %v4975_v58  ;;  %1857 = vmatpush1.bf16.msra.mxu1 %v4977_v26  ;;  %v5219_v26 = vcombine.low %v1018_v60, %v1022_v16  ;;  %v1038_v58 = vld [vmem:[#allocation11 + $0x2b0] sm:$0xff] }
 0x28b   :  { %1817 = vmatprep.subr.bf16.mxu0 %v4981_v44  ;;  %1858 = vmatprep.subr.bf16.mxu1 %v6631_v53  ;;  %v5213_v53 = vcombine.high %v1018_v60, %v1022_v16  ;;  %v1027_v44 = vld [vmem:[#allocation11 + $0x258] sm:$0xff] }
 0x28c   :  { %6635 = vst [vmem:[#allocation73_spill] sm:$0xff] %v5219_v26 }
 0x28d   :  { %6633 = vst [vmem:[#allocation57_spill] sm:$0xff] %v5213_v53 }
 0x28e   :  { %1818 = vmatpush1.bf16.msra.mxu0 %v6632_v43  ;;  %1859 = vmatpush1.bf16.msra.mxu1 %v4989_v18  ;;  %v5215_v43 = vcombine.high %v1019_v35, %v1023_v56  ;;  %v1026_v18 = vld [vmem:[#allocation11 + $0x250] sm:$0xff] }
 0x28f   :  { %1819 = vmatprep.subr.bf16.mxu0 %v4993_v39  ;;  %1860 = vmatprep.subr.bf16.mxu1 %v4995_v37  ;;  %v1030_v39 = vld [vmem:[#allocation11 + $0x270] sm:$0xff]  ;;  %v1031_v37 = vld [vmem:[#allocation11 + $0x278] sm:$0xff] }
 0x290   :  { %6634 = vst [vmem:[#allocation72_spill] sm:$0xff] %v5215_v43  ;;  %v5231_v60 = vcombine.low %v1026_v18, %v1030_v39 }
 0x292   :  { %1820 = vmatpush1.bf16.msra.mxu0 %v4999_v21  ;;  %1861 = vmatpush1.bf16.msra.mxu1 %v5001_v57  ;;  %v5221_v21 = vcombine.low %v1019_v35, %v1023_v56  ;;  %v1034_v57 = vld [vmem:[#allocation11 + $0x290] sm:$0xff]  ;;  %6639 = vst [vmem:[#allocation77_spill] sm:$0xff] %v5231_v60  ;;  %v5233_v35 = vcombine.low %v1027_v44, %v1031_v37 }
 0x293   :  { %1821 = vmatprep.subr.bf16.mxu0 %v5005_v0  ;;  %1862 = vmatprep.subr.bf16.mxu1 %v5007_v5  ;;  %v5225_v5 = vcombine.high %v1026_v18, %v1030_v39  ;;  %v5227_v0 = vcombine.high %v1027_v44, %v1031_v37  ;;  %v5237_v16 = vcombine.high %v1034_v57, %v1038_v58 }
 0x294   :  { %6636 = vst [vmem:[#allocation74_spill] sm:$0xff] %v5221_v21  ;;  %6640 = vst [vmem:[#allocation78_spill] sm:$0xff] %v5233_v35  ;;  %v5239_v56 = vcombine.high %v1035_v25, %v1039_v47  ;;  %v5243_v18 = vcombine.low %v1034_v57, %v1038_v58  ;;  %v5245_v44 = vcombine.low %v1035_v25, %v1039_v47 }
 0x295   :  { %6637 = vst [vmem:[#allocation75_spill] sm:$0xff] %v5225_v5  ;;  %6638 = vst [vmem:[#allocation76_spill] sm:$0xff] %v5227_v0 }
 0x296   :  { %1822 = vmatpush1.bf16.msra.mxu0 %v5011_v1  ;;  %1863 = vmatpush1.bf16.msra.mxu1 %v5013_v9  ;;  %6641 = vst [vmem:[#allocation135_spill] sm:$0xff] %v5237_v16  ;;  %6642 = vst [vmem:[#allocation136_spill] sm:$0xff] %v5239_v56  ;;  %v1043_v9 = vld [vmem:[#allocation11 + $0x2d8] sm:$0xff] }
 0x297   :  { %1823 = vmatprep.subr.bf16.mxu0 %v5213_v53  ;;  %1864 = vmatprep.subr.bf16.mxu1 %v5215_v43  ;;  %v1042_v43 = vld [vmem:[#allocation11 + $0x2d0] sm:$0xff]  ;;  %v1047_v1 = vld [vmem:[#allocation11 + $0x2f8] sm:$0xff]  ;;  %6643 = vst [vmem:[#allocation137_spill] sm:$0xff] %v5243_v18  ;;  %6644 = vst [vmem:[#allocation138_spill] sm:$0xff] %v5245_v44 }
 0x298   :  { %v1046_v53 = vld [vmem:[#allocation11 + $0x2f0] sm:$0xff]  ;;  %v5251_v37 = vcombine.high %v1043_v9, %v1047_v1  ;;  %v5257_v57 = vcombine.low %v1043_v9, %v1047_v1 }
 0x299   :  { %v5249_v39 = vcombine.high %v1042_v43, %v1046_v53  ;;  %v5255_v58 = vcombine.low %v1042_v43, %v1046_v53 }
 0x29a   :  { %1824 = vmatpush1.bf16.msra.mxu0 %v5219_v26  ;;  %1865 = vmatpush1.bf16.msra.mxu1 %v5221_v21  ;;  %6646 = vst [vmem:[#allocation140_spill] sm:$0xff] %v5251_v37  ;;  %v1051_v21 = vld [vmem:[#allocation11 + $0x318] sm:$0xff]  ;;  %6648 = vst [vmem:[#allocation142_spill] sm:$0xff] %v5257_v57 }
 0x29b   :  { %1825 = vmatprep.subr.bf16.mxu0 %v5225_v5  ;;  %1866 = vmatprep.subr.bf16.mxu1 %v5227_v0  ;;  %6645 = vst [vmem:[#allocation139_spill] sm:$0xff] %v5249_v39  ;;  %v1050_v0 = vld [vmem:[#allocation11 + $0x310] sm:$0xff]  ;;  %v1055_v26 = vld [vmem:[#allocation11 + $0x338] sm:$0xff]  ;;  %6647 = vst [vmem:[#allocation141_spill] sm:$0xff] %v5255_v58 }
 0x29c   :  { %v1054_v5 = vld [vmem:[#allocation11 + $0x330] sm:$0xff]  ;;  %v5263_v25 = vcombine.high %v1051_v21, %v1055_v26  ;;  %v5269_v1 = vcombine.low %v1051_v21, %v1055_v26 }
 0x29d   :  { %v5261_v47 = vcombine.high %v1050_v0, %v1054_v5  ;;  %v5267_v43 = vcombine.low %v1050_v0, %v1054_v5 }
 0x29e   :  { %1826 = vmatpush1.bf16.msra.mxu0 %v5231_v60  ;;  %1867 = vmatpush1.bf16.msra.mxu1 %v5233_v35  ;;  %6650 = vst [vmem:[#allocation144_spill] sm:$0xff] %v5263_v25  ;;  %v1059_v35 = vld [vmem:[#allocation11 + $0x358] sm:$0xff]  ;;  %6652 = vst [vmem:[#allocation146_spill] sm:$0xff] %v5269_v1 }
 0x29f   :  { %1827 = vmatprep.subr.bf16.mxu0 %v5237_v16  ;;  %1868 = vmatprep.subr.bf16.mxu1 %v5239_v56  ;;  %6649 = vst [vmem:[#allocation143_spill] sm:$0xff] %v5261_v47  ;;  %v1058_v56 = vld [vmem:[#allocation11 + $0x350] sm:$0xff]  ;;  %v1063_v60 = vld [vmem:[#allocation11 + $0x378] sm:$0xff]  ;;  %6651 = vst [vmem:[#allocation145_spill] sm:$0xff] %v5267_v43 }
 0x2a0   :  { %v1062_v16 = vld [vmem:[#allocation11 + $0x370] sm:$0xff]  ;;  %v5275_v53 = vcombine.high %v1059_v35, %v1063_v60  ;;  %v5281_v26 = vcombine.low %v1059_v35, %v1063_v60 }
 0x2a1   :  { %v5273_v9 = vcombine.high %v1058_v56, %v1062_v16  ;;  %v5279_v0 = vcombine.low %v1058_v56, %v1062_v16 }
 0x2a2   :  { %1828 = vmatpush1.bf16.msra.mxu0 %v5243_v18  ;;  %1869 = vmatpush1.bf16.msra.mxu1 %v5245_v44  ;;  %6654 = vst [vmem:[#allocation148_spill] sm:$0xff] %v5275_v53  ;;  %v1067_v44 = vld [vmem:[#allocation11 + $0x398] sm:$0xff]  ;;  %6656 = vst [vmem:[#allocation150_spill] sm:$0xff] %v5281_v26 }
 0x2a3   :  { %1829 = vmatprep.subr.bf16.mxu0 %v5249_v39  ;;  %1870 = vmatprep.subr.bf16.mxu1 %v5251_v37  ;;  %6653 = vst [vmem:[#allocation147_spill] sm:$0xff] %v5273_v9  ;;  %v1066_v37 = vld [vmem:[#allocation11 + $0x390] sm:$0xff]  ;;  %v1071_v18 = vld [vmem:[#allocation11 + $0x3b8] sm:$0xff]  ;;  %6655 = vst [vmem:[#allocation149_spill] sm:$0xff] %v5279_v0 }
 0x2a4   :  { %v1070_v39 = vld [vmem:[#allocation11 + $0x3b0] sm:$0xff]  ;;  %v5287_v5 = vcombine.high %v1067_v44, %v1071_v18  ;;  %v5293_v60 = vcombine.low %v1067_v44, %v1071_v18 }
 0x2a5   :  { %v5285_v21 = vcombine.high %v1066_v37, %v1070_v39  ;;  %v5291_v16 = vcombine.low %v1066_v37, %v1070_v39  ;;  %v6666_v18 = vld [vmem:[#allocation49_spill] sm:$0xff]  ;;  %v6668_v39 = vld [vmem:[#allocation52_spill] sm:$0xff]  ;;  %v6669_v37 = vld [vmem:[#allocation54_spill] sm:$0xff] }
 0x2a6   :  { %1830 = vmatpush1.bf16.msra.mxu0 %v5255_v58  ;;  %1871 = vmatpush1.bf16.msra.mxu1 %v5257_v57  ;;  %6658 = vst [vmem:[#allocation152_spill] sm:$0xff] %v5287_v5  ;;  %v1075_v57 = vld [vmem:[#allocation11 + $0x3d8] sm:$0xff]  ;;  %6660 = vst [vmem:[#allocation154_spill] sm:$0xff] %v5293_v60 }
 0x2a7   :  { %1831 = vmatprep.subr.bf16.mxu0 %v5261_v47  ;;  %1872 = vmatprep.subr.bf16.mxu1 %v5263_v25  ;;  %6657 = vst [vmem:[#allocation151_spill] sm:$0xff] %v5285_v21  ;;  %v1074_v25 = vld [vmem:[#allocation11 + $0x3d0] sm:$0xff]  ;;  %v1079_v58 = vld [vmem:[#allocation11 + $0x3f8] sm:$0xff]  ;;  %6659 = vst [vmem:[#allocation153_spill] sm:$0xff] %v5291_v16 }
 0x2a8   :  { %v1078_v47 = vld [vmem:[#allocation11 + $0x3f0] sm:$0xff]  ;;  %v5299_v56 = vcombine.high %v1075_v57, %v1079_v58 }
 0x2a9   :  { %v5297_v35 = vcombine.high %v1074_v25, %v1078_v47  ;;  %v6667_v44 = vld [vmem:[#allocation53_spill] sm:$0xff] }
 0x2aa   :  { %1832 = vmatpush1.bf16.msra.mxu0 %v5267_v43  ;;  %1873 = vmatpush1.bf16.msra.mxu1 %v5269_v1  ;;  %6662 = vst [vmem:[#allocation156_spill] sm:$0xff] %v5299_v56 }
 0x2ab   :  { %1833 = vmatprep.subr.bf16.mxu0 %v5273_v9  ;;  %1874 = vmatprep.subr.bf16.mxu1 %v5275_v53  ;;  %6661 = vst [vmem:[#allocation155_spill] sm:$0xff] %v5297_v35  ;;  %v5303_v53 = vcombine.low %v1074_v25, %v1078_v47  ;;  %v6672_v47 = vld [vmem:[#allocation56_spill] sm:$0xff]  ;;  %v6673_v25 = vld [vmem:[#allocation59_spill] sm:$0xff] }
 0x2ad   :  { %6663 = vst [vmem:[#allocation157_spill] sm:$0xff] %v5303_v53 }
 0x2ae   :  { %1834 = vmatpush1.bf16.msra.mxu0 %v5279_v0  ;;  %1875 = vmatpush1.bf16.msra.mxu1 %v5281_v26  ;;  %v5305_v0 = vcombine.low %v1075_v57, %v1079_v58  ;;  %v6670_v58 = vld [vmem:[#allocation55_spill] sm:$0xff]  ;;  %v6671_v57 = vld [vmem:[#allocation58_spill] sm:$0xff] }
 0x2af   :  { %1835 = vmatprep.subr.bf16.mxu0 %v5285_v21  ;;  %1876 = vmatprep.subr.bf16.mxu1 %v5287_v5 }
 0x2b0   :  { %6664 = vst [vmem:[#allocation158_spill] sm:$0xff] %v5305_v0 }
 0x2b2   :  { %1836 = vmatpush1.bf16.msra.mxu0 %v5291_v16  ;;  %1877 = vmatpush1.bf16.msra.mxu1 %v5293_v60 }
 0x2b3   :  { %1837 = vmatprep.subr.bf16.mxu0 %v5297_v35  ;;  %1878 = vmatprep.subr.bf16.mxu1 %v5299_v56 }
 0x2b6   :  { %1838 = vmatpush1.bf16.msra.mxu0 %v5303_v53  ;;  %1879 = vmatpush1.bf16.msra.mxu1 %v5305_v0 }
 0x2b7   :  { %1969 = vmatprep.subr.bf16.mxu0 %v4766_v10  ;;  %2010 = vmatprep.subr.bf16.mxu1 %v4775_v15 }
 0x2b9   :  { %1840 = vmatmul.mubr.bf16.vlgmr.msra.gmra.mrb[16].mxu0 %v5181_v63  ;;  %1881 = vmatmul.mubr.bf16.vlgmr.msra.gmra.mrb[16].mxu1 %v5181_v63  ;;  %v6665_v63 = vld [vmem:[#allocation51_spill] sm:$0xff] }
 0x2ba   :  { %1970 = vmatpush1.bf16.msra.mxu0 %v4770_v13  ;;  %2011 = vmatpush1.bf16.msra.mxu1 %v4772_v14 }
 0x2bb   :  { %1971 = vmatprep.subr.bf16.mxu0 %v4779_v19  ;;  %2012 = vmatprep.subr.bf16.mxu1 %v4789_v24 }
 0x2be   :  { %1972 = vmatpush1.bf16.msra.mxu0 %v4785_v22  ;;  %2013 = vmatpush1.bf16.msra.mxu1 %v4787_v23 }
 0x2bf   :  { %1973 = vmatprep.subr.bf16.mxu0 %v4803_v30  ;;  %2014 = vmatprep.subr.bf16.mxu1 %v4810_v34 }
 0x2c2   :  { %1974 = vmatpush1.bf16.msra.mxu0 %v4806_v32  ;;  %2015 = vmatpush1.bf16.msra.mxu1 %v4808_v33 }
 0x2c3   :  { %1975 = vmatprep.subr.bf16.mxu0 %v4815_v38  ;;  %2016 = vmatprep.subr.bf16.mxu1 %v4822_v42 }
 0x2c6   :  { %1976 = vmatpush1.bf16.msra.mxu0 %v4818_v40  ;;  %2017 = vmatpush1.bf16.msra.mxu1 %v4820_v41 }
 0x2c7   :  { %1977 = vmatprep.subr.bf16.mxu0 %v4827_v46  ;;  %2018 = vmatprep.subr.bf16.mxu1 %v4834_v50 }
 0x2ca   :  { %1978 = vmatpush1.bf16.msra.mxu0 %v4830_v48  ;;  %2019 = vmatpush1.bf16.msra.mxu1 %v4832_v49  ;;  %v6674_v49 = vld [vmem:[#allocation60_spill] sm:$0xff] }
 0x2cb   :  { %1979 = vmatprep.subr.bf16.mxu0 %v4841_v55  ;;  %2020 = vmatprep.subr.bf16.mxu1 %v6665_v63  ;;  %v6675_v55 = vld [vmem:[#allocation62_spill] sm:$0xff]  ;;  %v6676_v63 = vld [vmem:[#allocation100_spill] sm:$0xff] }
 0x2ce   :  { %1980 = vmatpush1.bf16.msra.mxu0 %v6666_v18  ;;  %2021 = vmatpush1.bf16.msra.mxu1 %v6667_v44  ;;  %v6677_v18 = vld [vmem:[#allocation101_spill] sm:$0xff]  ;;  %v6678_v44 = vld [vmem:[#allocation102_spill] sm:$0xff] }
 0x2cf   :  { %1981 = vmatprep.subr.bf16.mxu0 %v6668_v39  ;;  %2022 = vmatprep.subr.bf16.mxu1 %v6669_v37  ;;  %v6679_v39 = vld [vmem:[#allocation103_spill] sm:$0xff]  ;;  %v6680_v37 = vld [vmem:[#allocation104_spill] sm:$0xff] }
 0x2d2   :  { %1982 = vmatpush1.bf16.msra.mxu0 %v6670_v58  ;;  %2023 = vmatpush1.bf16.msra.mxu1 %v6671_v57  ;;  %v6681_v58 = vld [vmem:[#allocation105_spill] sm:$0xff]  ;;  %v6682_v57 = vld [vmem:[#allocation106_spill] sm:$0xff] }
 0x2d3   :  { %1983 = vmatprep.subr.bf16.mxu0 %v6672_v47  ;;  %2024 = vmatprep.subr.bf16.mxu1 %v6673_v25  ;;  %v6683_v47 = vld [vmem:[#allocation107_spill] sm:$0xff]  ;;  %v6684_v25 = vld [vmem:[#allocation108_spill] sm:$0xff] }
 0x2d6   :  { %1984 = vmatpush1.bf16.msra.mxu0 %v6674_v49  ;;  %2025 = vmatpush1.bf16.msra.mxu1 %v6675_v55  ;;  %v6685_v49 = vld [vmem:[#allocation109_spill] sm:$0xff]  ;;  %v6686_v55 = vld [vmem:[#allocation110_spill] sm:$0xff] }
 0x2d7   :  { %1985 = vmatprep.subr.bf16.mxu0 %v6676_v63  ;;  %2026 = vmatprep.subr.bf16.mxu1 %v6677_v18  ;;  %v6687_v63 = vld [vmem:[#allocation111_spill] sm:$0xff]  ;;  %v6688_v18 = vld [vmem:[#allocation112_spill] sm:$0xff] }
 0x2da   :  { %1986 = vmatpush1.bf16.msra.mxu0 %v6678_v44  ;;  %2027 = vmatpush1.bf16.msra.mxu1 %v6679_v39  ;;  %v6689_v44 = vld [vmem:[#allocation113_spill] sm:$0xff]  ;;  %v6690_v39 = vld [vmem:[#allocation114_spill] sm:$0xff] }
 0x2db   :  { %1987 = vmatprep.subr.bf16.mxu0 %v6680_v37  ;;  %2028 = vmatprep.subr.bf16.mxu1 %v6681_v58  ;;  %v6691_v37 = vld [vmem:[#allocation115_spill] sm:$0xff]  ;;  %v6692_v58 = vld [vmem:[#allocation116_spill] sm:$0xff] }
 0x2de   :  { %1988 = vmatpush1.bf16.msra.mxu0 %v6682_v57  ;;  %2029 = vmatpush1.bf16.msra.mxu1 %v6683_v47  ;;  %v6693_v57 = vld [vmem:[#allocation118_spill] sm:$0xff] }
 0x2df   :  { %1989 = vmatprep.subr.bf16.mxu0 %v6684_v25  ;;  %2030 = vmatprep.subr.bf16.mxu1 %v6685_v49 }
 0x2e2   :  { %1990 = vmatpush1.bf16.msra.mxu0 %v6686_v55  ;;  %2031 = vmatpush1.bf16.msra.mxu1 %v6687_v63  ;;  %v6694_v55 = vld [vmem:[#allocation121_spill] sm:$0xff] }
 0x2e3   :  { %1991 = vmatprep.subr.bf16.mxu0 %v6688_v18  ;;  %2032 = vmatprep.subr.bf16.mxu1 %v6689_v44  ;;  %v6695_v44 = vld [vmem:[#allocation124_spill] sm:$0xff] }
 0x2e6   :  { %1992 = vmatpush1.bf16.msra.mxu0 %v6690_v39  ;;  %2033 = vmatpush1.bf16.msra.mxu1 %v6691_v37  ;;  %v6696_v39 = vld [vmem:[#allocation125_spill] sm:$0xff]  ;;  %v6697_v37 = vld [vmem:[#allocation126_spill] sm:$0xff] }
 0x2e7   :  { %1993 = vmatprep.subr.bf16.mxu0 %v6692_v58  ;;  %2034 = vmatprep.subr.bf16.mxu1 %v6693_v57  ;;  %v6698_v58 = vld [vmem:[#allocation127_spill] sm:$0xff]  ;;  %v6699_v57 = vld [vmem:[#allocation128_spill] sm:$0xff] }
 0x2ea   :  { %1994 = vmatpush1.bf16.msra.mxu0 %v5102_v61  ;;  %2035 = vmatpush1.bf16.msra.mxu1 %v5107_v45  ;;  %v6700_v61 = vld [vmem:[#allocation129_spill] sm:$0xff]  ;;  %v6701_v45 = vld [vmem:[#allocation130_spill] sm:$0xff] }
 0x2eb   :  { %1995 = vmatprep.subr.bf16.mxu0 %v5109_v28  ;;  %2036 = vmatprep.subr.bf16.mxu1 %v6694_v55  ;;  %v6702_v28 = vld [vmem:[#allocation131_spill] sm:$0xff]  ;;  %v6703_v55 = vld [vmem:[#allocation61_spill] sm:$0xff] }
 0x2ee   :  { %1996 = vmatpush1.bf16.msra.mxu0 %v5116_v6  ;;  %2037 = vmatpush1.bf16.msra.mxu1 %v5120_v12  ;;  %v6704_v6 = vld [vmem:[#allocation63_spill] sm:$0xff] }
 0x2ef   :  { %1997 = vmatprep.subr.bf16.mxu0 %v6695_v44  ;;  %2038 = vmatprep.subr.bf16.mxu1 %v6696_v39 }
 0x2f2   :  { %1998 = vmatpush1.bf16.msra.mxu0 %v6697_v37  ;;  %2039 = vmatpush1.bf16.msra.mxu1 %v6698_v58 }
 0x2f3   :  { %1999 = vmatprep.subr.bf16.mxu0 %v6699_v57  ;;  %2040 = vmatprep.subr.bf16.mxu1 %v6700_v61 }
 0x2f6   :  { %2000 = vmatpush1.bf16.msra.mxu0 %v6701_v45  ;;  %2041 = vmatpush1.bf16.msra.mxu1 %v6702_v28 }
 0x2f7   :  { %2051 = vmatprep.subr.bf16.mxu0 %v6703_v55  ;;  %2092 = vmatprep.subr.bf16.mxu1 %v6704_v6 }
 0x34c   :  { %v1759_v12 = vpop.f32.mrb[12].mxu0  ;;  %v1800_v44 = vpop.f32.mrb[12].mxu1 }
 0x34d   :  { %v1922_v18 = vrot.slane %v1759_v12, 4  ;;  %v1761_v39 = vpop.f32.mrb[13].mxu0  ;;  %v1802_v63 = vpop.f32.mrb[13].mxu1  ;;  %v1924_v55 = vrot.slane %v1800_v44, 4  ;;  %v6705_v12 = vld [vmem:[#allocation71_spill] sm:$0xff]  ;;  %v1954_v44 = vrot.slane %v5169_v36, 6 }
 0x34e   :  { %v1923_v37 = vrot.slane %v1761_v39, 4  ;;  %v1763_v49 = vpop.f32.mrb[14].mxu0  ;;  %v1804_v58 = vpop.f32.mrb[14].mxu1  ;;  %v1925_v6 = vrot.slane %v1802_v63, 4 }
 0x34f   :  { %v1930_v57 = vadd.f32 %v1922_v18, %v4900_v51  ;;  %v1764_v25 = vpop.f32.mrb[15].mxu0  ;;  %v1805_v61 = vpop.f32.mrb[15].mxu1  ;;  %v1932_v48 = vadd.f32 %v1924_v55, %v4914_v2 }
 0x350   :  { %v1931_v45 = vadd.f32 %v1923_v37, %v5153_v8  ;;  %v1933_v50 = vadd.f32 %v1925_v6, %v6705_v12 }
 0x351   :  { %v4077_v47 = vmul.f32 -1.442695, %v1930_v57  ;;  %v4079_v46 = vmul.f32 -1.442695, %v1932_v48 }
 0x352   :  { %v4078_v28 = vmul.f32 -1.442695, %v1931_v45 }
 0x353   :  { %4290 = vpow2.f32 %v4077_v47 }
 0x354   :  { %4292 = vpow2.f32 %v4078_v28 }
 0x355   :  { %4294 = vtanh.f32 %v1933_v50 }
 0x356   :  { %4296 = vpow2.f32 %v4079_v46 }
 0x35d   :  { %v4291_v39 = vpop.eup %4290 }
 0x35e   :  { %v1943_v49 = vadd.f32 1.0, %v4291_v39  ;;  %v4293_v58 = vpop.eup %4292 }
 0x35f   :  { %v1944_v61 = vadd.f32 1.0, %v4293_v58  ;;  %v4295_v18 = vpop.eup %4294 }
 0x360   :  { %4298 = vrcp.f32 %v1943_v49  ;;  %v4297_v37 = vpop.eup %4296 }
 0x361   :  { %4300 = vrcp.f32 %v1944_v61  ;;  %v1945_v57 = vadd.f32 1.0, %v4297_v37  ;;  %v6707_v61 = vld [vmem:[#allocation36_spill] sm:$0xff] }
 0x363   :  { %4302 = vrcp.f32 %v1945_v57 }
 0x36a   :  { %v4299_v45 = vpop.eup %4298 }
 0x36b   :  { %v1957_v28 = vmul.f32 %v4299_v45, %v4295_v18  ;;  %v4301_v63 = vpop.eup %4300 }
 0x36c   :  { %v1956_v55 = vmul.f32 %v4301_v63, %v1954_v44 }
 0x36d   :  { %v4303_v48 = vpop.eup %4302 }
 0x36e   :  { %v5384_v47 = vadd.f32 %v1957_v28, %v1956_v55 }
 0x370   :  { %6706 = vst [vmem:[#allocation71_spill] sm:$0xff] %v5384_v47  ;;  %4304 = vtanh.f32 %v5384_v47 }
 0x37a   :  { %v4305_v50 = vpop.eup %4304 }
 0x37b   :  { %v1960_v46 = vmul.f32 %v4305_v50, %v4303_v48 }
 0x38c   :  { %v1841_v6 = vpop.f32.mrb[16].mxu0  ;;  %v1882_v25 = vpop.f32.mrb[16].mxu1 }
 0x38d   :  { %v1889_v39 = vadd.f32 %v1841_v6, %v5161_v29  ;;  %v1843_v49 = vpop.f32.mrb[17].mxu0  ;;  %v1884_v58 = vpop.f32.mrb[17].mxu1  ;;  %v1891_v57 = vadd.f32 %v1882_v25, %v5167_v59 }
 0x38e   :  { %v1890_v36 = vadd.f32 %v1843_v49, %v6707_v61  ;;  %v1845_v18 = vpop.f32.mrb[18].mxu0  ;;  %v1886_v45 = vpop.f32.mrb[18].mxu1  ;;  %v1892_v55 = vadd.f32 %v1884_v58, %v5175_v31 }
 0x38f   :  { %v4074_v37 = vmul.f32 -1.442695, %v1889_v39  ;;  %v1846_v44 = vpop.f32.mrb[19].mxu0  ;;  %v1887_v28 = vpop.f32.mrb[19].mxu1  ;;  %v4076_v48 = vmul.f32 -1.442695, %v1891_v57 }
 0x390   :  { %v4075_v63 = vmul.f32 -1.442695, %v1890_v36 }
 0x391   :  { %4306 = vpow2.f32 %v4074_v37 }
 0x392   :  { %4308 = vpow2.f32 %v4075_v63 }
 0x393   :  { %4310 = vtanh.f32 %v1892_v55 }
 0x394   :  { %4312 = vpow2.f32 %v4076_v48 }
 0x39b   :  { %v4307_v50 = vpop.eup %4306 }
 0x39c   :  { %v1902_v47 = vadd.f32 1.0, %v4307_v50  ;;  %v4309_v6 = vpop.eup %4308 }
 0x39d   :  { %v1903_v49 = vadd.f32 1.0, %v4309_v6  ;;  %v4311_v18 = vpop.eup %4310 }
 0x39e   :  { %4314 = vrcp.f32 %v1902_v47  ;;  %v4313_v39 = vpop.eup %4312  ;;  %v1961_v47 = vpack.c.bf16 %v1960_v46, %v1960_v46  ;;  %v6709_v46 = vld [vmem:[#allocation80_spill] sm:$0xff] }
 0x39f   :  { %4316 = vrcp.f32 %v1903_v49  ;;  %v1904_v37 = vadd.f32 1.0, %v4313_v39  ;;  %v6710_v49 = vld [vmem:[#allocation81_spill] sm:$0xff]  ;;  %v6712_v39 = vld [vmem:[#allocation83_spill] sm:$0xff] }
 0x3a0   :  { %v5395_v6 = vrot.slane %v1961_v47, 2  ;;  %v6722_v47 = vld [vmem:[#allocation93_spill] sm:$0xff] }
 0x3a1   :  { %4318 = vrcp.f32 %v1904_v37  ;;  %v6716_v37 = vld [vmem:[#allocation87_spill] sm:$0xff] }
 0x3a8   :  { %v4315_v45 = vpop.eup %4314 }
 0x3a9   :  { %v1913_v44 = vmul.f32 %v4315_v45, %v4311_v18  ;;  %v4317_v36 = vpop.eup %4316  ;;  %v6711_v18 = vld [vmem:[#allocation82_spill] sm:$0xff]  ;;  %v6713_v45 = vld [vmem:[#allocation84_spill] sm:$0xff] }
 0x3aa   :  { %v1912_v28 = vmul.f32 %v4317_v36, %v5178_v4  ;;  %v6708_v4 = vld [vmem:[#allocation79_spill] sm:$0xff]  ;;  %v6715_v36 = vld [vmem:[#allocation86_spill] sm:$0xff] }
 0x3ab   :  { %v4319_v58 = vpop.eup %4318 }
 0x3ac   :  { %v5392_v25 = vadd.f32 %v1913_v44, %v1912_v28  ;;  %v6714_v44 = vld [vmem:[#allocation85_spill] sm:$0xff]  ;;  %v6717_v28 = vld [vmem:[#allocation88_spill] sm:$0xff] }
 0x3ae   :  { %4320 = vtanh.f32 %v5392_v25 }
 0x3b8   :  { %v4321_v63 = vpop.eup %4320 }
 0x3b9   :  { %v1916_v57 = vmul.f32 %v4321_v63, %v4319_v58  ;;  %v6718_v58 = vld [vmem:[#allocation89_spill] sm:$0xff]  ;;  %v6719_v63 = vld [vmem:[#allocation90_spill] sm:$0xff] }
 0x3bb   :  { %v1917_v55 = vpack.c.bf16 %v1916_v57, %v1916_v57  ;;  %v6720_v57 = vld [vmem:[#allocation91_spill] sm:$0xff] }
 0x3bd   :  { %v1963_v48 = vrot.slane %v1917_v55, 6  ;;  %v6721_v55 = vld [vmem:[#allocation92_spill] sm:$0xff] }
 0x3bf   :  { %v1966_v50 = vrot.slane %v1963_v48, 2  ;;  %v6723_v48 = vld [vmem:[#allocation94_spill] sm:$0xff] }
 0x3c1   :  { %2001 = vmatprep.mubr.bf16.mxu0 %v1966_v50  ;;  %2042 = vmatprep.mubr.bf16.mxu1 %v1966_v50 }
 0x3c2   :  { %2002 = vmatmul.mubr.bf16.vlgmr.msra.gmra.mrb[20].mxu0 %v5395_v6  ;;  %2043 = vmatmul.mubr.bf16.vlgmr.msra.gmra.mrb[20].mxu1 %v5395_v6 }
 0x3c3   :  { %2052 = vmatpush1.bf16.msra.mxu0 %v4857_v11  ;;  %2093 = vmatpush1.bf16.msra.mxu1 %v6616_v52 }
 0x3c4   :  { %2083 = vmatprep.mubr.bf16.mxu0 %v1966_v50  ;;  %2124 = vmatprep.mubr.bf16.mxu1 %v1966_v50  ;;  %v6724_v50 = vld [vmem:[#allocation95_spill] sm:$0xff] }
 0x3c5   :  { %2053 = vmatprep.subr.bf16.mxu0 %v6617_v3  ;;  %2094 = vmatprep.subr.bf16.mxu1 %v6618_v54 }
 0x3c7   :  { %2054 = vmatpush1.bf16.msra.mxu0 %v6619_v27  ;;  %2095 = vmatpush1.bf16.msra.mxu1 %v6620_v20 }
 0x3c8   :  { %2055 = vmatprep.subr.bf16.mxu0 %v6621_v62  ;;  %2096 = vmatprep.subr.bf16.mxu1 %v6622_v17 }
 0x3cb   :  { %2056 = vmatpush1.bf16.msra.mxu0 %v6623_v7  ;;  %2097 = vmatpush1.bf16.msra.mxu1 %v6708_v4 }
 0x3cc   :  { %2057 = vmatprep.subr.bf16.mxu0 %v6709_v46  ;;  %2098 = vmatprep.subr.bf16.mxu1 %v6710_v49 }
 0x3cf   :  { %2058 = vmatpush1.bf16.msra.mxu0 %v6711_v18  ;;  %2099 = vmatpush1.bf16.msra.mxu1 %v6712_v39 }
 0x3d0   :  { %2059 = vmatprep.subr.bf16.mxu0 %v6713_v45  ;;  %2100 = vmatprep.subr.bf16.mxu1 %v6714_v44  ;;  %v6725_v44 = vld [vmem:[#allocation96_spill] sm:$0xff] }
 0x3d3   :  { %2060 = vmatpush1.bf16.msra.mxu0 %v6715_v36  ;;  %2101 = vmatpush1.bf16.msra.mxu1 %v6716_v37  ;;  %v6726_v36 = vld [vmem:[#allocation97_spill] sm:$0xff]  ;;  %v6727_v37 = vld [vmem:[#allocation98_spill] sm:$0xff] }
 0x3d4   :  { %2061 = vmatprep.subr.bf16.mxu0 %v6717_v28  ;;  %2102 = vmatprep.subr.bf16.mxu1 %v6718_v58  ;;  %v6728_v28 = vld [vmem:[#allocation99_spill] sm:$0xff]  ;;  %v6729_v58 = vld [vmem:[#allocation57_spill] sm:$0xff] }
 0x3d7   :  { %2062 = vmatpush1.bf16.msra.mxu0 %v6719_v63  ;;  %2103 = vmatpush1.bf16.msra.mxu1 %v6720_v57  ;;  %v6730_v63 = vld [vmem:[#allocation72_spill] sm:$0xff]  ;;  %v6731_v57 = vld [vmem:[#allocation73_spill] sm:$0xff] }
 0x3d8   :  { %2063 = vmatprep.subr.bf16.mxu0 %v6721_v55  ;;  %2104 = vmatprep.subr.bf16.mxu1 %v6722_v47  ;;  %v6732_v55 = vld [vmem:[#allocation74_spill] sm:$0xff]  ;;  %v6733_v47 = vld [vmem:[#allocation75_spill] sm:$0xff] }
 0x3db   :  { %2064 = vmatpush1.bf16.msra.mxu0 %v6723_v48  ;;  %2105 = vmatpush1.bf16.msra.mxu1 %v6724_v50  ;;  %v6734_v48 = vld [vmem:[#allocation76_spill] sm:$0xff]  ;;  %v6735_v50 = vld [vmem:[#allocation77_spill] sm:$0xff] }
 0x3dc   :  { %2065 = vmatprep.subr.bf16.mxu0 %v6725_v44  ;;  %2106 = vmatprep.subr.bf16.mxu1 %v6726_v36  ;;  %v6736_v44 = vld [vmem:[#allocation78_spill] sm:$0xff]  ;;  %v6737_v36 = vld [vmem:[#allocation135_spill] sm:$0xff] }
 0x3df   :  { %2066 = vmatpush1.bf16.msra.mxu0 %v6727_v37  ;;  %2107 = vmatpush1.bf16.msra.mxu1 %v6728_v28  ;;  %v6738_v37 = vld [vmem:[#allocation136_spill] sm:$0xff]  ;;  %v6739_v28 = vld [vmem:[#allocation137_spill] sm:$0xff] }
 0x3e0   :  { %2067 = vmatprep.subr.bf16.mxu0 %v6729_v58  ;;  %2108 = vmatprep.subr.bf16.mxu1 %v6730_v63  ;;  %v6740_v58 = vld [vmem:[#allocation138_spill] sm:$0xff]  ;;  %v6741_v63 = vld [vmem:[#allocation139_spill] sm:$0xff] }
 0x3e3   :  { %2068 = vmatpush1.bf16.msra.mxu0 %v6731_v57  ;;  %2109 = vmatpush1.bf16.msra.mxu1 %v6732_v55  ;;  %v6742_v57 = vld [vmem:[#allocation140_spill] sm:$0xff]  ;;  %v6743_v55 = vld [vmem:[#allocation141_spill] sm:$0xff] }
 0x3e4   :  { %2069 = vmatprep.subr.bf16.mxu0 %v6733_v47  ;;  %2110 = vmatprep.subr.bf16.mxu1 %v6734_v48  ;;  %v6744_v47 = vld [vmem:[#allocation142_spill] sm:$0xff]  ;;  %v6745_v48 = vld [vmem:[#allocation143_spill] sm:$0xff] }
 0x3e7   :  { %2070 = vmatpush1.bf16.msra.mxu0 %v6735_v50  ;;  %2111 = vmatpush1.bf16.msra.mxu1 %v6736_v44  ;;  %v6746_v50 = vld [vmem:[#allocation144_spill] sm:$0xff] }
 0x3e8   :  { %2071 = vmatprep.subr.bf16.mxu0 %v6737_v36  ;;  %2112 = vmatprep.subr.bf16.mxu1 %v6738_v37 }
 0x3eb   :  { %2072 = vmatpush1.bf16.msra.mxu0 %v6739_v28  ;;  %2113 = vmatpush1.bf16.msra.mxu1 %v6740_v58  ;;  %v6747_v28 = vld [vmem:[#allocation148_spill] sm:$0xff]  ;;  %v6748_v58 = vld [vmem:[#allocation149_spill] sm:$0xff] }
 0x3ec   :  { %2073 = vmatprep.subr.bf16.mxu0 %v6741_v63  ;;  %2114 = vmatprep.subr.bf16.mxu1 %v6742_v57 }
 0x3ef   :  { %2074 = vmatpush1.bf16.msra.mxu0 %v6743_v55  ;;  %2115 = vmatpush1.bf16.msra.mxu1 %v6744_v47 }
 0x3f0   :  { %2075 = vmatprep.subr.bf16.mxu0 %v6745_v48  ;;  %2116 = vmatprep.subr.bf16.mxu1 %v6746_v50 }
 0x3f3   :  { %2076 = vmatpush1.bf16.msra.mxu0 %v5267_v43  ;;  %2117 = vmatpush1.bf16.msra.mxu1 %v5269_v1 }
 0x3f4   :  { %2077 = vmatprep.subr.bf16.mxu0 %v5273_v9  ;;  %2118 = vmatprep.subr.bf16.mxu1 %v6747_v28 }
 0x3f7   :  { %2078 = vmatpush1.bf16.msra.mxu0 %v6748_v58  ;;  %2119 = vmatpush1.bf16.msra.mxu1 %v5281_v26 }
 0x3f8   :  { %2079 = vmatprep.subr.bf16.mxu0 %v5285_v21  ;;  %2120 = vmatprep.subr.bf16.mxu1 %v5287_v5 }
 0x3fb   :  { %2080 = vmatpush1.bf16.msra.mxu0 %v5291_v16  ;;  %2121 = vmatpush1.bf16.msra.mxu1 %v5293_v60 }
 0x3fc   :  { %2081 = vmatprep.subr.bf16.mxu0 %v5297_v35  ;;  %2122 = vmatprep.subr.bf16.mxu1 %v5299_v56 }
 0x3ff   :  { %2082 = vmatpush1.bf16.msra.mxu0 %v5303_v53  ;;  %2123 = vmatpush1.bf16.msra.mxu1 %v5305_v0 }
 0x400   :  { %2213 = vmatprep.subr.bf16.mxu0 %v4766_v10  ;;  %2254 = vmatprep.subr.bf16.mxu1 %v4775_v15 }
 0x402   :  { %2084 = vmatmul.mubr.bf16.vlgmr.msra.gmra.mrb[24].mxu0 %v5395_v6  ;;  %2125 = vmatmul.mubr.bf16.vlgmr.msra.gmra.mrb[24].mxu1 %v5395_v6  ;;  %v6749_v6 = vld [vmem:[#allocation45_spill] sm:$0xff] }
 0x403   :  { %2214 = vmatpush1.bf16.msra.mxu0 %v4770_v13  ;;  %2255 = vmatpush1.bf16.msra.mxu1 %v4772_v14 }
 0x404   :  { %2215 = vmatprep.subr.bf16.mxu0 %v4779_v19  ;;  %2256 = vmatprep.subr.bf16.mxu1 %v4789_v24 }
 0x407   :  { %2216 = vmatpush1.bf16.msra.mxu0 %v4785_v22  ;;  %2257 = vmatpush1.bf16.msra.mxu1 %v4787_v23  ;;  %v6750_v22 = vld [vmem:[#allocation48_spill] sm:$0xff]  ;;  %v6751_v23 = vld [vmem:[#allocation46_spill] sm:$0xff] }
 0x408   :  { %2217 = vmatprep.subr.bf16.mxu0 %v4803_v30  ;;  %2258 = vmatprep.subr.bf16.mxu1 %v4810_v34  ;;  %v6752_v30 = vld [vmem:[#allocation47_spill] sm:$0xff]  ;;  %v6753_v34 = vld [vmem:[#allocation50_spill] sm:$0xff] }
 0x40b   :  { %2218 = vmatpush1.bf16.msra.mxu0 %v4806_v32  ;;  %2259 = vmatpush1.bf16.msra.mxu1 %v4808_v33  ;;  %v6754_v32 = vld [vmem:[#allocation51_spill] sm:$0xff]  ;;  %v6755_v33 = vld [vmem:[#allocation49_spill] sm:$0xff] }
 0x40c   :  { %2219 = vmatprep.subr.bf16.mxu0 %v4815_v38  ;;  %2260 = vmatprep.subr.bf16.mxu1 %v4822_v42  ;;  %v6756_v38 = vld [vmem:[#allocation53_spill] sm:$0xff]  ;;  %v6757_v42 = vld [vmem:[#allocation52_spill] sm:$0xff] }
 0x40f   :  { %2220 = vmatpush1.bf16.msra.mxu0 %v4818_v40  ;;  %2261 = vmatpush1.bf16.msra.mxu1 %v4820_v41  ;;  %v6758_v40 = vld [vmem:[#allocation54_spill] sm:$0xff]  ;;  %v6759_v41 = vld [vmem:[#allocation55_spill] sm:$0xff] }
 0x410   :  { %2221 = vmatprep.subr.bf16.mxu0 %v6749_v6  ;;  %2262 = vmatprep.subr.bf16.mxu1 %v6750_v22  ;;  %v6760_v6 = vld [vmem:[#allocation58_spill] sm:$0xff]  ;;  %v6761_v22 = vld [vmem:[#allocation56_spill] sm:$0xff] }
 0x413   :  { %2222 = vmatpush1.bf16.msra.mxu0 %v6751_v23  ;;  %2263 = vmatpush1.bf16.msra.mxu1 %v6752_v30  ;;  %v6762_v23 = vld [vmem:[#allocation59_spill] sm:$0xff]  ;;  %v6763_v30 = vld [vmem:[#allocation60_spill] sm:$0xff] }
 0x414   :  { %2223 = vmatprep.subr.bf16.mxu0 %v6753_v34  ;;  %2264 = vmatprep.subr.bf16.mxu1 %v6754_v32  ;;  %v6764_v34 = vld [vmem:[#allocation62_spill] sm:$0xff]  ;;  %v6765_v32 = vld [vmem:[#allocation100_spill] sm:$0xff] }
 0x417   :  { %2224 = vmatpush1.bf16.msra.mxu0 %v6755_v33  ;;  %2265 = vmatpush1.bf16.msra.mxu1 %v6756_v38  ;;  %v6766_v33 = vld [vmem:[#allocation101_spill] sm:$0xff]  ;;  %v6767_v38 = vld [vmem:[#allocation102_spill] sm:$0xff] }
 0x418   :  { %2225 = vmatprep.subr.bf16.mxu0 %v6757_v42  ;;  %2266 = vmatprep.subr.bf16.mxu1 %v6758_v40  ;;  %v6768_v42 = vld [vmem:[#allocation103_spill] sm:$0xff]  ;;  %v6769_v40 = vld [vmem:[#allocation104_spill] sm:$0xff] }
 0x41b   :  { %2226 = vmatpush1.bf16.msra.mxu0 %v6759_v41  ;;  %2267 = vmatpush1.bf16.msra.mxu1 %v6760_v6  ;;  %v6770_v41 = vld [vmem:[#allocation105_spill] sm:$0xff]  ;;  %v6771_v6 = vld [vmem:[#allocation106_spill] sm:$0xff] }
 0x41c   :  { %2227 = vmatprep.subr.bf16.mxu0 %v6761_v22  ;;  %2268 = vmatprep.subr.bf16.mxu1 %v6762_v23  ;;  %v6772_v22 = vld [vmem:[#allocation107_spill] sm:$0xff]  ;;  %v6773_v23 = vld [vmem:[#allocation108_spill] sm:$0xff] }
 0x41f   :  { %2228 = vmatpush1.bf16.msra.mxu0 %v6763_v30  ;;  %2269 = vmatpush1.bf16.msra.mxu1 %v6764_v34  ;;  %v6774_v30 = vld [vmem:[#allocation109_spill] sm:$0xff]  ;;  %v6775_v34 = vld [vmem:[#allocation110_spill] sm:$0xff] }
 0x420   :  { %2229 = vmatprep.subr.bf16.mxu0 %v6765_v32  ;;  %2270 = vmatprep.subr.bf16.mxu1 %v6766_v33  ;;  %v6776_v32 = vld [vmem:[#allocation111_spill] sm:$0xff]  ;;  %v6777_v33 = vld [vmem:[#allocation112_spill] sm:$0xff] }
 0x423   :  { %2230 = vmatpush1.bf16.msra.mxu0 %v6767_v38  ;;  %2271 = vmatpush1.bf16.msra.mxu1 %v6768_v42  ;;  %v6778_v38 = vld [vmem:[#allocation113_spill] sm:$0xff]  ;;  %v6779_v42 = vld [vmem:[#allocation114_spill] sm:$0xff] }
 0x424   :  { %2231 = vmatprep.subr.bf16.mxu0 %v6769_v40  ;;  %2272 = vmatprep.subr.bf16.mxu1 %v6770_v41  ;;  %v6780_v40 = vld [vmem:[#allocation115_spill] sm:$0xff]  ;;  %v6781_v41 = vld [vmem:[#allocation116_spill] sm:$0xff] }
 0x427   :  { %2232 = vmatpush1.bf16.msra.mxu0 %v6771_v6  ;;  %2273 = vmatpush1.bf16.msra.mxu1 %v6772_v22  ;;  %v6782_v6 = vld [vmem:[#allocation118_spill] sm:$0xff]  ;;  %v6783_v22 = vld [vmem:[#allocation117_spill] sm:$0xff] }
 0x428   :  { %2233 = vmatprep.subr.bf16.mxu0 %v6773_v23  ;;  %2274 = vmatprep.subr.bf16.mxu1 %v6774_v30  ;;  %v6784_v23 = vld [vmem:[#allocation119_spill] sm:$0xff]  ;;  %v6785_v30 = vld [vmem:[#allocation120_spill] sm:$0xff] }
 0x42b   :  { %2234 = vmatpush1.bf16.msra.mxu0 %v6775_v34  ;;  %2275 = vmatpush1.bf16.msra.mxu1 %v6776_v32  ;;  %v6786_v34 = vld [vmem:[#allocation121_spill] sm:$0xff]  ;;  %v6787_v32 = vld [vmem:[#allocation122_spill] sm:$0xff] }
 0x42c   :  { %2235 = vmatprep.subr.bf16.mxu0 %v6777_v33  ;;  %2276 = vmatprep.subr.bf16.mxu1 %v6778_v38  ;;  %v6788_v33 = vld [vmem:[#allocation123_spill] sm:$0xff]  ;;  %v6789_v38 = vld [vmem:[#allocation124_spill] sm:$0xff] }
 0x42f   :  { %2236 = vmatpush1.bf16.msra.mxu0 %v6779_v42  ;;  %2277 = vmatpush1.bf16.msra.mxu1 %v6780_v40  ;;  %v6790_v42 = vld [vmem:[#allocation125_spill] sm:$0xff]  ;;  %v6791_v40 = vld [vmem:[#allocation126_spill] sm:$0xff] }
 0x430   :  { %2237 = vmatprep.subr.bf16.mxu0 %v6781_v41  ;;  %2278 = vmatprep.subr.bf16.mxu1 %v6782_v6  ;;  %v6792_v41 = vld [vmem:[#allocation127_spill] sm:$0xff]  ;;  %v6793_v6 = vld [vmem:[#allocation128_spill] sm:$0xff] }
 0x433   :  { %2238 = vmatpush1.bf16.msra.mxu0 %v6783_v22  ;;  %2279 = vmatpush1.bf16.msra.mxu1 %v6784_v23  ;;  %v6794_v22 = vld [vmem:[#allocation129_spill] sm:$0xff]  ;;  %v6795_v23 = vld [vmem:[#allocation130_spill] sm:$0xff] }
 0x434   :  { %2239 = vmatprep.subr.bf16.mxu0 %v6785_v30  ;;  %2280 = vmatprep.subr.bf16.mxu1 %v6786_v34  ;;  %v6796_v30 = vld [vmem:[#allocation131_spill] sm:$0xff]  ;;  %v6797_v34 = vld [vmem:[#allocation61_spill] sm:$0xff] }
 0x437   :  { %2240 = vmatpush1.bf16.msra.mxu0 %v6787_v32  ;;  %2281 = vmatpush1.bf16.msra.mxu1 %v6788_v33  ;;  %v6798_v32 = vld [vmem:[#allocation63_spill] sm:$0xff] }
 0x438   :  { %2241 = vmatprep.subr.bf16.mxu0 %v6789_v38  ;;  %2282 = vmatprep.subr.bf16.mxu1 %v6790_v42 }
 0x43b   :  { %2242 = vmatpush1.bf16.msra.mxu0 %v6791_v40  ;;  %2283 = vmatpush1.bf16.msra.mxu1 %v6792_v41 }
 0x43c   :  { %2243 = vmatprep.subr.bf16.mxu0 %v6793_v6  ;;  %2284 = vmatprep.subr.bf16.mxu1 %v6794_v22 }
 0x43f   :  { %2244 = vmatpush1.bf16.msra.mxu0 %v6795_v23  ;;  %2285 = vmatpush1.bf16.msra.mxu1 %v6796_v30 }
 0x440   :  { %2295 = vmatprep.subr.bf16.mxu0 %v6797_v34  ;;  %2336 = vmatprep.subr.bf16.mxu1 %v6798_v32 }
 0x495   :  { %v2003_v33 = vpop.f32.mrb[20].mxu0  ;;  %v2044_v38 = vpop.f32.mrb[20].mxu1 }
 0x496   :  { %v2166_v24 = vrot.slane %v2003_v33, 2  ;;  %v2005_v42 = vpop.f32.mrb[21].mxu0  ;;  %v2046_v19 = vpop.f32.mrb[21].mxu1  ;;  %v2168_v34 = vrot.slane %v2044_v38, 2 }
 0x497   :  { %v2167_v40 = vrot.slane %v2005_v42, 2  ;;  %v2007_v14 = vpop.f32.mrb[22].mxu0  ;;  %v2048_v41 = vpop.f32.mrb[22].mxu1  ;;  %v2169_v32 = vrot.slane %v2046_v19, 2 }
 0x498   :  { %v2174_v6 = vadd.f32 %v2166_v24, %v4900_v51  ;;  %v2008_v13 = vpop.f32.mrb[23].mxu0  ;;  %v2049_v22 = vpop.f32.mrb[23].mxu1  ;;  %v2176_v10 = vadd.f32 %v2168_v34, %v4914_v2 }
 0x499   :  { %v2175_v23 = vadd.f32 %v2167_v40, %v5153_v8  ;;  %v2177_v33 = vadd.f32 %v2169_v32, %v6705_v12 }
 0x49a   :  { %v4083_v15 = vmul.f32 -1.442695, %v2174_v6  ;;  %v4085_v0 = vmul.f32 -1.442695, %v2176_v10 }
 0x49b   :  { %v4084_v30 = vmul.f32 -1.442695, %v2175_v23 }
 0x49c   :  { %4322 = vpow2.f32 %v4083_v15  ;;  %v6799_v15 = vld [vmem:[#allocation71_spill] sm:$0xff] }
 0x49d   :  { %4324 = vpow2.f32 %v4084_v30  ;;  %v2198_v38 = vrot.slane %v6799_v15, 6 }
 0x49e   :  { %4326 = vtanh.f32 %v2177_v33 }
 0x49f   :  { %4328 = vpow2.f32 %v4085_v0 }
 0x4a6   :  { %v4323_v42 = vpop.eup %4322 }
 0x4a7   :  { %v2187_v14 = vadd.f32 1.0, %v4323_v42  ;;  %v4325_v41 = vpop.eup %4324 }
 0x4a8   :  { %v2188_v13 = vadd.f32 1.0, %v4325_v41  ;;  %v4327_v22 = vpop.eup %4326 }
 0x4a9   :  { %4330 = vrcp.f32 %v2187_v14  ;;  %v4329_v24 = vpop.eup %4328 }
 0x4aa   :  { %4332 = vrcp.f32 %v2188_v13  ;;  %v2189_v40 = vadd.f32 1.0, %v4329_v24 }
 0x4ac   :  { %4334 = vrcp.f32 %v2189_v40 }
 0x4b3   :  { %v4331_v23 = vpop.eup %4330 }
 0x4b4   :  { %v2201_v30 = vmul.f32 %v4331_v23, %v4327_v22  ;;  %v4333_v19 = vpop.eup %4332 }
 0x4b5   :  { %v2200_v34 = vmul.f32 %v4333_v19, %v2198_v38 }
 0x4b6   :  { %v4335_v10 = vpop.eup %4334 }
 0x4b7   :  { %v5534_v51 = vadd.f32 %v2201_v30, %v2200_v34 }
 0x4b9   :  { %4336 = vtanh.f32 %v5534_v51 }
 0x4c3   :  { %v4337_v32 = vpop.eup %4336 }
 0x4c4   :  { %v2204_v2 = vmul.f32 %v4337_v32, %v4335_v10 }
 0x4d5   :  { %v2085_v8 = vpop.f32.mrb[24].mxu0  ;;  %v2126_v0 = vpop.f32.mrb[24].mxu1 }
 0x4d6   :  { %v2133_v12 = vadd.f32 %v2085_v8, %v5161_v29  ;;  %v2087_v6 = vpop.f32.mrb[25].mxu0  ;;  %v2128_v33 = vpop.f32.mrb[25].mxu1  ;;  %v2135_v15 = vadd.f32 %v2126_v0, %v5167_v59 }
 0x4d7   :  { %v2134_v42 = vadd.f32 %v2087_v6, %v6707_v61  ;;  %v2089_v14 = vpop.f32.mrb[26].mxu0  ;;  %v2130_v41 = vpop.f32.mrb[26].mxu1  ;;  %v2136_v38 = vadd.f32 %v2128_v33, %v5175_v31 }
 0x4d8   :  { %v4080_v13 = vmul.f32 -1.442695, %v2133_v12  ;;  %v2090_v22 = vpop.f32.mrb[27].mxu0  ;;  %v2131_v24 = vpop.f32.mrb[27].mxu1  ;;  %v4082_v30 = vmul.f32 -1.442695, %v2135_v15 }
 0x4d9   :  { %v4081_v23 = vmul.f32 -1.442695, %v2134_v42 }
 0x4da   :  { %4338 = vpow2.f32 %v4080_v13 }
 0x4db   :  { %4340 = vpow2.f32 %v4081_v23  ;;  %v2205_v23 = vpack.c.bf16 %v2204_v2, %v2204_v2  ;;  %v6801_v2 = vld [vmem:[#allocation86_spill] sm:$0xff] }
 0x4dc   :  { %4342 = vtanh.f32 %v2136_v38 }
 0x4dd   :  { %4344 = vpow2.f32 %v4082_v30  ;;  %v5545_v30 = vrot.slane %v2205_v23, 3  ;;  %v6817_v23 = vld [vmem:[#allocation73_spill] sm:$0xff] }
 0x4e4   :  { %v4339_v19 = vpop.eup %4338 }
 0x4e5   :  { %v2146_v40 = vadd.f32 1.0, %v4339_v19  ;;  %v4341_v34 = vpop.eup %4340  ;;  %v6802_v19 = vld [vmem:[#allocation87_spill] sm:$0xff] }
 0x4e6   :  { %v2147_v10 = vadd.f32 1.0, %v4341_v34  ;;  %v4343_v32 = vpop.eup %4342  ;;  %v6804_v34 = vld [vmem:[#allocation89_spill] sm:$0xff] }
 0x4e7   :  { %4346 = vrcp.f32 %v2146_v40  ;;  %v4345_v8 = vpop.eup %4344  ;;  %v6803_v40 = vld [vmem:[#allocation88_spill] sm:$0xff] }
 0x4e8   :  { %4348 = vrcp.f32 %v2147_v10  ;;  %v2148_v14 = vadd.f32 1.0, %v4345_v8  ;;  %v6805_v10 = vld [vmem:[#allocation90_spill] sm:$0xff]  ;;  %v6807_v8 = vld [vmem:[#allocation92_spill] sm:$0xff] }
 0x4ea   :  { %4350 = vrcp.f32 %v2148_v14  ;;  %v6811_v14 = vld [vmem:[#allocation96_spill] sm:$0xff] }
 0x4f1   :  { %v4347_v12 = vpop.eup %4346 }
 0x4f2   :  { %v2157_v6 = vmul.f32 %v4347_v12, %v4343_v32  ;;  %v4349_v42 = vpop.eup %4348  ;;  %v6806_v32 = vld [vmem:[#allocation91_spill] sm:$0xff]  ;;  %v6808_v12 = vld [vmem:[#allocation93_spill] sm:$0xff] }
 0x4f3   :  { %v2156_v41 = vmul.f32 %v4349_v42, %v5392_v25  ;;  %v6800_v25 = vld [vmem:[#allocation85_spill] sm:$0xff]  ;;  %v6810_v42 = vld [vmem:[#allocation95_spill] sm:$0xff] }
 0x4f4   :  { %v4351_v33 = vpop.eup %4350 }
 0x4f5   :  { %v5542_v0 = vadd.f32 %v2157_v6, %v2156_v41  ;;  %v6809_v6 = vld [vmem:[#allocation94_spill] sm:$0xff]  ;;  %v6812_v41 = vld [vmem:[#allocation97_spill] sm:$0xff] }
 0x4f7   :  { %4352 = vtanh.f32 %v5542_v0 }
 0x501   :  { %v4353_v13 = vpop.eup %4352 }
 0x502   :  { %v2160_v22 = vmul.f32 %v4353_v13, %v4351_v33  ;;  %v6813_v33 = vld [vmem:[#allocation98_spill] sm:$0xff]  ;;  %v6814_v13 = vld [vmem:[#allocation99_spill] sm:$0xff] }
 0x504   :  { %v2161_v24 = vpack.c.bf16 %v2160_v22, %v2160_v22  ;;  %v6815_v22 = vld [vmem:[#allocation57_spill] sm:$0xff] }
 0x506   :  { %v2207_v15 = vrot.slane %v2161_v24, 5  ;;  %v6816_v24 = vld [vmem:[#allocation72_spill] sm:$0xff] }
 0x508   :  { %v2210_v38 = vrot.slane %v2207_v15, 3  ;;  %v6818_v15 = vld [vmem:[#allocation74_spill] sm:$0xff] }
 0x50a   :  { %2245 = vmatprep.mubr.bf16.mxu0 %v2210_v38  ;;  %2286 = vmatprep.mubr.bf16.mxu1 %v2210_v38 }
 0x50b   :  { %2246 = vmatmul.mubr.bf16.vlgmr.msra.gmra.mrb[28].mxu0 %v5545_v30  ;;  %2287 = vmatmul.mubr.bf16.vlgmr.msra.gmra.mrb[28].mxu1 %v5545_v30 }
 0x50c   :  { %2296 = vmatpush1.bf16.msra.mxu0 %v4857_v11  ;;  %2337 = vmatpush1.bf16.msra.mxu1 %v6616_v52 }
 0x50d   :  { %2327 = vmatprep.mubr.bf16.mxu0 %v2210_v38  ;;  %2368 = vmatprep.mubr.bf16.mxu1 %v2210_v38  ;;  %v6819_v38 = vld [vmem:[#allocation75_spill] sm:$0xff] }
 0x50e   :  { %2297 = vmatprep.subr.bf16.mxu0 %v6617_v3  ;;  %2338 = vmatprep.subr.bf16.mxu1 %v6618_v54 }
 0x510   :  { %2298 = vmatpush1.bf16.msra.mxu0 %v6619_v27  ;;  %2339 = vmatpush1.bf16.msra.mxu1 %v6620_v20 }
 0x511   :  { %2299 = vmatprep.subr.bf16.mxu0 %v6621_v62  ;;  %2340 = vmatprep.subr.bf16.mxu1 %v6622_v17 }
 0x514   :  { %2300 = vmatpush1.bf16.msra.mxu0 %v6623_v7  ;;  %2341 = vmatpush1.bf16.msra.mxu1 %v6708_v4 }
 0x515   :  { %2301 = vmatprep.subr.bf16.mxu0 %v6709_v46  ;;  %2342 = vmatprep.subr.bf16.mxu1 %v6710_v49 }
 0x518   :  { %2302 = vmatpush1.bf16.msra.mxu0 %v6711_v18  ;;  %2343 = vmatpush1.bf16.msra.mxu1 %v6712_v39 }
 0x519   :  { %2303 = vmatprep.subr.bf16.mxu0 %v6713_v45  ;;  %2344 = vmatprep.subr.bf16.mxu1 %v6800_v25 }
 0x51c   :  { %2304 = vmatpush1.bf16.msra.mxu0 %v6801_v2  ;;  %2345 = vmatpush1.bf16.msra.mxu1 %v6802_v19 }
 0x51d   :  { %2305 = vmatprep.subr.bf16.mxu0 %v6803_v40  ;;  %2346 = vmatprep.subr.bf16.mxu1 %v6804_v34 }
 0x520   :  { %2306 = vmatpush1.bf16.msra.mxu0 %v6805_v10  ;;  %2347 = vmatpush1.bf16.msra.mxu1 %v6806_v32 }
 0x521   :  { %2307 = vmatprep.subr.bf16.mxu0 %v6807_v8  ;;  %2348 = vmatprep.subr.bf16.mxu1 %v6808_v12 }
 0x524   :  { %2308 = vmatpush1.bf16.msra.mxu0 %v6809_v6  ;;  %2349 = vmatpush1.bf16.msra.mxu1 %v6810_v42  ;;  %v6820_v6 = vld [vmem:[#allocation76_spill] sm:$0xff]  ;;  %v6821_v42 = vld [vmem:[#allocation77_spill] sm:$0xff] }
 0x525   :  { %2309 = vmatprep.subr.bf16.mxu0 %v6811_v14  ;;  %2350 = vmatprep.subr.bf16.mxu1 %v6812_v41 }
 0x528   :  { %2310 = vmatpush1.bf16.msra.mxu0 %v6813_v33  ;;  %2351 = vmatpush1.bf16.msra.mxu1 %v6814_v13  ;;  %v6822_v13 = vld [vmem:[#allocation137_spill] sm:$0xff] }
 0x529   :  { %2311 = vmatprep.subr.bf16.mxu0 %v6815_v22  ;;  %2352 = vmatprep.subr.bf16.mxu1 %v6816_v24  ;;  %v6823_v22 = vld [vmem:[#allocation138_spill] sm:$0xff] }
 0x52c   :  { %2312 = vmatpush1.bf16.msra.mxu0 %v6817_v23  ;;  %2353 = vmatpush1.bf16.msra.mxu1 %v6818_v15 }
 0x52d   :  { %2313 = vmatprep.subr.bf16.mxu0 %v6819_v38  ;;  %2354 = vmatprep.subr.bf16.mxu1 %v6820_v6 }
 0x530   :  { %2314 = vmatpush1.bf16.msra.mxu0 %v6821_v42  ;;  %2355 = vmatpush1.bf16.msra.mxu1 %v6736_v44 }
 0x531   :  { %2315 = vmatprep.subr.bf16.mxu0 %v6737_v36  ;;  %2356 = vmatprep.subr.bf16.mxu1 %v6738_v37 }
 0x534   :  { %2316 = vmatpush1.bf16.msra.mxu0 %v6822_v13  ;;  %2357 = vmatpush1.bf16.msra.mxu1 %v6823_v22 }
 0x535   :  { %2317 = vmatprep.subr.bf16.mxu0 %v6741_v63  ;;  %2358 = vmatprep.subr.bf16.mxu1 %v6742_v57 }
 0x538   :  { %2318 = vmatpush1.bf16.msra.mxu0 %v6743_v55  ;;  %2359 = vmatpush1.bf16.msra.mxu1 %v6744_v47  ;;  %v6894_v55 = vld [vmem:[#allocation70_spill] sm:$0xff] }
 0x539   :  { %2319 = vmatprep.subr.bf16.mxu0 %v6745_v48  ;;  %2360 = vmatprep.subr.bf16.mxu1 %v6746_v50 }
 0x53c   :  { %2320 = vmatpush1.bf16.msra.mxu0 %v5267_v43  ;;  %2361 = vmatpush1.bf16.msra.mxu1 %v5269_v1  ;;  %v6892_v43 = vld [vmem:[#allocation68_spill] sm:$0xff] }
 0x53d   :  { %2321 = vmatprep.subr.bf16.mxu0 %v5273_v9  ;;  %2362 = vmatprep.subr.bf16.mxu1 %v6747_v28  ;;  %v6824_v9 = vld [vmem:[#allocation158_spill] sm:$0xff]  ;;  %v6825_v28 = vld [vmem:[#allocation27_spill] sm:$0xff] }
 0x540   :  { %2322 = vmatpush1.bf16.msra.mxu0 %v6748_v58  ;;  %2363 = vmatpush1.bf16.msra.mxu1 %v5281_v26  ;;  %v6826_v58 = vld [vmem:[#allocation30_spill] sm:$0xff]  ;;  %v6891_v26 = vld [vmem:[#allocation67_spill] sm:$0xff] }
 0x541   :  { %2323 = vmatprep.subr.bf16.mxu0 %v5285_v21  ;;  %2364 = vmatprep.subr.bf16.mxu1 %v5287_v5  ;;  %v6827_v5 = vld [vmem:[#allocation28_spill] sm:$0xff]  ;;  %v6836_v21 = vld [vmem:[#allocation39_spill] sm:$0xff] }
 0x544   :  { %2324 = vmatpush1.bf16.msra.mxu0 %v5291_v16  ;;  %2365 = vmatpush1.bf16.msra.mxu1 %v5293_v60  ;;  %v6828_v16 = vld [vmem:[#allocation29_spill] sm:$0xff]  ;;  %v6829_v60 = vld [vmem:[#allocation31_spill] sm:$0xff] }
 0x545   :  { %2325 = vmatprep.subr.bf16.mxu0 %v5297_v35  ;;  %2366 = vmatprep.subr.bf16.mxu1 %v5299_v56  ;;  %v6830_v35 = vld [vmem:[#allocation35_spill] sm:$0xff]  ;;  %v6831_v56 = vld [vmem:[#allocation33_spill] sm:$0xff] }
 0x548   :  { %2326 = vmatpush1.bf16.msra.mxu0 %v5303_v53  ;;  %2367 = vmatpush1.bf16.msra.mxu1 %v6824_v9  ;;  %v6832_v53 = vld [vmem:[#allocation34_spill] sm:$0xff]  ;;  %v6833_v9 = vld [vmem:[#allocation37_spill] sm:$0xff] }
 0x549   :  { %2438 = vmatprep.subr.bf16.mxu0 %v6825_v28  ;;  %2479 = vmatprep.subr.bf16.mxu1 %v6826_v58  ;;  %v6834_v28 = vld [vmem:[#allocation40_spill] sm:$0xff]  ;;  %v6835_v58 = vld [vmem:[#allocation38_spill] sm:$0xff] }
 0x54b   :  { %2328 = vmatmul.mubr.bf16.vlgmr.msra.gmra.mrb[32].mxu0 %v5545_v30  ;;  %2369 = vmatmul.mubr.bf16.vlgmr.msra.gmra.mrb[32].mxu1 %v5545_v30  ;;  %v6837_v30 = vld [vmem:[#allocation41_spill] sm:$0xff] }
 0x54c   :  { %2439 = vmatpush1.bf16.msra.mxu0 %v6827_v5  ;;  %2480 = vmatpush1.bf16.msra.mxu1 %v6828_v16  ;;  %v6838_v5 = vld [vmem:[#allocation44_spill] sm:$0xff]  ;;  %v6839_v16 = vld [vmem:[#allocation42_spill] sm:$0xff] }
 0x54d   :  { %2440 = vmatprep.subr.bf16.mxu0 %v6829_v60  ;;  %2481 = vmatprep.subr.bf16.mxu1 %v6830_v35  ;;  %v6840_v60 = vld [vmem:[#allocation43_spill] sm:$0xff]  ;;  %v6841_v35 = vld [vmem:[#allocation45_spill] sm:$0xff] }
 0x550   :  { %2441 = vmatpush1.bf16.msra.mxu0 %v6831_v56  ;;  %2482 = vmatpush1.bf16.msra.mxu1 %v6832_v53  ;;  %v6842_v56 = vld [vmem:[#allocation48_spill] sm:$0xff]  ;;  %v6843_v53 = vld [vmem:[#allocation46_spill] sm:$0xff] }
 0x551   :  { %2442 = vmatprep.subr.bf16.mxu0 %v6833_v9  ;;  %2483 = vmatprep.subr.bf16.mxu1 %v6834_v28  ;;  %v6844_v9 = vld [vmem:[#allocation47_spill] sm:$0xff]  ;;  %v6845_v28 = vld [vmem:[#allocation50_spill] sm:$0xff] }
 0x554   :  { %2443 = vmatpush1.bf16.msra.mxu0 %v6835_v58  ;;  %2484 = vmatpush1.bf16.msra.mxu1 %v6836_v21  ;;  %v6846_v58 = vld [vmem:[#allocation51_spill] sm:$0xff]  ;;  %v6847_v21 = vld [vmem:[#allocation49_spill] sm:$0xff] }
 0x555   :  { %2444 = vmatprep.subr.bf16.mxu0 %v6837_v30  ;;  %2485 = vmatprep.subr.bf16.mxu1 %v6838_v5  ;;  %v6848_v30 = vld [vmem:[#allocation53_spill] sm:$0xff]  ;;  %v6849_v5 = vld [vmem:[#allocation52_spill] sm:$0xff] }
 0x558   :  { %2445 = vmatpush1.bf16.msra.mxu0 %v6839_v16  ;;  %2486 = vmatpush1.bf16.msra.mxu1 %v6840_v60  ;;  %v6850_v16 = vld [vmem:[#allocation54_spill] sm:$0xff]  ;;  %v6851_v60 = vld [vmem:[#allocation55_spill] sm:$0xff] }
 0x559   :  { %2446 = vmatprep.subr.bf16.mxu0 %v6841_v35  ;;  %2487 = vmatprep.subr.bf16.mxu1 %v6842_v56  ;;  %v6852_v35 = vld [vmem:[#allocation58_spill] sm:$0xff]  ;;  %v6853_v56 = vld [vmem:[#allocation56_spill] sm:$0xff] }
 0x55c   :  { %2447 = vmatpush1.bf16.msra.mxu0 %v6843_v53  ;;  %2488 = vmatpush1.bf16.msra.mxu1 %v6844_v9  ;;  %v6854_v53 = vld [vmem:[#allocation59_spill] sm:$0xff]  ;;  %v6855_v9 = vld [vmem:[#allocation60_spill] sm:$0xff] }
 0x55d   :  { %2448 = vmatprep.subr.bf16.mxu0 %v6845_v28  ;;  %2489 = vmatprep.subr.bf16.mxu1 %v6846_v58  ;;  %v6856_v28 = vld [vmem:[#allocation62_spill] sm:$0xff]  ;;  %v6857_v58 = vld [vmem:[#allocation100_spill] sm:$0xff] }
 0x560   :  { %2449 = vmatpush1.bf16.msra.mxu0 %v6847_v21  ;;  %2490 = vmatpush1.bf16.msra.mxu1 %v6848_v30  ;;  %v6858_v21 = vld [vmem:[#allocation101_spill] sm:$0xff]  ;;  %v6859_v30 = vld [vmem:[#allocation102_spill] sm:$0xff] }
 0x561   :  { %2450 = vmatprep.subr.bf16.mxu0 %v6849_v5  ;;  %2491 = vmatprep.subr.bf16.mxu1 %v6850_v16  ;;  %v6860_v5 = vld [vmem:[#allocation103_spill] sm:$0xff]  ;;  %v6861_v16 = vld [vmem:[#allocation104_spill] sm:$0xff] }
 0x564   :  { %2451 = vmatpush1.bf16.msra.mxu0 %v6851_v60  ;;  %2492 = vmatpush1.bf16.msra.mxu1 %v6852_v35  ;;  %v6862_v60 = vld [vmem:[#allocation105_spill] sm:$0xff]  ;;  %v6863_v35 = vld [vmem:[#allocation106_spill] sm:$0xff] }
 0x565   :  { %2452 = vmatprep.subr.bf16.mxu0 %v6853_v56  ;;  %2493 = vmatprep.subr.bf16.mxu1 %v6854_v53  ;;  %v6864_v56 = vld [vmem:[#allocation107_spill] sm:$0xff]  ;;  %v6865_v53 = vld [vmem:[#allocation108_spill] sm:$0xff] }
 0x568   :  { %2453 = vmatpush1.bf16.msra.mxu0 %v6855_v9  ;;  %2494 = vmatpush1.bf16.msra.mxu1 %v6856_v28  ;;  %v6866_v9 = vld [vmem:[#allocation109_spill] sm:$0xff]  ;;  %v6867_v28 = vld [vmem:[#allocation110_spill] sm:$0xff] }
 0x569   :  { %2454 = vmatprep.subr.bf16.mxu0 %v6857_v58  ;;  %2495 = vmatprep.subr.bf16.mxu1 %v6858_v21  ;;  %v6868_v58 = vld [vmem:[#allocation111_spill] sm:$0xff]  ;;  %v6869_v21 = vld [vmem:[#allocation112_spill] sm:$0xff] }
 0x56c   :  { %2455 = vmatpush1.bf16.msra.mxu0 %v6859_v30  ;;  %2496 = vmatpush1.bf16.msra.mxu1 %v6860_v5  ;;  %v6870_v30 = vld [vmem:[#allocation113_spill] sm:$0xff]  ;;  %v6871_v5 = vld [vmem:[#allocation114_spill] sm:$0xff] }
 0x56d   :  { %2456 = vmatprep.subr.bf16.mxu0 %v6861_v16  ;;  %2497 = vmatprep.subr.bf16.mxu1 %v6862_v60  ;;  %v6872_v16 = vld [vmem:[#allocation115_spill] sm:$0xff]  ;;  %v6873_v60 = vld [vmem:[#allocation116_spill] sm:$0xff] }
 0x570   :  { %2457 = vmatpush1.bf16.msra.mxu0 %v6863_v35  ;;  %2498 = vmatpush1.bf16.msra.mxu1 %v6864_v56  ;;  %v6874_v35 = vld [vmem:[#allocation118_spill] sm:$0xff]  ;;  %v6875_v56 = vld [vmem:[#allocation117_spill] sm:$0xff] }
 0x571   :  { %2458 = vmatprep.subr.bf16.mxu0 %v6865_v53  ;;  %2499 = vmatprep.subr.bf16.mxu1 %v6866_v9  ;;  %v6876_v53 = vld [vmem:[#allocation119_spill] sm:$0xff]  ;;  %v6877_v9 = vld [vmem:[#allocation120_spill] sm:$0xff] }
 0x574   :  { %2459 = vmatpush1.bf16.msra.mxu0 %v6867_v28  ;;  %2500 = vmatpush1.bf16.msra.mxu1 %v6868_v58  ;;  %v6878_v28 = vld [vmem:[#allocation121_spill] sm:$0xff]  ;;  %v6879_v58 = vld [vmem:[#allocation122_spill] sm:$0xff] }
 0x575   :  { %2460 = vmatprep.subr.bf16.mxu0 %v6869_v21  ;;  %2501 = vmatprep.subr.bf16.mxu1 %v6870_v30  ;;  %v6880_v21 = vld [vmem:[#allocation123_spill] sm:$0xff]  ;;  %v6881_v30 = vld [vmem:[#allocation124_spill] sm:$0xff] }
 0x578   :  { %2461 = vmatpush1.bf16.msra.mxu0 %v6871_v5  ;;  %2502 = vmatpush1.bf16.msra.mxu1 %v6872_v16  ;;  %v6882_v5 = vld [vmem:[#allocation125_spill] sm:$0xff]  ;;  %v6883_v16 = vld [vmem:[#allocation126_spill] sm:$0xff] }
 0x579   :  { %2462 = vmatprep.subr.bf16.mxu0 %v6873_v60  ;;  %2503 = vmatprep.subr.bf16.mxu1 %v6874_v35  ;;  %v6884_v60 = vld [vmem:[#allocation127_spill] sm:$0xff]  ;;  %v6885_v35 = vld [vmem:[#allocation128_spill] sm:$0xff] }
 0x57c   :  { %2463 = vmatpush1.bf16.msra.mxu0 %v6875_v56  ;;  %2504 = vmatpush1.bf16.msra.mxu1 %v6876_v53  ;;  %v6886_v56 = vld [vmem:[#allocation129_spill] sm:$0xff]  ;;  %v6887_v53 = vld [vmem:[#allocation130_spill] sm:$0xff] }
 0x57d   :  { %2464 = vmatprep.subr.bf16.mxu0 %v6877_v9  ;;  %2505 = vmatprep.subr.bf16.mxu1 %v6878_v28  ;;  %v6888_v9 = vld [vmem:[#allocation131_spill] sm:$0xff]  ;;  %v6889_v28 = vld [vmem:[#allocation61_spill] sm:$0xff] }
 0x580   :  { %2465 = vmatpush1.bf16.msra.mxu0 %v6879_v58  ;;  %2506 = vmatpush1.bf16.msra.mxu1 %v6880_v21  ;;  %v6890_v58 = vld [vmem:[#allocation63_spill] sm:$0xff] }
 0x581   :  { %2466 = vmatprep.subr.bf16.mxu0 %v6881_v30  ;;  %2507 = vmatprep.subr.bf16.mxu1 %v6882_v5 }
 0x584   :  { %2467 = vmatpush1.bf16.msra.mxu0 %v6883_v16  ;;  %2508 = vmatpush1.bf16.msra.mxu1 %v6884_v60 }
 0x585   :  { %2468 = vmatprep.subr.bf16.mxu0 %v6885_v35  ;;  %2509 = vmatprep.subr.bf16.mxu1 %v6886_v56 }
 0x588   :  { %2469 = vmatpush1.bf16.msra.mxu0 %v6887_v53  ;;  %2510 = vmatpush1.bf16.msra.mxu1 %v6888_v9  ;;  %v6893_v9 = vld [vmem:[#allocation69_spill] sm:$0xff] }
 0x589   :  { %2520 = vmatprep.subr.bf16.mxu0 %v6889_v28  ;;  %2561 = vmatprep.subr.bf16.mxu1 %v6890_v58 }
 0x5de   :  { %v2247_v21 = vpop.f32.mrb[28].mxu0  ;;  %v2288_v30 = vpop.f32.mrb[28].mxu1 }
 0x5df   :  { %v2406_v5 = vadd.f32 %v2247_v21, %v6891_v26  ;;  %v2249_v1 = vpop.f32.mrb[29].mxu0  ;;  %v2290_v16 = vpop.f32.mrb[29].mxu1  ;;  %v2408_v28 = vadd.f32 %v2288_v30, %v6893_v9 }
 0x5e0   :  { %v2407_v60 = vadd.f32 %v2249_v1, %v6892_v43  ;;  %v2251_v50 = vpop.f32.mrb[30].mxu0  ;;  %v2292_v35 = vpop.f32.mrb[30].mxu1  ;;  %v2409_v58 = vadd.f32 %v2290_v16, %v6894_v55 }
 0x5e1   :  { %v4089_v48 = vmul.f32 -1.442695, %v2406_v5  ;;  %v2252_v56 = vpop.f32.mrb[31].mxu0  ;;  %v2293_v47 = vpop.f32.mrb[31].mxu1  ;;  %v4091_v57 = vmul.f32 -1.442695, %v2408_v28 }
 0x5e2   :  { %v4090_v53 = vmul.f32 -1.442695, %v2407_v60  ;;  %v2430_v60 = vrot.slane %v5534_v51, 6 }
 0x5e3   :  { %4354 = vpow2.f32 %v4089_v48 }
 0x5e4   :  { %4356 = vpow2.f32 %v4090_v53 }
 0x5e5   :  { %4358 = vtanh.f32 %v2409_v58 }
 0x5e6   :  { %4360 = vpow2.f32 %v4091_v57 }
 0x5ed   :  { %v4355_v63 = vpop.eup %4354 }
 0x5ee   :  { %v2419_v22 = vadd.f32 1.0, %v4355_v63  ;;  %v4357_v21 = vpop.eup %4356 }
 0x5ef   :  { %v2420_v1 = vadd.f32 1.0, %v4357_v21  ;;  %v4359_v35 = vpop.eup %4358 }
 0x5f0   :  { %4362 = vrcp.f32 %v2419_v22  ;;  %v4361_v5 = vpop.eup %4360 }
 0x5f1   :  { %4364 = vrcp.f32 %v2420_v1  ;;  %v2421_v48 = vadd.f32 1.0, %v4361_v5 }
 0x5f3   :  { %4366 = vrcp.f32 %v2421_v48 }
 0x5fa   :  { %v4363_v56 = vpop.eup %4362 }
 0x5fb   :  { %v2433_v47 = vmul.f32 %v4363_v56, %v4359_v35  ;;  %v4365_v53 = vpop.eup %4364 }
 0x5fc   :  { %v2432_v50 = vmul.f32 %v4365_v53, %v2430_v60 }
 0x5fd   :  { %v4367_v16 = vpop.eup %4366 }
 0x5fe   :  { %v5684_v30 = vadd.f32 %v2433_v47, %v2432_v50 }
 0x600   :  { %6895 = vst [vmem:[#allocation79_spill] sm:$0xff] %v5684_v30  ;;  %4368 = vtanh.f32 %v5684_v30 }
 0x60a   :  { %v4369_v28 = vpop.eup %4368 }
 0x60b   :  { %v2436_v58 = vmul.f32 %v4369_v28, %v4367_v16 }
 0x61e   :  { %v2329_v63 = vpop.f32.mrb[32].mxu0  ;;  %v2370_v57 = vpop.f32.mrb[32].mxu1 }
 0x61f   :  { %v2377_v22 = vadd.f32 %v2329_v63, %v5161_v29  ;;  %v2331_v21 = vpop.f32.mrb[33].mxu0  ;;  %v2372_v1 = vpop.f32.mrb[33].mxu1  ;;  %v2379_v48 = vadd.f32 %v2370_v57, %v5167_v59 }
 0x620   :  { %v2378_v51 = vadd.f32 %v2331_v21, %v6707_v61  ;;  %v2333_v35 = vpop.f32.mrb[34].mxu0  ;;  %v2374_v56 = vpop.f32.mrb[34].mxu1  ;;  %v2380_v50 = vadd.f32 %v2372_v1, %v5175_v31 }
 0x621   :  { %v4086_v5 = vmul.f32 -1.442695, %v2377_v22  ;;  %v2334_v60 = vpop.f32.mrb[35].mxu0  ;;  %v2375_v47 = vpop.f32.mrb[35].mxu1  ;;  %v4088_v16 = vmul.f32 -1.442695, %v2379_v48 }
 0x622   :  { %v4087_v53 = vmul.f32 -1.442695, %v2378_v51 }
 0x623   :  { %4370 = vpow2.f32 %v4086_v5 }
 0x624   :  { %4372 = vpow2.f32 %v4087_v53 }
 0x625   :  { %4374 = vtanh.f32 %v2380_v50 }
 0x626   :  { %4376 = vpow2.f32 %v4088_v16  ;;  %v6898_v16 = vld [vmem:[#allocation99_spill] sm:$0xff] }
 0x62d   :  { %v4371_v28 = vpop.eup %4370 }
 0x62e   :  { %v2390_v30 = vadd.f32 1.0, %v4371_v28  ;;  %v4373_v63 = vpop.eup %4372  ;;  %v6899_v28 = vld [vmem:[#allocation57_spill] sm:$0xff] }
 0x62f   :  { %v2391_v21 = vadd.f32 1.0, %v4373_v63  ;;  %v4375_v35 = vpop.eup %4374  ;;  %v6900_v63 = vld [vmem:[#allocation138_spill] sm:$0xff] }
 0x630   :  { %4378 = vrcp.f32 %v2390_v30  ;;  %v4377_v22 = vpop.eup %4376  ;;  %v5695_v30 = vpack.c.bf16 %v2436_v58, %v2436_v58  ;;  %v6897_v58 = vld [vmem:[#allocation95_spill] sm:$0xff] }
 0x631   :  { %4380 = vrcp.f32 %v2391_v21  ;;  %v2392_v5 = vadd.f32 1.0, %v4377_v22  ;;  %v6901_v21 = vld [vmem:[#allocation139_spill] sm:$0xff]  ;;  %v6903_v22 = vld [vmem:[#allocation141_spill] sm:$0xff] }
 0x633   :  { %4382 = vrcp.f32 %v2392_v5  ;;  %v6907_v5 = vld [vmem:[#allocation145_spill] sm:$0xff] }
 0x63a   :  { %v4379_v56 = vpop.eup %4378 }
 0x63b   :  { %v2401_v60 = vmul.f32 %v4379_v56, %v4375_v35  ;;  %v4381_v51 = vpop.eup %4380  ;;  %v6902_v35 = vld [vmem:[#allocation140_spill] sm:$0xff]  ;;  %v6904_v56 = vld [vmem:[#allocation142_spill] sm:$0xff] }
 0x63c   :  { %v2400_v47 = vmul.f32 %v4381_v51, %v5542_v0  ;;  %v6896_v0 = vld [vmem:[#allocation94_spill] sm:$0xff]  ;;  %v6906_v51 = vld [vmem:[#allocation144_spill] sm:$0xff] }
 0x63d   :  { %v4383_v1 = vpop.eup %4382 }
 0x63e   :  { %v5692_v57 = vadd.f32 %v2401_v60, %v2400_v47  ;;  %v6905_v60 = vld [vmem:[#allocation143_spill] sm:$0xff]  ;;  %v6908_v47 = vld [vmem:[#allocation146_spill] sm:$0xff] }
 0x640   :  { %4384 = vtanh.f32 %v5692_v57 }
 0x64a   :  { %v4385_v53 = vpop.eup %4384 }
 0x64b   :  { %v2404_v48 = vmul.f32 %v4385_v53, %v4383_v1  ;;  %v6909_v1 = vld [vmem:[#allocation147_spill] sm:$0xff]  ;;  %v6910_v53 = vld [vmem:[#allocation148_spill] sm:$0xff] }
 0x64d   :  { %v2405_v50 = vpack.c.bf16 %v2404_v48, %v2404_v48  ;;  %v6911_v48 = vld [vmem:[#allocation149_spill] sm:$0xff] }
 0x64f   :  { %2470 = vmatprep.mubr.bf16.mxu0 %v2405_v50  ;;  %2511 = vmatprep.mubr.bf16.mxu1 %v2405_v50 }
 0x650   :  { %2471 = vmatmul.mubr.bf16.vlgmr.msra.gmra.mrb[36].mxu0 %v5695_v30  ;;  %2512 = vmatmul.mubr.bf16.vlgmr.msra.gmra.mrb[36].mxu1 %v5695_v30 }
 0x651   :  { %2521 = vmatpush1.bf16.msra.mxu0 %v4857_v11  ;;  %2562 = vmatpush1.bf16.msra.mxu1 %v6616_v52 }
 0x652   :  { %2552 = vmatprep.mubr.bf16.mxu0 %v2405_v50  ;;  %2593 = vmatprep.mubr.bf16.mxu1 %v2405_v50  ;;  %v6912_v50 = vld [vmem:[#allocation150_spill] sm:$0xff] }
 0x653   :  { %2522 = vmatprep.subr.bf16.mxu0 %v6617_v3  ;;  %2563 = vmatprep.subr.bf16.mxu1 %v6618_v54 }
 0x655   :  { %2523 = vmatpush1.bf16.msra.mxu0 %v6619_v27  ;;  %2564 = vmatpush1.bf16.msra.mxu1 %v6620_v20 }
 0x656   :  { %2524 = vmatprep.subr.bf16.mxu0 %v6621_v62  ;;  %2565 = vmatprep.subr.bf16.mxu1 %v6622_v17 }
 0x659   :  { %2525 = vmatpush1.bf16.msra.mxu0 %v6623_v7  ;;  %2566 = vmatpush1.bf16.msra.mxu1 %v6708_v4 }
 0x65a   :  { %2526 = vmatprep.subr.bf16.mxu0 %v6709_v46  ;;  %2567 = vmatprep.subr.bf16.mxu1 %v6710_v49 }
 0x65d   :  { %2527 = vmatpush1.bf16.msra.mxu0 %v6711_v18  ;;  %2568 = vmatpush1.bf16.msra.mxu1 %v6712_v39 }
 0x65e   :  { %2528 = vmatprep.subr.bf16.mxu0 %v6713_v45  ;;  %2569 = vmatprep.subr.bf16.mxu1 %v6800_v25 }
 0x661   :  { %2529 = vmatpush1.bf16.msra.mxu0 %v6801_v2  ;;  %2570 = vmatpush1.bf16.msra.mxu1 %v6802_v19 }
 0x662   :  { %2530 = vmatprep.subr.bf16.mxu0 %v6803_v40  ;;  %2571 = vmatprep.subr.bf16.mxu1 %v6804_v34 }
 0x665   :  { %2531 = vmatpush1.bf16.msra.mxu0 %v6805_v10  ;;  %2572 = vmatpush1.bf16.msra.mxu1 %v6806_v32 }
 0x666   :  { %2532 = vmatprep.subr.bf16.mxu0 %v6807_v8  ;;  %2573 = vmatprep.subr.bf16.mxu1 %v6808_v12 }
 0x669   :  { %2533 = vmatpush1.bf16.msra.mxu0 %v6896_v0  ;;  %2574 = vmatpush1.bf16.msra.mxu1 %v6897_v58 }
 0x66a   :  { %2534 = vmatprep.subr.bf16.mxu0 %v6811_v14  ;;  %2575 = vmatprep.subr.bf16.mxu1 %v6812_v41 }
 0x66d   :  { %2535 = vmatpush1.bf16.msra.mxu0 %v6813_v33  ;;  %2576 = vmatpush1.bf16.msra.mxu1 %v6898_v16 }
 0x66e   :  { %2536 = vmatprep.subr.bf16.mxu0 %v6899_v28  ;;  %2577 = vmatprep.subr.bf16.mxu1 %v6816_v24 }
 0x671   :  { %2537 = vmatpush1.bf16.msra.mxu0 %v6817_v23  ;;  %2578 = vmatpush1.bf16.msra.mxu1 %v6818_v15 }
 0x672   :  { %2538 = vmatprep.subr.bf16.mxu0 %v6819_v38  ;;  %2579 = vmatprep.subr.bf16.mxu1 %v6820_v6 }
 0x675   :  { %2539 = vmatpush1.bf16.msra.mxu0 %v6821_v42  ;;  %2580 = vmatpush1.bf16.msra.mxu1 %v6736_v44 }
 0x676   :  { %2540 = vmatprep.subr.bf16.mxu0 %v6737_v36  ;;  %2581 = vmatprep.subr.bf16.mxu1 %v6738_v37 }
 0x679   :  { %2541 = vmatpush1.bf16.msra.mxu0 %v6822_v13  ;;  %2582 = vmatpush1.bf16.msra.mxu1 %v6900_v63 }
 0x67a   :  { %2542 = vmatprep.subr.bf16.mxu0 %v6901_v21  ;;  %2583 = vmatprep.subr.bf16.mxu1 %v6902_v35  ;;  %v6913_v35 = vld [vmem:[#allocation151_spill] sm:$0xff] }
 0x67d   :  { %2543 = vmatpush1.bf16.msra.mxu0 %v6903_v22  ;;  %2584 = vmatpush1.bf16.msra.mxu1 %v6904_v56  ;;  %v6914_v22 = vld [vmem:[#allocation152_spill] sm:$0xff]  ;;  %v6915_v56 = vld [vmem:[#allocation153_spill] sm:$0xff] }
 0x67e   :  { %2544 = vmatprep.subr.bf16.mxu0 %v6905_v60  ;;  %2585 = vmatprep.subr.bf16.mxu1 %v6906_v51  ;;  %v6916_v60 = vld [vmem:[#allocation154_spill] sm:$0xff]  ;;  %v6917_v51 = vld [vmem:[#allocation155_spill] sm:$0xff] }
 0x681   :  { %2545 = vmatpush1.bf16.msra.mxu0 %v6907_v5  ;;  %2586 = vmatpush1.bf16.msra.mxu1 %v6908_v47  ;;  %v6918_v5 = vld [vmem:[#allocation156_spill] sm:$0xff]  ;;  %v6919_v47 = vld [vmem:[#allocation157_spill] sm:$0xff] }
 0x682   :  { %2546 = vmatprep.subr.bf16.mxu0 %v6909_v1  ;;  %2587 = vmatprep.subr.bf16.mxu1 %v6910_v53  ;;  %v6920_v1 = vld [vmem:[#allocation158_spill] sm:$0xff]  ;;  %v6921_v53 = vld [vmem:[#allocation27_spill] sm:$0xff] }
 0x685   :  { %2547 = vmatpush1.bf16.msra.mxu0 %v6911_v48  ;;  %2588 = vmatpush1.bf16.msra.mxu1 %v6912_v50  ;;  %v6922_v48 = vld [vmem:[#allocation30_spill] sm:$0xff] }
 0x686   :  { %2548 = vmatprep.subr.bf16.mxu0 %v6913_v35  ;;  %2589 = vmatprep.subr.bf16.mxu1 %v6914_v22  ;;  %v6923_v22 = vld [vmem:[#allocation28_spill] sm:$0xff]  ;;  %v6932_v35 = vld [vmem:[#allocation39_spill] sm:$0xff] }
 0x689   :  { %2549 = vmatpush1.bf16.msra.mxu0 %v6915_v56  ;;  %2590 = vmatpush1.bf16.msra.mxu1 %v6916_v60  ;;  %v6924_v56 = vld [vmem:[#allocation29_spill] sm:$0xff]  ;;  %v6925_v60 = vld [vmem:[#allocation31_spill] sm:$0xff] }
 0x68a   :  { %2550 = vmatprep.subr.bf16.mxu0 %v6917_v51  ;;  %2591 = vmatprep.subr.bf16.mxu1 %v6918_v5  ;;  %v6926_v51 = vld [vmem:[#allocation35_spill] sm:$0xff]  ;;  %v6927_v5 = vld [vmem:[#allocation33_spill] sm:$0xff] }
 0x68d   :  { %2551 = vmatpush1.bf16.msra.mxu0 %v6919_v47  ;;  %2592 = vmatpush1.bf16.msra.mxu1 %v6920_v1  ;;  %v6928_v47 = vld [vmem:[#allocation34_spill] sm:$0xff]  ;;  %v6929_v1 = vld [vmem:[#allocation37_spill] sm:$0xff] }
 0x68e   :  { %2682 = vmatprep.subr.bf16.mxu0 %v6921_v53  ;;  %2723 = vmatprep.subr.bf16.mxu1 %v6922_v48  ;;  %v6930_v53 = vld [vmem:[#allocation40_spill] sm:$0xff]  ;;  %v6931_v48 = vld [vmem:[#allocation38_spill] sm:$0xff] }
 0x690   :  { %2553 = vmatmul.mubr.bf16.vlgmr.msra.gmra.mrb[40].mxu0 %v5695_v30  ;;  %2594 = vmatmul.mubr.bf16.vlgmr.msra.gmra.mrb[40].mxu1 %v5695_v30  ;;  %v6933_v30 = vld [vmem:[#allocation41_spill] sm:$0xff] }
 0x691   :  { %2683 = vmatpush1.bf16.msra.mxu0 %v6923_v22  ;;  %2724 = vmatpush1.bf16.msra.mxu1 %v6924_v56  ;;  %v6934_v22 = vld [vmem:[#allocation44_spill] sm:$0xff]  ;;  %v6935_v56 = vld [vmem:[#allocation42_spill] sm:$0xff] }
 0x692   :  { %2684 = vmatprep.subr.bf16.mxu0 %v6925_v60  ;;  %2725 = vmatprep.subr.bf16.mxu1 %v6926_v51  ;;  %v6936_v60 = vld [vmem:[#allocation43_spill] sm:$0xff]  ;;  %v6937_v51 = vld [vmem:[#allocation45_spill] sm:$0xff] }
 0x695   :  { %2685 = vmatpush1.bf16.msra.mxu0 %v6927_v5  ;;  %2726 = vmatpush1.bf16.msra.mxu1 %v6928_v47  ;;  %v6938_v5 = vld [vmem:[#allocation48_spill] sm:$0xff]  ;;  %v6939_v47 = vld [vmem:[#allocation46_spill] sm:$0xff] }
 0x696   :  { %2686 = vmatprep.subr.bf16.mxu0 %v6929_v1  ;;  %2727 = vmatprep.subr.bf16.mxu1 %v6930_v53  ;;  %v6940_v1 = vld [vmem:[#allocation47_spill] sm:$0xff]  ;;  %v6941_v53 = vld [vmem:[#allocation50_spill] sm:$0xff] }
 0x699   :  { %2687 = vmatpush1.bf16.msra.mxu0 %v6931_v48  ;;  %2728 = vmatpush1.bf16.msra.mxu1 %v6932_v35  ;;  %v6942_v48 = vld [vmem:[#allocation51_spill] sm:$0xff]  ;;  %v6943_v35 = vld [vmem:[#allocation49_spill] sm:$0xff] }
 0x69a   :  { %2688 = vmatprep.subr.bf16.mxu0 %v6933_v30  ;;  %2729 = vmatprep.subr.bf16.mxu1 %v6934_v22  ;;  %v6944_v30 = vld [vmem:[#allocation53_spill] sm:$0xff]  ;;  %v6945_v22 = vld [vmem:[#allocation52_spill] sm:$0xff] }
 0x69d   :  { %2689 = vmatpush1.bf16.msra.mxu0 %v6935_v56  ;;  %2730 = vmatpush1.bf16.msra.mxu1 %v6936_v60  ;;  %v6946_v56 = vld [vmem:[#allocation54_spill] sm:$0xff]  ;;  %v6947_v60 = vld [vmem:[#allocation55_spill] sm:$0xff] }
 0x69e   :  { %2690 = vmatprep.subr.bf16.mxu0 %v6937_v51  ;;  %2731 = vmatprep.subr.bf16.mxu1 %v6938_v5  ;;  %v6948_v51 = vld [vmem:[#allocation58_spill] sm:$0xff]  ;;  %v6949_v5 = vld [vmem:[#allocation56_spill] sm:$0xff] }
 0x6a1   :  { %2691 = vmatpush1.bf16.msra.mxu0 %v6939_v47  ;;  %2732 = vmatpush1.bf16.msra.mxu1 %v6940_v1  ;;  %v6950_v47 = vld [vmem:[#allocation59_spill] sm:$0xff]  ;;  %v6951_v1 = vld [vmem:[#allocation60_spill] sm:$0xff] }
 0x6a2   :  { %2692 = vmatprep.subr.bf16.mxu0 %v6941_v53  ;;  %2733 = vmatprep.subr.bf16.mxu1 %v6942_v48  ;;  %v6952_v53 = vld [vmem:[#allocation62_spill] sm:$0xff]  ;;  %v6953_v48 = vld [vmem:[#allocation100_spill] sm:$0xff] }
 0x6a5   :  { %2693 = vmatpush1.bf16.msra.mxu0 %v6943_v35  ;;  %2734 = vmatpush1.bf16.msra.mxu1 %v6944_v30  ;;  %v6954_v35 = vld [vmem:[#allocation101_spill] sm:$0xff]  ;;  %v6955_v30 = vld [vmem:[#allocation102_spill] sm:$0xff] }
 0x6a6   :  { %2694 = vmatprep.subr.bf16.mxu0 %v6945_v22  ;;  %2735 = vmatprep.subr.bf16.mxu1 %v6946_v56  ;;  %v6956_v22 = vld [vmem:[#allocation103_spill] sm:$0xff]  ;;  %v6957_v56 = vld [vmem:[#allocation104_spill] sm:$0xff] }
 0x6a9   :  { %2695 = vmatpush1.bf16.msra.mxu0 %v6947_v60  ;;  %2736 = vmatpush1.bf16.msra.mxu1 %v6948_v51  ;;  %v6958_v60 = vld [vmem:[#allocation105_spill] sm:$0xff]  ;;  %v6959_v51 = vld [vmem:[#allocation106_spill] sm:$0xff] }
 0x6aa   :  { %2696 = vmatprep.subr.bf16.mxu0 %v6949_v5  ;;  %2737 = vmatprep.subr.bf16.mxu1 %v6950_v47  ;;  %v6960_v5 = vld [vmem:[#allocation107_spill] sm:$0xff]  ;;  %v6961_v47 = vld [vmem:[#allocation108_spill] sm:$0xff] }
 0x6ad   :  { %2697 = vmatpush1.bf16.msra.mxu0 %v6951_v1  ;;  %2738 = vmatpush1.bf16.msra.mxu1 %v6952_v53  ;;  %v6962_v1 = vld [vmem:[#allocation109_spill] sm:$0xff]  ;;  %v6963_v53 = vld [vmem:[#allocation110_spill] sm:$0xff] }
 0x6ae   :  { %2698 = vmatprep.subr.bf16.mxu0 %v6953_v48  ;;  %2739 = vmatprep.subr.bf16.mxu1 %v6954_v35  ;;  %v6964_v48 = vld [vmem:[#allocation111_spill] sm:$0xff]  ;;  %v6965_v35 = vld [vmem:[#allocation112_spill] sm:$0xff] }
 0x6b1   :  { %2699 = vmatpush1.bf16.msra.mxu0 %v6955_v30  ;;  %2740 = vmatpush1.bf16.msra.mxu1 %v6956_v22  ;;  %v6966_v30 = vld [vmem:[#allocation113_spill] sm:$0xff]  ;;  %v6967_v22 = vld [vmem:[#allocation114_spill] sm:$0xff] }
 0x6b2   :  { %2700 = vmatprep.subr.bf16.mxu0 %v6957_v56  ;;  %2741 = vmatprep.subr.bf16.mxu1 %v6958_v60  ;;  %v6968_v56 = vld [vmem:[#allocation115_spill] sm:$0xff]  ;;  %v6969_v60 = vld [vmem:[#allocation116_spill] sm:$0xff] }
 0x6b5   :  { %2701 = vmatpush1.bf16.msra.mxu0 %v6959_v51  ;;  %2742 = vmatpush1.bf16.msra.mxu1 %v6960_v5  ;;  %v6970_v51 = vld [vmem:[#allocation118_spill] sm:$0xff]  ;;  %v6971_v5 = vld [vmem:[#allocation117_spill] sm:$0xff] }
 0x6b6   :  { %2702 = vmatprep.subr.bf16.mxu0 %v6961_v47  ;;  %2743 = vmatprep.subr.bf16.mxu1 %v6962_v1  ;;  %v6972_v47 = vld [vmem:[#allocation119_spill] sm:$0xff]  ;;  %v6973_v1 = vld [vmem:[#allocation120_spill] sm:$0xff] }
 0x6b9   :  { %2703 = vmatpush1.bf16.msra.mxu0 %v6963_v53  ;;  %2744 = vmatpush1.bf16.msra.mxu1 %v6964_v48  ;;  %v6974_v53 = vld [vmem:[#allocation121_spill] sm:$0xff]  ;;  %v6975_v48 = vld [vmem:[#allocation122_spill] sm:$0xff] }
 0x6ba   :  { %2704 = vmatprep.subr.bf16.mxu0 %v6965_v35  ;;  %2745 = vmatprep.subr.bf16.mxu1 %v6966_v30  ;;  %v6976_v35 = vld [vmem:[#allocation123_spill] sm:$0xff]  ;;  %v6977_v30 = vld [vmem:[#allocation124_spill] sm:$0xff] }
 0x6bd   :  { %2705 = vmatpush1.bf16.msra.mxu0 %v6967_v22  ;;  %2746 = vmatpush1.bf16.msra.mxu1 %v6968_v56  ;;  %v6978_v22 = vld [vmem:[#allocation125_spill] sm:$0xff]  ;;  %v6979_v56 = vld [vmem:[#allocation126_spill] sm:$0xff] }
 0x6be   :  { %2706 = vmatprep.subr.bf16.mxu0 %v6969_v60  ;;  %2747 = vmatprep.subr.bf16.mxu1 %v6970_v51  ;;  %v6980_v60 = vld [vmem:[#allocation127_spill] sm:$0xff]  ;;  %v6981_v51 = vld [vmem:[#allocation128_spill] sm:$0xff] }
 0x6c1   :  { %2707 = vmatpush1.bf16.msra.mxu0 %v6971_v5  ;;  %2748 = vmatpush1.bf16.msra.mxu1 %v6972_v47  ;;  %v6982_v5 = vld [vmem:[#allocation129_spill] sm:$0xff]  ;;  %v6983_v47 = vld [vmem:[#allocation130_spill] sm:$0xff] }
 0x6c2   :  { %2708 = vmatprep.subr.bf16.mxu0 %v6973_v1  ;;  %2749 = vmatprep.subr.bf16.mxu1 %v6974_v53  ;;  %v6984_v1 = vld [vmem:[#allocation131_spill] sm:$0xff]  ;;  %v6985_v53 = vld [vmem:[#allocation61_spill] sm:$0xff] }
 0x6c5   :  { %2709 = vmatpush1.bf16.msra.mxu0 %v6975_v48  ;;  %2750 = vmatpush1.bf16.msra.mxu1 %v6976_v35  ;;  %v6986_v48 = vld [vmem:[#allocation63_spill] sm:$0xff] }
 0x6c6   :  { %2710 = vmatprep.subr.bf16.mxu0 %v6977_v30  ;;  %2751 = vmatprep.subr.bf16.mxu1 %v6978_v22 }
 0x6c9   :  { %2711 = vmatpush1.bf16.msra.mxu0 %v6979_v56  ;;  %2752 = vmatpush1.bf16.msra.mxu1 %v6980_v60 }
 0x6ca   :  { %2712 = vmatprep.subr.bf16.mxu0 %v6981_v51  ;;  %2753 = vmatprep.subr.bf16.mxu1 %v6982_v5 }
 0x6cd   :  { %2713 = vmatpush1.bf16.msra.mxu0 %v6983_v47  ;;  %2754 = vmatpush1.bf16.msra.mxu1 %v6984_v1 }
 0x6ce   :  { %2764 = vmatprep.subr.bf16.mxu0 %v6985_v53  ;;  %2805 = vmatprep.subr.bf16.mxu1 %v6986_v48 }
 0x723   :  { %v2472_v35 = vpop.f32.mrb[36].mxu0  ;;  %v2513_v30 = vpop.f32.mrb[36].mxu1 }
 0x724   :  { %v2635_v50 = vrot.slane %v2472_v35, 6  ;;  %v2474_v22 = vpop.f32.mrb[37].mxu0  ;;  %v2515_v21 = vpop.f32.mrb[37].mxu1  ;;  %v2637_v53 = vrot.slane %v2513_v30, 6 }
 0x725   :  { %v2636_v56 = vrot.slane %v2474_v22, 6  ;;  %v2476_v63 = vpop.f32.mrb[38].mxu0  ;;  %v2517_v60 = vpop.f32.mrb[38].mxu1  ;;  %v2638_v48 = vrot.slane %v2515_v21, 6 }
 0x726   :  { %v2643_v51 = vadd.f32 %v2635_v50, %v6891_v26  ;;  %v2477_v13 = vpop.f32.mrb[39].mxu0  ;;  %v2518_v5 = vpop.f32.mrb[39].mxu1  ;;  %v2645_v36 = vadd.f32 %v2637_v53, %v6893_v9 }
 0x727   :  { %v2644_v47 = vadd.f32 %v2636_v56, %v6892_v43  ;;  %v2646_v35 = vadd.f32 %v2638_v48, %v6894_v55 }
 0x728   :  { %v4095_v37 = vmul.f32 -1.442695, %v2643_v51  ;;  %v4097_v44 = vmul.f32 -1.442695, %v2645_v36 }
 0x729   :  { %v4096_v1 = vmul.f32 -1.442695, %v2644_v47 }
 0x72a   :  { %4386 = vpow2.f32 %v4095_v37  ;;  %v6987_v37 = vld [vmem:[#allocation79_spill] sm:$0xff] }
 0x72b   :  { %4388 = vpow2.f32 %v4096_v1  ;;  %v2667_v47 = vrot.slane %v6987_v37, 6 }
 0x72c   :  { %4390 = vtanh.f32 %v2646_v35 }
 0x72d   :  { %4392 = vpow2.f32 %v4097_v44 }
 0x734   :  { %v4387_v22 = vpop.eup %4386 }
 0x735   :  { %v2656_v63 = vadd.f32 1.0, %v4387_v22  ;;  %v4389_v60 = vpop.eup %4388 }
 0x736   :  { %v2657_v13 = vadd.f32 1.0, %v4389_v60  ;;  %v4391_v56 = vpop.eup %4390 }
 0x737   :  { %4394 = vrcp.f32 %v2656_v63  ;;  %v4393_v51 = vpop.eup %4392 }
 0x738   :  { %4396 = vrcp.f32 %v2657_v13  ;;  %v2658_v50 = vadd.f32 1.0, %v4393_v51 }
 0x73a   :  { %4398 = vrcp.f32 %v2658_v50 }
 0x741   :  { %v4395_v5 = vpop.eup %4394 }
 0x742   :  { %v2670_v1 = vmul.f32 %v4395_v5, %v4391_v56  ;;  %v4397_v21 = vpop.eup %4396 }
 0x743   :  { %v2669_v53 = vmul.f32 %v4397_v21, %v2667_v47 }
 0x744   :  { %v4399_v36 = vpop.eup %4398 }
 0x745   :  { %v5834_v30 = vadd.f32 %v2670_v1, %v2669_v53 }
 0x747   :  { %6988 = vst [vmem:[#allocation80_spill] sm:$0xff] %v5834_v30  ;;  %4400 = vtanh.f32 %v5834_v30 }
 0x751   :  { %v4401_v48 = vpop.eup %4400 }
 0x752   :  { %v2673_v44 = vmul.f32 %v4401_v48, %v4399_v36 }
 0x763   :  { %v2554_v35 = vpop.f32.mrb[40].mxu0  ;;  %v2595_v22 = vpop.f32.mrb[40].mxu1 }
 0x764   :  { %v2602_v63 = vadd.f32 %v2554_v35, %v5161_v29  ;;  %v2556_v60 = vpop.f32.mrb[41].mxu0  ;;  %v2597_v13 = vpop.f32.mrb[41].mxu1  ;;  %v2604_v50 = vadd.f32 %v2595_v22, %v5167_v59 }
 0x765   :  { %v2603_v37 = vadd.f32 %v2556_v60, %v6707_v61  ;;  %v2558_v56 = vpop.f32.mrb[42].mxu0  ;;  %v2599_v5 = vpop.f32.mrb[42].mxu1  ;;  %v2605_v53 = vadd.f32 %v2597_v13, %v5175_v31 }
 0x766   :  { %v4092_v51 = vmul.f32 -1.442695, %v2602_v63  ;;  %v2559_v47 = vpop.f32.mrb[43].mxu0  ;;  %v2600_v1 = vpop.f32.mrb[43].mxu1  ;;  %v4094_v36 = vmul.f32 -1.442695, %v2604_v50 }
 0x767   :  { %v4093_v21 = vmul.f32 -1.442695, %v2603_v37 }
 0x768   :  { %4402 = vpow2.f32 %v4092_v51 }
 0x769   :  { %4404 = vpow2.f32 %v4093_v21 }
 0x76a   :  { %4406 = vtanh.f32 %v2605_v53 }
 0x76b   :  { %4408 = vpow2.f32 %v4094_v36 }
 0x772   :  { %v4403_v48 = vpop.eup %4402 }
 0x773   :  { %v2615_v30 = vadd.f32 1.0, %v4403_v48  ;;  %v4405_v35 = vpop.eup %4404 }
 0x774   :  { %v2616_v60 = vadd.f32 1.0, %v4405_v35  ;;  %v4407_v56 = vpop.eup %4406 }
 0x775   :  { %4410 = vrcp.f32 %v2615_v30  ;;  %v4409_v63 = vpop.eup %4408  ;;  %v2674_v30 = vpack.c.bf16 %v2673_v44, %v2673_v44  ;;  %v6990_v44 = vld [vmem:[#allocation135_spill] sm:$0xff] }
 0x776   :  { %4412 = vrcp.f32 %v2616_v60  ;;  %v2617_v51 = vadd.f32 1.0, %v4409_v63  ;;  %v6991_v60 = vld [vmem:[#allocation136_spill] sm:$0xff]  ;;  %v6993_v63 = vld [vmem:[#allocation138_spill] sm:$0xff] }
 0x777   :  { %v5845_v35 = vrot.slane %v2674_v30, 1  ;;  %v7003_v30 = vld [vmem:[#allocation148_spill] sm:$0xff] }
 0x778   :  { %4414 = vrcp.f32 %v2617_v51  ;;  %v6997_v51 = vld [vmem:[#allocation142_spill] sm:$0xff] }
 0x77f   :  { %v4411_v5 = vpop.eup %4410 }
 0x780   :  { %v2626_v47 = vmul.f32 %v4411_v5, %v4407_v56  ;;  %v4413_v37 = vpop.eup %4412  ;;  %v6992_v56 = vld [vmem:[#allocation137_spill] sm:$0xff]  ;;  %v6994_v5 = vld [vmem:[#allocation139_spill] sm:$0xff] }
 0x781   :  { %v2625_v1 = vmul.f32 %v4413_v37, %v5692_v57  ;;  %v6989_v57 = vld [vmem:[#allocation78_spill] sm:$0xff]  ;;  %v6996_v37 = vld [vmem:[#allocation141_spill] sm:$0xff] }
 0x782   :  { %v4415_v13 = vpop.eup %4414 }
 0x783   :  { %v5842_v22 = vadd.f32 %v2626_v47, %v2625_v1  ;;  %v6995_v47 = vld [vmem:[#allocation140_spill] sm:$0xff]  ;;  %v6998_v1 = vld [vmem:[#allocation143_spill] sm:$0xff] }
 0x785   :  { %4416 = vtanh.f32 %v5842_v22 }
 0x78f   :  { %v4417_v21 = vpop.eup %4416 }
 0x790   :  { %v2629_v50 = vmul.f32 %v4417_v21, %v4415_v13  ;;  %v6999_v13 = vld [vmem:[#allocation144_spill] sm:$0xff]  ;;  %v7000_v21 = vld [vmem:[#allocation145_spill] sm:$0xff] }
 0x792   :  { %v2630_v53 = vpack.c.bf16 %v2629_v50, %v2629_v50  ;;  %v7001_v50 = vld [vmem:[#allocation146_spill] sm:$0xff] }
 0x794   :  { %v2676_v36 = vrot.slane %v2630_v53, 7  ;;  %v7002_v53 = vld [vmem:[#allocation147_spill] sm:$0xff] }
 0x796   :  { %v2679_v48 = vrot.slane %v2676_v36, 1  ;;  %v7004_v36 = vld [vmem:[#allocation149_spill] sm:$0xff] }
 0x798   :  { %2714 = vmatprep.mubr.bf16.mxu0 %v2679_v48  ;;  %2755 = vmatprep.mubr.bf16.mxu1 %v2679_v48 }
 0x799   :  { %2715 = vmatmul.mubr.bf16.vlgmr.msra.gmra.mrb[44].mxu0 %v5845_v35  ;;  %2756 = vmatmul.mubr.bf16.vlgmr.msra.gmra.mrb[44].mxu1 %v5845_v35 }
 0x79a   :  { %2765 = vmatpush1.bf16.msra.mxu0 %v4857_v11  ;;  %2806 = vmatpush1.bf16.msra.mxu1 %v6616_v52 }
 0x79b   :  { %2796 = vmatprep.mubr.bf16.mxu0 %v2679_v48  ;;  %2837 = vmatprep.mubr.bf16.mxu1 %v2679_v48  ;;  %v7005_v48 = vld [vmem:[#allocation150_spill] sm:$0xff] }
 0x79c   :  { %2766 = vmatprep.subr.bf16.mxu0 %v6617_v3  ;;  %2807 = vmatprep.subr.bf16.mxu1 %v6618_v54 }
 0x79e   :  { %2767 = vmatpush1.bf16.msra.mxu0 %v6619_v27  ;;  %2808 = vmatpush1.bf16.msra.mxu1 %v6620_v20 }
 0x79f   :  { %2768 = vmatprep.subr.bf16.mxu0 %v6621_v62  ;;  %2809 = vmatprep.subr.bf16.mxu1 %v6622_v17 }
 0x7a2   :  { %2769 = vmatpush1.bf16.msra.mxu0 %v6623_v7  ;;  %2810 = vmatpush1.bf16.msra.mxu1 %v6708_v4 }
 0x7a3   :  { %2770 = vmatprep.subr.bf16.mxu0 %v6709_v46  ;;  %2811 = vmatprep.subr.bf16.mxu1 %v6710_v49 }
 0x7a6   :  { %2771 = vmatpush1.bf16.msra.mxu0 %v6711_v18  ;;  %2812 = vmatpush1.bf16.msra.mxu1 %v6712_v39 }
 0x7a7   :  { %2772 = vmatprep.subr.bf16.mxu0 %v6713_v45  ;;  %2813 = vmatprep.subr.bf16.mxu1 %v6800_v25 }
 0x7aa   :  { %2773 = vmatpush1.bf16.msra.mxu0 %v6801_v2  ;;  %2814 = vmatpush1.bf16.msra.mxu1 %v6802_v19 }
 0x7ab   :  { %2774 = vmatprep.subr.bf16.mxu0 %v6803_v40  ;;  %2815 = vmatprep.subr.bf16.mxu1 %v6804_v34 }
 0x7ae   :  { %2775 = vmatpush1.bf16.msra.mxu0 %v6805_v10  ;;  %2816 = vmatpush1.bf16.msra.mxu1 %v6806_v32 }
 0x7af   :  { %2776 = vmatprep.subr.bf16.mxu0 %v6807_v8  ;;  %2817 = vmatprep.subr.bf16.mxu1 %v6808_v12 }
 0x7b2   :  { %2777 = vmatpush1.bf16.msra.mxu0 %v6896_v0  ;;  %2818 = vmatpush1.bf16.msra.mxu1 %v6897_v58 }
 0x7b3   :  { %2778 = vmatprep.subr.bf16.mxu0 %v6811_v14  ;;  %2819 = vmatprep.subr.bf16.mxu1 %v6812_v41 }
 0x7b6   :  { %2779 = vmatpush1.bf16.msra.mxu0 %v6813_v33  ;;  %2820 = vmatpush1.bf16.msra.mxu1 %v6898_v16 }
 0x7b7   :  { %2780 = vmatprep.subr.bf16.mxu0 %v6899_v28  ;;  %2821 = vmatprep.subr.bf16.mxu1 %v6816_v24 }
 0x7ba   :  { %2781 = vmatpush1.bf16.msra.mxu0 %v6817_v23  ;;  %2822 = vmatpush1.bf16.msra.mxu1 %v6818_v15 }
 0x7bb   :  { %2782 = vmatprep.subr.bf16.mxu0 %v6819_v38  ;;  %2823 = vmatprep.subr.bf16.mxu1 %v6820_v6 }
 0x7be   :  { %2783 = vmatpush1.bf16.msra.mxu0 %v6821_v42  ;;  %2824 = vmatpush1.bf16.msra.mxu1 %v6989_v57 }
 0x7bf   :  { %2784 = vmatprep.subr.bf16.mxu0 %v6990_v44  ;;  %2825 = vmatprep.subr.bf16.mxu1 %v6991_v60 }
 0x7c2   :  { %2785 = vmatpush1.bf16.msra.mxu0 %v6992_v56  ;;  %2826 = vmatpush1.bf16.msra.mxu1 %v6993_v63 }
 0x7c3   :  { %2786 = vmatprep.subr.bf16.mxu0 %v6994_v5  ;;  %2827 = vmatprep.subr.bf16.mxu1 %v6995_v47  ;;  %v7006_v47 = vld [vmem:[#allocation151_spill] sm:$0xff] }
 0x7c6   :  { %2787 = vmatpush1.bf16.msra.mxu0 %v6996_v37  ;;  %2828 = vmatpush1.bf16.msra.mxu1 %v6997_v51  ;;  %v7007_v37 = vld [vmem:[#allocation152_spill] sm:$0xff]  ;;  %v7008_v51 = vld [vmem:[#allocation153_spill] sm:$0xff] }
 0x7c7   :  { %2788 = vmatprep.subr.bf16.mxu0 %v6998_v1  ;;  %2829 = vmatprep.subr.bf16.mxu1 %v6999_v13  ;;  %v7009_v1 = vld [vmem:[#allocation154_spill] sm:$0xff]  ;;  %v7010_v13 = vld [vmem:[#allocation155_spill] sm:$0xff] }
 0x7ca   :  { %2789 = vmatpush1.bf16.msra.mxu0 %v7000_v21  ;;  %2830 = vmatpush1.bf16.msra.mxu1 %v7001_v50  ;;  %v7011_v21 = vld [vmem:[#allocation156_spill] sm:$0xff]  ;;  %v7012_v50 = vld [vmem:[#allocation157_spill] sm:$0xff] }
 0x7cb   :  { %2790 = vmatprep.subr.bf16.mxu0 %v7002_v53  ;;  %2831 = vmatprep.subr.bf16.mxu1 %v7003_v30  ;;  %v7013_v53 = vld [vmem:[#allocation158_spill] sm:$0xff]  ;;  %v7014_v30 = vld [vmem:[#allocation27_spill] sm:$0xff] }
 0x7ce   :  { %2791 = vmatpush1.bf16.msra.mxu0 %v7004_v36  ;;  %2832 = vmatpush1.bf16.msra.mxu1 %v7005_v48  ;;  %v7015_v36 = vld [vmem:[#allocation30_spill] sm:$0xff] }
 0x7cf   :  { %2792 = vmatprep.subr.bf16.mxu0 %v7006_v47  ;;  %2833 = vmatprep.subr.bf16.mxu1 %v7007_v37  ;;  %v7016_v37 = vld [vmem:[#allocation28_spill] sm:$0xff]  ;;  %v7025_v47 = vld [vmem:[#allocation39_spill] sm:$0xff] }
 0x7d2   :  { %2793 = vmatpush1.bf16.msra.mxu0 %v7008_v51  ;;  %2834 = vmatpush1.bf16.msra.mxu1 %v7009_v1  ;;  %v7017_v51 = vld [vmem:[#allocation29_spill] sm:$0xff]  ;;  %v7018_v1 = vld [vmem:[#allocation31_spill] sm:$0xff] }
 0x7d3   :  { %2794 = vmatprep.subr.bf16.mxu0 %v7010_v13  ;;  %2835 = vmatprep.subr.bf16.mxu1 %v7011_v21  ;;  %v7019_v13 = vld [vmem:[#allocation35_spill] sm:$0xff]  ;;  %v7020_v21 = vld [vmem:[#allocation33_spill] sm:$0xff] }
 0x7d6   :  { %2795 = vmatpush1.bf16.msra.mxu0 %v7012_v50  ;;  %2836 = vmatpush1.bf16.msra.mxu1 %v7013_v53  ;;  %v7021_v50 = vld [vmem:[#allocation34_spill] sm:$0xff]  ;;  %v7022_v53 = vld [vmem:[#allocation37_spill] sm:$0xff] }
 0x7d7   :  { %2926 = vmatprep.subr.bf16.mxu0 %v7014_v30  ;;  %2967 = vmatprep.subr.bf16.mxu1 %v7015_v36  ;;  %v7023_v30 = vld [vmem:[#allocation40_spill] sm:$0xff]  ;;  %v7024_v36 = vld [vmem:[#allocation38_spill] sm:$0xff] }
 0x7d9   :  { %2797 = vmatmul.mubr.bf16.vlgmr.msra.gmra.mrb[48].mxu0 %v5845_v35  ;;  %2838 = vmatmul.mubr.bf16.vlgmr.msra.gmra.mrb[48].mxu1 %v5845_v35  ;;  %v7026_v35 = vld [vmem:[#allocation41_spill] sm:$0xff] }
 0x7da   :  { %2927 = vmatpush1.bf16.msra.mxu0 %v7016_v37  ;;  %2968 = vmatpush1.bf16.msra.mxu1 %v7017_v51  ;;  %v7027_v37 = vld [vmem:[#allocation44_spill] sm:$0xff]  ;;  %v7028_v51 = vld [vmem:[#allocation42_spill] sm:$0xff] }
 0x7db   :  { %2928 = vmatprep.subr.bf16.mxu0 %v7018_v1  ;;  %2969 = vmatprep.subr.bf16.mxu1 %v7019_v13  ;;  %v7029_v1 = vld [vmem:[#allocation43_spill] sm:$0xff]  ;;  %v7030_v13 = vld [vmem:[#allocation45_spill] sm:$0xff] }
 0x7de   :  { %2929 = vmatpush1.bf16.msra.mxu0 %v7020_v21  ;;  %2970 = vmatpush1.bf16.msra.mxu1 %v7021_v50  ;;  %v7031_v21 = vld [vmem:[#allocation48_spill] sm:$0xff]  ;;  %v7032_v50 = vld [vmem:[#allocation46_spill] sm:$0xff] }
 0x7df   :  { %2930 = vmatprep.subr.bf16.mxu0 %v7022_v53  ;;  %2971 = vmatprep.subr.bf16.mxu1 %v7023_v30  ;;  %v7033_v53 = vld [vmem:[#allocation47_spill] sm:$0xff]  ;;  %v7034_v30 = vld [vmem:[#allocation50_spill] sm:$0xff] }
 0x7e2   :  { %2931 = vmatpush1.bf16.msra.mxu0 %v7024_v36  ;;  %2972 = vmatpush1.bf16.msra.mxu1 %v7025_v47  ;;  %v7035_v36 = vld [vmem:[#allocation51_spill] sm:$0xff]  ;;  %v7036_v47 = vld [vmem:[#allocation49_spill] sm:$0xff] }
 0x7e3   :  { %2932 = vmatprep.subr.bf16.mxu0 %v7026_v35  ;;  %2973 = vmatprep.subr.bf16.mxu1 %v7027_v37  ;;  %v7037_v35 = vld [vmem:[#allocation53_spill] sm:$0xff]  ;;  %v7038_v37 = vld [vmem:[#allocation52_spill] sm:$0xff] }
 0x7e6   :  { %2933 = vmatpush1.bf16.msra.mxu0 %v7028_v51  ;;  %2974 = vmatpush1.bf16.msra.mxu1 %v7029_v1  ;;  %v7039_v51 = vld [vmem:[#allocation54_spill] sm:$0xff]  ;;  %v7040_v1 = vld [vmem:[#allocation55_spill] sm:$0xff] }
 0x7e7   :  { %2934 = vmatprep.subr.bf16.mxu0 %v7030_v13  ;;  %2975 = vmatprep.subr.bf16.mxu1 %v7031_v21  ;;  %v7041_v13 = vld [vmem:[#allocation58_spill] sm:$0xff]  ;;  %v7042_v21 = vld [vmem:[#allocation56_spill] sm:$0xff] }
 0x7ea   :  { %2935 = vmatpush1.bf16.msra.mxu0 %v7032_v50  ;;  %2976 = vmatpush1.bf16.msra.mxu1 %v7033_v53  ;;  %v7043_v50 = vld [vmem:[#allocation59_spill] sm:$0xff]  ;;  %v7044_v53 = vld [vmem:[#allocation60_spill] sm:$0xff] }
 0x7eb   :  { %2936 = vmatprep.subr.bf16.mxu0 %v7034_v30  ;;  %2977 = vmatprep.subr.bf16.mxu1 %v7035_v36  ;;  %v7045_v30 = vld [vmem:[#allocation62_spill] sm:$0xff]  ;;  %v7046_v36 = vld [vmem:[#allocation100_spill] sm:$0xff] }
 0x7ee   :  { %2937 = vmatpush1.bf16.msra.mxu0 %v7036_v47  ;;  %2978 = vmatpush1.bf16.msra.mxu1 %v7037_v35  ;;  %v7047_v47 = vld [vmem:[#allocation101_spill] sm:$0xff]  ;;  %v7048_v35 = vld [vmem:[#allocation102_spill] sm:$0xff] }
 0x7ef   :  { %2938 = vmatprep.subr.bf16.mxu0 %v7038_v37  ;;  %2979 = vmatprep.subr.bf16.mxu1 %v7039_v51  ;;  %v7049_v37 = vld [vmem:[#allocation103_spill] sm:$0xff]  ;;  %v7050_v51 = vld [vmem:[#allocation104_spill] sm:$0xff] }
 0x7f2   :  { %2939 = vmatpush1.bf16.msra.mxu0 %v7040_v1  ;;  %2980 = vmatpush1.bf16.msra.mxu1 %v7041_v13  ;;  %v7051_v1 = vld [vmem:[#allocation105_spill] sm:$0xff]  ;;  %v7052_v13 = vld [vmem:[#allocation106_spill] sm:$0xff] }
 0x7f3   :  { %2940 = vmatprep.subr.bf16.mxu0 %v7042_v21  ;;  %2981 = vmatprep.subr.bf16.mxu1 %v7043_v50  ;;  %v7053_v21 = vld [vmem:[#allocation107_spill] sm:$0xff]  ;;  %v7054_v50 = vld [vmem:[#allocation108_spill] sm:$0xff] }
 0x7f6   :  { %2941 = vmatpush1.bf16.msra.mxu0 %v7044_v53  ;;  %2982 = vmatpush1.bf16.msra.mxu1 %v7045_v30  ;;  %v7055_v53 = vld [vmem:[#allocation109_spill] sm:$0xff]  ;;  %v7056_v30 = vld [vmem:[#allocation110_spill] sm:$0xff] }
 0x7f7   :  { %2942 = vmatprep.subr.bf16.mxu0 %v7046_v36  ;;  %2983 = vmatprep.subr.bf16.mxu1 %v7047_v47  ;;  %v7057_v36 = vld [vmem:[#allocation111_spill] sm:$0xff]  ;;  %v7058_v47 = vld [vmem:[#allocation112_spill] sm:$0xff] }
 0x7fa   :  { %2943 = vmatpush1.bf16.msra.mxu0 %v7048_v35  ;;  %2984 = vmatpush1.bf16.msra.mxu1 %v7049_v37  ;;  %v7059_v35 = vld [vmem:[#allocation113_spill] sm:$0xff]  ;;  %v7060_v37 = vld [vmem:[#allocation114_spill] sm:$0xff] }
 0x7fb   :  { %2944 = vmatprep.subr.bf16.mxu0 %v7050_v51  ;;  %2985 = vmatprep.subr.bf16.mxu1 %v7051_v1  ;;  %v7061_v51 = vld [vmem:[#allocation115_spill] sm:$0xff]  ;;  %v7062_v1 = vld [vmem:[#allocation116_spill] sm:$0xff] }
 0x7fe   :  { %2945 = vmatpush1.bf16.msra.mxu0 %v7052_v13  ;;  %2986 = vmatpush1.bf16.msra.mxu1 %v7053_v21  ;;  %v7063_v13 = vld [vmem:[#allocation118_spill] sm:$0xff]  ;;  %v7064_v21 = vld [vmem:[#allocation117_spill] sm:$0xff] }
 0x7ff   :  { %2946 = vmatprep.subr.bf16.mxu0 %v7054_v50  ;;  %2987 = vmatprep.subr.bf16.mxu1 %v7055_v53  ;;  %v7065_v50 = vld [vmem:[#allocation119_spill] sm:$0xff]  ;;  %v7066_v53 = vld [vmem:[#allocation120_spill] sm:$0xff] }
 0x802   :  { %2947 = vmatpush1.bf16.msra.mxu0 %v7056_v30  ;;  %2988 = vmatpush1.bf16.msra.mxu1 %v7057_v36  ;;  %v7067_v30 = vld [vmem:[#allocation121_spill] sm:$0xff]  ;;  %v7068_v36 = vld [vmem:[#allocation122_spill] sm:$0xff] }
 0x803   :  { %2948 = vmatprep.subr.bf16.mxu0 %v7058_v47  ;;  %2989 = vmatprep.subr.bf16.mxu1 %v7059_v35  ;;  %v7069_v47 = vld [vmem:[#allocation123_spill] sm:$0xff]  ;;  %v7070_v35 = vld [vmem:[#allocation124_spill] sm:$0xff] }
 0x806   :  { %2949 = vmatpush1.bf16.msra.mxu0 %v7060_v37  ;;  %2990 = vmatpush1.bf16.msra.mxu1 %v7061_v51  ;;  %v7071_v37 = vld [vmem:[#allocation125_spill] sm:$0xff]  ;;  %v7072_v51 = vld [vmem:[#allocation126_spill] sm:$0xff] }
 0x807   :  { %2950 = vmatprep.subr.bf16.mxu0 %v7062_v1  ;;  %2991 = vmatprep.subr.bf16.mxu1 %v7063_v13  ;;  %v7073_v1 = vld [vmem:[#allocation127_spill] sm:$0xff]  ;;  %v7074_v13 = vld [vmem:[#allocation128_spill] sm:$0xff] }
 0x80a   :  { %2951 = vmatpush1.bf16.msra.mxu0 %v7064_v21  ;;  %2992 = vmatpush1.bf16.msra.mxu1 %v7065_v50  ;;  %v7075_v21 = vld [vmem:[#allocation129_spill] sm:$0xff]  ;;  %v7076_v50 = vld [vmem:[#allocation130_spill] sm:$0xff] }
 0x80b   :  { %2952 = vmatprep.subr.bf16.mxu0 %v7066_v53  ;;  %2993 = vmatprep.subr.bf16.mxu1 %v7067_v30  ;;  %v7077_v53 = vld [vmem:[#allocation131_spill] sm:$0xff]  ;;  %v7078_v30 = vld [vmem:[#allocation61_spill] sm:$0xff] }
 0x80e   :  { %2953 = vmatpush1.bf16.msra.mxu0 %v7068_v36  ;;  %2994 = vmatpush1.bf16.msra.mxu1 %v7069_v47  ;;  %v7079_v36 = vld [vmem:[#allocation63_spill] sm:$0xff] }
 0x80f   :  { %2954 = vmatprep.subr.bf16.mxu0 %v7070_v35  ;;  %2995 = vmatprep.subr.bf16.mxu1 %v7071_v37 }
 0x812   :  { %2955 = vmatpush1.bf16.msra.mxu0 %v7072_v51  ;;  %2996 = vmatpush1.bf16.msra.mxu1 %v7073_v1 }
 0x813   :  { %2956 = vmatprep.subr.bf16.mxu0 %v7074_v13  ;;  %2997 = vmatprep.subr.bf16.mxu1 %v7075_v21 }
 0x816   :  { %2957 = vmatpush1.bf16.msra.mxu0 %v7076_v50  ;;  %2998 = vmatpush1.bf16.msra.mxu1 %v7077_v53 }
 0x817   :  { %3008 = vmatprep.subr.bf16.mxu0 %v7078_v30  ;;  %3049 = vmatprep.subr.bf16.mxu1 %v7079_v36 }
 0x86c   :  { %v2716_v47 = vpop.f32.mrb[44].mxu0  ;;  %v2757_v35 = vpop.f32.mrb[44].mxu1 }
 0x86d   :  { %v2879_v48 = vrot.slane %v2716_v47, 4  ;;  %v2718_v37 = vpop.f32.mrb[45].mxu0  ;;  %v2759_v5 = vpop.f32.mrb[45].mxu1  ;;  %v2881_v30 = vrot.slane %v2757_v35, 4 }
 0x86e   :  { %v2880_v51 = vrot.slane %v2718_v37, 4  ;;  %v2720_v63 = vpop.f32.mrb[46].mxu0  ;;  %v2761_v1 = vpop.f32.mrb[46].mxu1  ;;  %v2882_v36 = vrot.slane %v2759_v5, 4 }
 0x86f   :  { %v2887_v13 = vadd.f32 %v2879_v48, %v6891_v26  ;;  %v2721_v56 = vpop.f32.mrb[47].mxu0  ;;  %v2762_v21 = vpop.f32.mrb[47].mxu1  ;;  %v2889_v44 = vadd.f32 %v2881_v30, %v6893_v9  ;;  %v7106_v9 = vld [vmem:[#allocation157_spill] sm:$0xff] }
 0x870   :  { %v2888_v50 = vadd.f32 %v2880_v51, %v6892_v43  ;;  %v2890_v47 = vadd.f32 %v2882_v36, %v6894_v55  ;;  %v7105_v55 = vld [vmem:[#allocation156_spill] sm:$0xff]  ;;  %v7107_v43 = vld [vmem:[#allocation158_spill] sm:$0xff]  ;;  %v7108_v26 = vld [vmem:[#allocation61_spill] sm:$0xff] }
 0x871   :  { %v4101_v60 = vmul.f32 -1.442695, %v2887_v13  ;;  %v4103_v57 = vmul.f32 -1.442695, %v2889_v44 }
 0x872   :  { %v4102_v53 = vmul.f32 -1.442695, %v2888_v50 }
 0x873   :  { %4418 = vpow2.f32 %v4101_v60  ;;  %v7080_v60 = vld [vmem:[#allocation80_spill] sm:$0xff] }
 0x874   :  { %4420 = vpow2.f32 %v4102_v53  ;;  %v2911_v35 = vrot.slane %v7080_v60, 6 }
 0x875   :  { %4422 = vtanh.f32 %v2890_v47 }
 0x876   :  { %4424 = vpow2.f32 %v4103_v57 }
 0x87d   :  { %v4419_v37 = vpop.eup %4418 }
 0x87e   :  { %v2900_v63 = vadd.f32 1.0, %v4419_v37  ;;  %v4421_v1 = vpop.eup %4420 }
 0x87f   :  { %v2901_v56 = vadd.f32 1.0, %v4421_v1  ;;  %v4423_v48 = vpop.eup %4422 }
 0x880   :  { %4426 = vrcp.f32 %v2900_v63  ;;  %v4425_v51 = vpop.eup %4424 }
 0x881   :  { %4428 = vrcp.f32 %v2901_v56  ;;  %v2902_v50 = vadd.f32 1.0, %v4425_v51 }
 0x883   :  { %4430 = vrcp.f32 %v2902_v50 }
 0x88a   :  { %v4427_v13 = vpop.eup %4426 }
 0x88b   :  { %v2914_v21 = vmul.f32 %v4427_v13, %v4423_v48  ;;  %v4429_v5 = vpop.eup %4428 }
 0x88c   :  { %v2913_v30 = vmul.f32 %v4429_v5, %v2911_v35 }
 0x88d   :  { %v4431_v44 = vpop.eup %4430 }
 0x88e   :  { %v5984_v53 = vadd.f32 %v2914_v21, %v2913_v30 }
 0x890   :  { %7081 = vst [vmem:[#allocation81_spill] sm:$0xff] %v5984_v53  ;;  %4432 = vtanh.f32 %v5984_v53 }
 0x89a   :  { %v4433_v36 = vpop.eup %4432 }
 0x89b   :  { %v2917_v57 = vmul.f32 %v4433_v36, %v4431_v44 }
 0x8ac   :  { %v2798_v47 = vpop.f32.mrb[48].mxu0  ;;  %v2839_v37 = vpop.f32.mrb[48].mxu1 }
 0x8ad   :  { %v2846_v63 = vadd.f32 %v2798_v47, %v5161_v29  ;;  %v2800_v1 = vpop.f32.mrb[49].mxu0  ;;  %v2841_v56 = vpop.f32.mrb[49].mxu1  ;;  %v2848_v50 = vadd.f32 %v2839_v37, %v5167_v59  ;;  %v7102_v59 = vld [vmem:[#allocation153_spill] sm:$0xff]  ;;  %v7104_v29 = vld [vmem:[#allocation155_spill] sm:$0xff] }
 0x8ae   :  { %v2847_v60 = vadd.f32 %v2800_v1, %v6707_v61  ;;  %v2802_v48 = vpop.f32.mrb[50].mxu0  ;;  %v2843_v13 = vpop.f32.mrb[50].mxu1  ;;  %v2849_v30 = vadd.f32 %v2841_v56, %v5175_v31  ;;  %v7101_v31 = vld [vmem:[#allocation152_spill] sm:$0xff]  ;;  %v7103_v61 = vld [vmem:[#allocation154_spill] sm:$0xff] }
 0x8af   :  { %v4098_v51 = vmul.f32 -1.442695, %v2846_v63  ;;  %v2803_v35 = vpop.f32.mrb[51].mxu0  ;;  %v2844_v21 = vpop.f32.mrb[51].mxu1  ;;  %v4100_v44 = vmul.f32 -1.442695, %v2848_v50 }
 0x8b0   :  { %v4099_v5 = vmul.f32 -1.442695, %v2847_v60 }
 0x8b1   :  { %4434 = vpow2.f32 %v4098_v51 }
 0x8b2   :  { %4436 = vpow2.f32 %v4099_v5 }
 0x8b3   :  { %4438 = vtanh.f32 %v2849_v30 }
 0x8b4   :  { %4440 = vpow2.f32 %v4100_v44 }
 0x8bb   :  { %v4435_v36 = vpop.eup %4434 }
 0x8bc   :  { %v2859_v53 = vadd.f32 1.0, %v4435_v36  ;;  %v4437_v47 = vpop.eup %4436 }
 0x8bd   :  { %v2860_v1 = vadd.f32 1.0, %v4437_v47  ;;  %v4439_v48 = vpop.eup %4438 }
 0x8be   :  { %4442 = vrcp.f32 %v2859_v53  ;;  %v4441_v63 = vpop.eup %4440  ;;  %v2918_v53 = vpack.c.bf16 %v2917_v57, %v2917_v57  ;;  %v7084_v57 = vld [vmem:[#allocation135_spill] sm:$0xff] }
 0x8bf   :  { %4444 = vrcp.f32 %v2860_v1  ;;  %v2861_v51 = vadd.f32 1.0, %v4441_v63  ;;  %v7085_v1 = vld [vmem:[#allocation136_spill] sm:$0xff]  ;;  %v7087_v63 = vld [vmem:[#allocation138_spill] sm:$0xff] }
 0x8c0   :  { %v5995_v47 = vrot.slane %v2918_v53, 2  ;;  %v7097_v53 = vld [vmem:[#allocation148_spill] sm:$0xff] }
 0x8c1   :  { %4446 = vrcp.f32 %v2861_v51  ;;  %v7091_v51 = vld [vmem:[#allocation142_spill] sm:$0xff] }
 0x8c8   :  { %v4443_v13 = vpop.eup %4442 }
 0x8c9   :  { %v2870_v35 = vmul.f32 %v4443_v13, %v4439_v48  ;;  %v4445_v60 = vpop.eup %4444  ;;  %v7086_v48 = vld [vmem:[#allocation137_spill] sm:$0xff]  ;;  %v7088_v13 = vld [vmem:[#allocation139_spill] sm:$0xff] }
 0x8ca   :  { %v2869_v21 = vmul.f32 %v4445_v60, %v5842_v22  ;;  %v7083_v22 = vld [vmem:[#allocation78_spill] sm:$0xff]  ;;  %v7090_v60 = vld [vmem:[#allocation141_spill] sm:$0xff] }
 0x8cb   :  { %v4447_v56 = vpop.eup %4446 }
 0x8cc   :  { %v5992_v37 = vadd.f32 %v2870_v35, %v2869_v21  ;;  %v7089_v35 = vld [vmem:[#allocation140_spill] sm:$0xff]  ;;  %v7092_v21 = vld [vmem:[#allocation143_spill] sm:$0xff] }
 0x8ce   :  { %7082 = vst [vmem:[#allocation82_spill] sm:$0xff] %v5992_v37  ;;  %4448 = vtanh.f32 %v5992_v37  ;;  %v7100_v37 = vld [vmem:[#allocation151_spill] sm:$0xff] }
 0x8d8   :  { %v4449_v5 = vpop.eup %4448 }
 0x8d9   :  { %v2873_v50 = vmul.f32 %v4449_v5, %v4447_v56  ;;  %v7093_v56 = vld [vmem:[#allocation144_spill] sm:$0xff]  ;;  %v7094_v5 = vld [vmem:[#allocation145_spill] sm:$0xff] }
 0x8db   :  { %v2874_v30 = vpack.c.bf16 %v2873_v50, %v2873_v50  ;;  %v7095_v50 = vld [vmem:[#allocation146_spill] sm:$0xff] }
 0x8dd   :  { %v2920_v44 = vrot.slane %v2874_v30, 6  ;;  %v7096_v30 = vld [vmem:[#allocation147_spill] sm:$0xff] }
 0x8df   :  { %v2923_v36 = vrot.slane %v2920_v44, 2  ;;  %v7098_v44 = vld [vmem:[#allocation149_spill] sm:$0xff] }
 0x8e1   :  { %2958 = vmatprep.mubr.bf16.mxu0 %v2923_v36  ;;  %2999 = vmatprep.mubr.bf16.mxu1 %v2923_v36 }
 0x8e2   :  { %2959 = vmatmul.mubr.bf16.vlgmr.msra.gmra.mrb[52].mxu0 %v5995_v47  ;;  %3000 = vmatmul.mubr.bf16.vlgmr.msra.gmra.mrb[52].mxu1 %v5995_v47 }
 0x8e3   :  { %3009 = vmatpush1.bf16.msra.mxu0 %v4857_v11  ;;  %3050 = vmatpush1.bf16.msra.mxu1 %v6616_v52 }
 0x8e4   :  { %3040 = vmatprep.mubr.bf16.mxu0 %v2923_v36  ;;  %3081 = vmatprep.mubr.bf16.mxu1 %v2923_v36  ;;  %v7099_v36 = vld [vmem:[#allocation150_spill] sm:$0xff] }
 0x8e5   :  { %3010 = vmatprep.subr.bf16.mxu0 %v6617_v3  ;;  %3051 = vmatprep.subr.bf16.mxu1 %v6618_v54 }
 0x8e7   :  { %3011 = vmatpush1.bf16.msra.mxu0 %v6619_v27  ;;  %3052 = vmatpush1.bf16.msra.mxu1 %v6620_v20 }
 0x8e8   :  { %3012 = vmatprep.subr.bf16.mxu0 %v6621_v62  ;;  %3053 = vmatprep.subr.bf16.mxu1 %v6622_v17 }
 0x8eb   :  { %3013 = vmatpush1.bf16.msra.mxu0 %v6623_v7  ;;  %3054 = vmatpush1.bf16.msra.mxu1 %v6708_v4 }
 0x8ec   :  { %3014 = vmatprep.subr.bf16.mxu0 %v6709_v46  ;;  %3055 = vmatprep.subr.bf16.mxu1 %v6710_v49 }
 0x8ef   :  { %3015 = vmatpush1.bf16.msra.mxu0 %v6711_v18  ;;  %3056 = vmatpush1.bf16.msra.mxu1 %v6712_v39 }
 0x8f0   :  { %3016 = vmatprep.subr.bf16.mxu0 %v6713_v45  ;;  %3057 = vmatprep.subr.bf16.mxu1 %v6800_v25 }
 0x8f3   :  { %3017 = vmatpush1.bf16.msra.mxu0 %v6801_v2  ;;  %3058 = vmatpush1.bf16.msra.mxu1 %v6802_v19 }
 0x8f4   :  { %3018 = vmatprep.subr.bf16.mxu0 %v6803_v40  ;;  %3059 = vmatprep.subr.bf16.mxu1 %v6804_v34 }
 0x8f7   :  { %3019 = vmatpush1.bf16.msra.mxu0 %v6805_v10  ;;  %3060 = vmatpush1.bf16.msra.mxu1 %v6806_v32 }
 0x8f8   :  { %3020 = vmatprep.subr.bf16.mxu0 %v6807_v8  ;;  %3061 = vmatprep.subr.bf16.mxu1 %v6808_v12 }
 0x8fb   :  { %3021 = vmatpush1.bf16.msra.mxu0 %v6896_v0  ;;  %3062 = vmatpush1.bf16.msra.mxu1 %v6897_v58 }
 0x8fc   :  { %3022 = vmatprep.subr.bf16.mxu0 %v6811_v14  ;;  %3063 = vmatprep.subr.bf16.mxu1 %v6812_v41 }
 0x8ff   :  { %3023 = vmatpush1.bf16.msra.mxu0 %v6813_v33  ;;  %3064 = vmatpush1.bf16.msra.mxu1 %v6898_v16 }
 0x900   :  { %3024 = vmatprep.subr.bf16.mxu0 %v6899_v28  ;;  %3065 = vmatprep.subr.bf16.mxu1 %v6816_v24 }
 0x903   :  { %3025 = vmatpush1.bf16.msra.mxu0 %v6817_v23  ;;  %3066 = vmatpush1.bf16.msra.mxu1 %v6818_v15 }
 0x904   :  { %3026 = vmatprep.subr.bf16.mxu0 %v6819_v38  ;;  %3067 = vmatprep.subr.bf16.mxu1 %v6820_v6 }
 0x907   :  { %3027 = vmatpush1.bf16.msra.mxu0 %v6821_v42  ;;  %3068 = vmatpush1.bf16.msra.mxu1 %v7083_v22 }
 0x908   :  { %3028 = vmatprep.subr.bf16.mxu0 %v7084_v57  ;;  %3069 = vmatprep.subr.bf16.mxu1 %v7085_v1 }
 0x90b   :  { %3029 = vmatpush1.bf16.msra.mxu0 %v7086_v48  ;;  %3070 = vmatpush1.bf16.msra.mxu1 %v7087_v63 }
 0x90c   :  { %3030 = vmatprep.subr.bf16.mxu0 %v7088_v13  ;;  %3071 = vmatprep.subr.bf16.mxu1 %v7089_v35 }
 0x90f   :  { %3031 = vmatpush1.bf16.msra.mxu0 %v7090_v60  ;;  %3072 = vmatpush1.bf16.msra.mxu1 %v7091_v51 }
 0x910   :  { %3032 = vmatprep.subr.bf16.mxu0 %v7092_v21  ;;  %3073 = vmatprep.subr.bf16.mxu1 %v7093_v56 }
 0x913   :  { %3033 = vmatpush1.bf16.msra.mxu0 %v7094_v5  ;;  %3074 = vmatpush1.bf16.msra.mxu1 %v7095_v50 }
 0x914   :  { %3034 = vmatprep.subr.bf16.mxu0 %v7096_v30  ;;  %3075 = vmatprep.subr.bf16.mxu1 %v7097_v53 }
 0x917   :  { %3035 = vmatpush1.bf16.msra.mxu0 %v7098_v44  ;;  %3076 = vmatpush1.bf16.msra.mxu1 %v7099_v36  ;;  %v7109_v44 = vld [vmem:[#allocation63_spill] sm:$0xff] }
 0x918   :  { %3036 = vmatprep.subr.bf16.mxu0 %v7100_v37  ;;  %3077 = vmatprep.subr.bf16.mxu1 %v7101_v31 }
 0x91b   :  { %3037 = vmatpush1.bf16.msra.mxu0 %v7102_v59  ;;  %3078 = vmatpush1.bf16.msra.mxu1 %v7103_v61 }
 0x91c   :  { %3038 = vmatprep.subr.bf16.mxu0 %v7104_v29  ;;  %3079 = vmatprep.subr.bf16.mxu1 %v7105_v55 }
 0x91f   :  { %3039 = vmatpush1.bf16.msra.mxu0 %v7106_v9  ;;  %3080 = vmatpush1.bf16.msra.mxu1 %v7107_v43 }
 0x920   :  { %3170 = vmatprep.subr.bf16.mxu0 %v7108_v26  ;;  %3211 = vmatprep.subr.bf16.mxu1 %v7109_v44 }
 0x922   :  { %3041 = vmatmul.mubr.bf16.vlgmr.msra.gmra.mrb[56].mxu0 %v5995_v47  ;;  %3082 = vmatmul.mubr.bf16.vlgmr.msra.gmra.mrb[56].mxu1 %v5995_v47 }
 0x923   :  { %3171 = vmatpush1.bf16.msra.mxu0 %v4857_v11  ;;  %3212 = vmatpush1.bf16.msra.mxu1 %v6616_v52  ;;  %v7110_v11 = vld [vmem:[#allocation149_spill] sm:$0xff] }
 0x924   :  { %3172 = vmatprep.subr.bf16.mxu0 %v6617_v3  ;;  %3213 = vmatprep.subr.bf16.mxu1 %v6618_v54 }
 0x927   :  { %3173 = vmatpush1.bf16.msra.mxu0 %v6619_v27  ;;  %3214 = vmatpush1.bf16.msra.mxu1 %v6620_v20 }
 0x928   :  { %3174 = vmatprep.subr.bf16.mxu0 %v6621_v62  ;;  %3215 = vmatprep.subr.bf16.mxu1 %v6622_v17 }
 0x92b   :  { %3175 = vmatpush1.bf16.msra.mxu0 %v6623_v7  ;;  %3216 = vmatpush1.bf16.msra.mxu1 %v6708_v4  ;;  %v7111_v7 = vld [vmem:[#allocation67_spill] sm:$0xff]  ;;  %v7112_v4 = vld [vmem:[#allocation68_spill] sm:$0xff] }
 0x92c   :  { %3176 = vmatprep.subr.bf16.mxu0 %v6709_v46  ;;  %3217 = vmatprep.subr.bf16.mxu1 %v6710_v49 }
 0x92f   :  { %3177 = vmatpush1.bf16.msra.mxu0 %v6711_v18  ;;  %3218 = vmatpush1.bf16.msra.mxu1 %v6712_v39  ;;  %v7113_v18 = vld [vmem:[#allocation69_spill] sm:$0xff] }
 0x930   :  { %3178 = vmatprep.subr.bf16.mxu0 %v6713_v45  ;;  %3219 = vmatprep.subr.bf16.mxu1 %v6800_v25  ;;  %v7114_v45 = vld [vmem:[#allocation70_spill] sm:$0xff] }
 0x933   :  { %3179 = vmatpush1.bf16.msra.mxu0 %v6801_v2  ;;  %3220 = vmatpush1.bf16.msra.mxu1 %v6802_v19 }
 0x934   :  { %3180 = vmatprep.subr.bf16.mxu0 %v6803_v40  ;;  %3221 = vmatprep.subr.bf16.mxu1 %v6804_v34 }
 0x937   :  { %3181 = vmatpush1.bf16.msra.mxu0 %v6805_v10  ;;  %3222 = vmatpush1.bf16.msra.mxu1 %v6806_v32 }
 0x938   :  { %3182 = vmatprep.subr.bf16.mxu0 %v6807_v8  ;;  %3223 = vmatprep.subr.bf16.mxu1 %v6808_v12  ;;  %v7115_v12 = vld [vmem:[#allocation81_spill] sm:$0xff] }
 0x93b   :  { %3183 = vmatpush1.bf16.msra.mxu0 %v6896_v0  ;;  %3224 = vmatpush1.bf16.msra.mxu1 %v6897_v58 }
 0x93c   :  { %3184 = vmatprep.subr.bf16.mxu0 %v6811_v14  ;;  %3225 = vmatprep.subr.bf16.mxu1 %v6812_v41 }
 0x93f   :  { %3185 = vmatpush1.bf16.msra.mxu0 %v6813_v33  ;;  %3226 = vmatpush1.bf16.msra.mxu1 %v6898_v16  ;;  %v7116_v16 = vld [vmem:[#allocation132_spill] sm:$0xff] }
 0x940   :  { %3186 = vmatprep.subr.bf16.mxu0 %v6899_v28  ;;  %3227 = vmatprep.subr.bf16.mxu1 %v6816_v24 }
 0x943   :  { %3187 = vmatpush1.bf16.msra.mxu0 %v6817_v23  ;;  %3228 = vmatpush1.bf16.msra.mxu1 %v6818_v15 }
 0x944   :  { %3188 = vmatprep.subr.bf16.mxu0 %v6819_v38  ;;  %3229 = vmatprep.subr.bf16.mxu1 %v6820_v6  ;;  %v3155_v6 = vrot.slane %v7115_v12, 6 }
 0x947   :  { %3189 = vmatpush1.bf16.msra.mxu0 %v6821_v42  ;;  %3230 = vmatpush1.bf16.msra.mxu1 %v7083_v22  ;;  %v7117_v22 = vld [vmem:[#allocation36_spill] sm:$0xff] }
 0x948   :  { %3190 = vmatprep.subr.bf16.mxu0 %v7084_v57  ;;  %3231 = vmatprep.subr.bf16.mxu1 %v7085_v1 }
 0x94b   :  { %3191 = vmatpush1.bf16.msra.mxu0 %v7086_v48  ;;  %3232 = vmatpush1.bf16.msra.mxu1 %v7087_v63 }
 0x94c   :  { %3192 = vmatprep.subr.bf16.mxu0 %v7088_v13  ;;  %3233 = vmatprep.subr.bf16.mxu1 %v7089_v35 }
 0x94f   :  { %3193 = vmatpush1.bf16.msra.mxu0 %v7090_v60  ;;  %3234 = vmatpush1.bf16.msra.mxu1 %v7091_v51  ;;  %v7118_v51 = vld [vmem:[#allocation133_spill] sm:$0xff] }
 0x950   :  { %3194 = vmatprep.subr.bf16.mxu0 %v7092_v21  ;;  %3235 = vmatprep.subr.bf16.mxu1 %v7093_v56  ;;  %v7119_v56 = vld [vmem:[#allocation134_spill] sm:$0xff] }
 0x953   :  { %3195 = vmatpush1.bf16.msra.mxu0 %v7094_v5  ;;  %3236 = vmatpush1.bf16.msra.mxu1 %v7095_v50 }
 0x954   :  { %3196 = vmatprep.subr.bf16.mxu0 %v7096_v30  ;;  %3237 = vmatprep.subr.bf16.mxu1 %v7097_v53 }
 0x957   :  { %3197 = vmatpush1.bf16.msra.mxu0 %v7110_v11  ;;  %3238 = vmatpush1.bf16.msra.mxu1 %v7099_v36 }
 0x958   :  { %3198 = vmatprep.subr.bf16.mxu0 %v7100_v37  ;;  %3239 = vmatprep.subr.bf16.mxu1 %v7101_v31 }
 0x95b   :  { %3199 = vmatpush1.bf16.msra.mxu0 %v7102_v59  ;;  %3240 = vmatpush1.bf16.msra.mxu1 %v7103_v61 }
 0x95c   :  { %3200 = vmatprep.subr.bf16.mxu0 %v7104_v29  ;;  %3241 = vmatprep.subr.bf16.mxu1 %v7105_v55 }
 0x95f   :  { %3201 = vmatpush1.bf16.msra.mxu0 %v7106_v9  ;;  %3242 = vmatpush1.bf16.msra.mxu1 %v7107_v43 }
 0x9b5   :  { %v2960_v52 = vpop.f32.mrb[52].mxu0  ;;  %v3001_v3 = vpop.f32.mrb[52].mxu1 }
 0x9b6   :  { %v3123_v54 = vrot.slane %v2960_v52, 2  ;;  %v2962_v27 = vpop.f32.mrb[53].mxu0  ;;  %v3003_v20 = vpop.f32.mrb[53].mxu1  ;;  %v3125_v9 = vrot.slane %v3001_v3, 2 }
 0x9b7   :  { %v3124_v62 = vrot.slane %v2962_v27, 2  ;;  %v2964_v17 = vpop.f32.mrb[54].mxu0  ;;  %v3005_v31 = vpop.f32.mrb[54].mxu1  ;;  %v3126_v43 = vrot.slane %v3003_v20, 2 }
 0x9b8   :  { %v3131_v59 = vadd.f32 %v3123_v54, %v7111_v7  ;;  %v2965_v26 = vpop.f32.mrb[55].mxu0  ;;  %v3006_v61 = vpop.f32.mrb[55].mxu1  ;;  %v3133_v39 = vadd.f32 %v3125_v9, %v7113_v18 }
 0x9b9   :  { %v3132_v29 = vadd.f32 %v3124_v62, %v7112_v4  ;;  %v3134_v55 = vadd.f32 %v3126_v43, %v7114_v45  ;;  %v7120_v62 = vld [vmem:[#allocation82_spill] sm:$0xff] }
 0x9ba   :  { %v4107_v46 = vmul.f32 -1.442695, %v3131_v59  ;;  %v4109_v25 = vmul.f32 -1.442695, %v3133_v39 }
 0x9bb   :  { %v4108_v49 = vmul.f32 -1.442695, %v3132_v29 }
 0x9bc   :  { %4450 = vpow2.f32 %v4107_v46 }
 0x9bd   :  { %4452 = vpow2.f32 %v4108_v49 }
 0x9be   :  { %4454 = vtanh.f32 %v3134_v55 }
 0x9bf   :  { %4456 = vpow2.f32 %v4109_v25 }
 0x9c6   :  { %v4451_v2 = vpop.eup %4450 }
 0x9c7   :  { %v3144_v19 = vadd.f32 1.0, %v4451_v2  ;;  %v4453_v40 = vpop.eup %4452 }
 0x9c8   :  { %v3145_v34 = vadd.f32 1.0, %v4453_v40  ;;  %v4455_v10 = vpop.eup %4454 }
 0x9c9   :  { %4458 = vrcp.f32 %v3144_v19  ;;  %v4457_v32 = vpop.eup %4456 }
 0x9ca   :  { %4460 = vrcp.f32 %v3145_v34  ;;  %v3146_v41 = vadd.f32 1.0, %v4457_v32 }
 0x9cc   :  { %4462 = vrcp.f32 %v3146_v41 }
 0x9d3   :  { %v4459_v8 = vpop.eup %4458 }
 0x9d4   :  { %v3158_v42 = vmul.f32 %v4459_v8, %v4455_v10  ;;  %v4461_v14 = vpop.eup %4460 }
 0x9d5   :  { %v3157_v33 = vmul.f32 %v4461_v14, %v3155_v6 }
 0x9d6   :  { %v4463_v23 = vpop.eup %4462 }
 0x9d7   :  { %v3159_v24 = vadd.f32 %v3158_v42, %v3157_v33 }
 0x9d9   :  { %4464 = vtanh.f32 %v3159_v24 }
 0x9e3   :  { %v4465_v15 = vpop.eup %4464 }
 0x9e4   :  { %v3161_v38 = vmul.f32 %v4465_v15, %v4463_v23 }
 0x9e6   :  { %v3162_v4 = vpack.c.bf16 %v3161_v38, %v3161_v38 }
 0x9e8   :  { %v3166_v49 = vrot.slane %v3162_v4, 3 }
 0x9f5   :  { %v3042_v0 = vpop.f32.mrb[56].mxu0  ;;  %v3083_v58 = vpop.f32.mrb[56].mxu1 }
 0x9f6   :  { %v3090_v28 = vadd.f32 %v3042_v0, %v7116_v16  ;;  %v3044_v37 = vpop.f32.mrb[57].mxu0  ;;  %v3085_v47 = vpop.f32.mrb[57].mxu1  ;;  %v3092_v21 = vadd.f32 %v3083_v58, %v7118_v51 }
 0x9f7   :  { %v3091_v57 = vadd.f32 %v3044_v37, %v7117_v22  ;;  %v3046_v1 = vpop.f32.mrb[58].mxu0  ;;  %v3087_v48 = vpop.f32.mrb[58].mxu1  ;;  %v3093_v5 = vadd.f32 %v3085_v47, %v7119_v56 }
 0x9f8   :  { %v4104_v63 = vmul.f32 -1.442695, %v3090_v28  ;;  %v3047_v13 = vpop.f32.mrb[59].mxu0  ;;  %v3088_v35 = vpop.f32.mrb[59].mxu1  ;;  %v4106_v50 = vmul.f32 -1.442695, %v3092_v21 }
 0x9f9   :  { %v4105_v60 = vmul.f32 -1.442695, %v3091_v57 }
 0x9fa   :  { %4466 = vpow2.f32 %v4104_v63 }
 0x9fb   :  { %4468 = vpow2.f32 %v4105_v60 }
 0x9fc   :  { %4470 = vtanh.f32 %v3093_v5 }
 0x9fd   :  { %4472 = vpow2.f32 %v4106_v50 }
 0xa04   :  { %v4467_v30 = vpop.eup %4466 }
 0xa05   :  { %v3103_v53 = vadd.f32 1.0, %v4467_v30  ;;  %v4469_v44 = vpop.eup %4468 }
 0xa06   :  { %v3104_v36 = vadd.f32 1.0, %v4469_v44  ;;  %v4471_v11 = vpop.eup %4470 }
 0xa07   :  { %4474 = vrcp.f32 %v3103_v53  ;;  %v4473_v52 = vpop.eup %4472 }
 0xa08   :  { %4476 = vrcp.f32 %v3104_v36  ;;  %v3105_v20 = vadd.f32 1.0, %v4473_v52 }
 0xa0a   :  { %4478 = vrcp.f32 %v3105_v20 }
 0xa11   :  { %v4475_v3 = vpop.eup %4474 }
 0xa12   :  { %v3114_v54 = vmul.f32 %v4475_v3, %v4471_v11  ;;  %v4477_v27 = vpop.eup %4476 }
 0xa13   :  { %v3113_v17 = vmul.f32 %v4477_v27, %v7120_v62 }
 0xa14   :  { %v4479_v7 = vpop.eup %4478 }
 0xa15   :  { %v3115_v31 = vadd.f32 %v3114_v54, %v3113_v17 }
 0xa17   :  { %4480 = vtanh.f32 %v3115_v31 }
 0xa21   :  { %v4481_v59 = vpop.eup %4480 }
 0xa22   :  { %v3117_v26 = vmul.f32 %v4481_v59, %v4479_v7 }
 0xa24   :  { %v3118_v61 = vpack.c.bf16 %v3117_v26, %v3117_v26 }
 0xa26   :  { %v3164_v29 = vrot.slane %v3118_v61, 5 }
 0xa28   :  { %v3167_v46 = vrot.slane %v3164_v29, 3 }
 0xa2a   :  { %3202 = vmatprep.mubr.bf16.mxu0 %v3167_v46  ;;  %3243 = vmatprep.mubr.bf16.mxu1 %v3167_v46 }
 0xa2b   :  { %3203 = vmatmul.mubr.bf16.vlgmr.msra.gmra.mrb[60].mxu0 %v3166_v49  ;;  %3244 = vmatmul.mubr.bf16.vlgmr.msra.gmra.mrb[60].mxu1 %v3166_v49 }
 0xa2c   :  { %4575 = shalt.err (!%p4572_p12)  }
 0xa2d   :  { %s4576_s28 = scalar_lea.vmem %s154_s20, 3072  ;;  %p4581_p0 = scmp.lt.s32.totalorder %s154_s20, %s154_s20 }
 0xa2e   :  { %p4577_p13 = scmp.ne.s32.totalorder %s154_s20, %s4576_s28  ;;  %p4582_p1 = scmp.lt.s32.totalorder %s4576_s28, %s4576_s28 }
 0xa30   :  { %p4583_p2 = por %p4582_p1, %p4581_p0 }
 0xa32   :  { %p4584_p3 = pnand %p4583_p2, %p4577_p13 }
 0xa34   :  { %4587 = shalt.err (!%p4584_p3)  }
 0xa35   :  { %156 = dma.hbm_to_vmem [thread:$0]  %s6203_s10, 3072, %s154_s20, [#allocation5 + $0x2] }
 0xafe   :  { %v3204_v9 = vpop.f32.mrb[60].mxu0  ;;  %v3245_v43 = vpop.f32.mrb[60].mxu1 }
 0xaff   :  { %v3205_v18 = vadd.f32 %v3204_v9, %v7116_v16  ;;  %v3206_v39 = vpop.f32.mrb[61].mxu0  ;;  %v3247_v45 = vpop.f32.mrb[61].mxu1  ;;  %v3246_v32 = vadd.f32 %v3245_v43, %v7118_v51 }
 0xb00   :  { %v3207_v55 = vadd.f32 %v3206_v39, %v7117_v22  ;;  %v3208_v25 = vpop.f32.mrb[62].mxu0  ;;  %v3249_v2 = vpop.f32.mrb[62].mxu1  ;;  %v3248_v8 = vadd.f32 %v3247_v45, %v7119_v56 }
 0xb01   :  { %v4110_v19 = vmul.f32 -1.442695, %v3205_v18  ;;  %v3209_v40 = vpop.f32.mrb[63].mxu0  ;;  %v3250_v34 = vpop.f32.mrb[63].mxu1  ;;  %v4112_v12 = vmul.f32 -1.442695, %v3246_v32 }
 0xb02   :  { %v4111_v10 = vmul.f32 -1.442695, %v3207_v55 }
 0xb03   :  { %4482 = vpow2.f32 %v4110_v19 }
 0xb04   :  { %4484 = vpow2.f32 %v4111_v10 }
 0xb05   :  { %4486 = vtanh.f32 %v3248_v8 }
 0xb06   :  { %4488 = vpow2.f32 %v4112_v12 }
 0xb0d   :  { %v4483_v6 = vpop.eup %4482 }
 0xb0e   :  { %v3261_v42 = vadd.f32 1.0, %v4483_v6  ;;  %v4485_v14 = vpop.eup %4484 }
 0xb0f   :  { %v3262_v41 = vadd.f32 1.0, %v4485_v14  ;;  %v4487_v33 = vpop.eup %4486 }
 0xb10   :  { %4490 = vrcp.f32 %v3261_v42  ;;  %v4489_v24 = vpop.eup %4488 }
 0xb11   :  { %4492 = vrcp.f32 %v3262_v41  ;;  %v3263_v0 = vadd.f32 1.0, %v4489_v24 }
 0xb13   :  { %4494 = vrcp.f32 %v3263_v0 }
 0xb1a   :  { %v4491_v23 = vpop.eup %4490 }
 0xb1b   :  { %v3272_v15 = vmul.f32 %v4491_v23, %v4487_v33  ;;  %v4493_v38 = vpop.eup %4492 }
 0xb1c   :  { %v3271_v58 = vmul.f32 %v4493_v38, %v3115_v31 }
 0xb1d   :  { %v4495_v28 = vpop.eup %4494 }
 0xb1e   :  { %v3273_v16 = vadd.f32 %v3272_v15, %v3271_v58 }
 0xb20   :  { %4496 = vtanh.f32 %v3273_v16 }
 0xb2a   :  { %v4497_v37 = vpop.eup %4496 }
 0xb2b   :  { %v6153_v47 = vmul.f32 %v4497_v37, %v4495_v28 }
 0xb2c   :  { %4614 = dma.done.wait [#allocation5], 4096 }
 0xb2d   :  { %4615 = vsyncadd [#allocation5], 4294963200 }
 0xb2e   :  { %4616 = dma.done.wait [#allocation5 + $0x1], 12288 }
 0xb2f   :  { %4617 = vsyncadd [#allocation5 + $0x1], 4294955008 }
 0xb30   :  { %4618 = dma.done.wait [#allocation5 + $0x2], 3072 }
 0xb31   :  { %4619 = vsyncadd [#allocation5 + $0x2], 4294964224  ;;  %v7121_v22 = vmov 0   ;;  %v3290_v57 = vld [vmem:[#allocation2 + $0x8] sm:$0xff]  ;;  %v3289_v1 = vld [vmem:[#allocation2] sm:$0xff]  ;;  %v3288_v46 = vpack.c.bf16 %v6153_v47, %v6153_v47  ;;  %vm4645_vm1 = vmmov 0  }
 0xb32   :  { %3375 = vmatprep.mubr.bf16.mxu0 %v7121_v22  ;;  %3416 = vmatprep.mubr.bf16.mxu1 %v7121_v22  ;;  %v3294_v48 = vld [vmem:[#allocation2 + $0x28] sm:$0xff]  ;;  %v3293_v63 = vld [vmem:[#allocation2 + $0x20] sm:$0xff]  ;;  %v3292_v35 = vld [vmem:[#allocation2 + $0x18] sm:$0xff]  ;;  %s4646_s15 = smov [#allocation12]  }
 0xb33   :  { %3343 = vmatprep.subr.bf16.mxu0 %v3290_v57  ;;  %v3298_v13 = vld [vmem:[#allocation2 + $0x48] sm:$0xff]  ;;  %v3291_v60 = vld [vmem:[#allocation2 + $0x10] sm:$0xff]  ;;  %3384 = vmatprep.subr.bf16.mxu1 %v3292_v35  ;;  %v3296_v51 = vld [vmem:[#allocation2 + $0x38] sm:$0xff]  ;;  %s3834_s16 = sshll.u32 %s4646_s15, 4  ;;  %s3835_s16 = int_to_ptr.vmem [resolvable:$true] %s3834_s16 }
 0xb34   :  { %3344 = vmatpush1.bf16.msra.mxu0 %v3289_v1  ;;  %v3297_v21 = vld [vmem:[#allocation2 + $0x40] sm:$0xff]  ;;  %3385 = vmatpush1.bf16.msra.mxu1 %v3291_v60  ;;  %v3302_v56 = vld [vmem:[#allocation2 + $0x68] sm:$0xff]  ;;  %v3295_v5 = vld [vmem:[#allocation2 + $0x30] sm:$0xff]  ;;  %s4588_s17 = scalar_lea.vmem %s3835_s16, 32  ;;  %p4593_p5 = scmp.lt.s32.totalorder %s3835_s16, %s3835_s16 }
 0xb35   :  { %3345 = vmatprep.subr.bf16.mxu0 %v3294_v48  ;;  %3386 = vmatprep.subr.bf16.mxu1 %v3296_v51  ;;  %v3300_v50 = vld [vmem:[#allocation2 + $0x58] sm:$0xff]  ;;  %v3301_v30 = vld [vmem:[#allocation2 + $0x60] sm:$0xff]  ;;  %v3306_v53 = vld [vmem:[#allocation2 + $0x88] sm:$0xff]  ;;  %p4589_p4 = scmp.ne.s32.totalorder %s3835_s16, %s4588_s17  ;;  %p4594_p6 = scmp.lt.s32.totalorder %s4588_s17, %s4588_s17 }
 0xb36   :  { %v3299_v44 = vld [vmem:[#allocation2 + $0x50] sm:$0xff]  ;;  %v3304_v36 = vld [vmem:[#allocation2 + $0x78] sm:$0xff]  ;;  %v3305_v11 = vld [vmem:[#allocation2 + $0x80] sm:$0xff] }
 0xb37   :  { %v3310_v52 = vld [vmem:[#allocation2 + $0xa8] sm:$0xff]  ;;  %v3303_v3 = vld [vmem:[#allocation2 + $0x70] sm:$0xff]  ;;  %v3308_v54 = vld [vmem:[#allocation2 + $0x98] sm:$0xff]  ;;  %p4595_p7 = por %p4594_p6, %p4593_p5 }
 0xb38   :  { %3346 = vmatpush1.bf16.msra.mxu0 %v3293_v63  ;;  %3387 = vmatpush1.bf16.msra.mxu1 %v3295_v5  ;;  %v3309_v27 = vld [vmem:[#allocation2 + $0xa0] sm:$0xff]  ;;  %v3314_v20 = vld [vmem:[#allocation2 + $0xc8] sm:$0xff]  ;;  %v3307_v62 = vld [vmem:[#allocation2 + $0x90] sm:$0xff] }
 0xb39   :  { %3347 = vmatprep.subr.bf16.mxu0 %v3298_v13  ;;  %3388 = vmatprep.subr.bf16.mxu1 %v3300_v50  ;;  %v3312_v17 = vld [vmem:[#allocation2 + $0xb8] sm:$0xff]  ;;  %v3313_v31 = vld [vmem:[#allocation2 + $0xc0] sm:$0xff]  ;;  %v3318_v7 = vld [vmem:[#allocation2 + $0xe8] sm:$0xff]  ;;  %p4596_p8 = pnand %p4595_p7, %p4589_p4 }
 0xb3a   :  { %v3311_v59 = vld [vmem:[#allocation2 + $0xb0] sm:$0xff]  ;;  %v3316_v26 = vld [vmem:[#allocation2 + $0xd8] sm:$0xff]  ;;  %v3317_v61 = vld [vmem:[#allocation2 + $0xe0] sm:$0xff] }
 0xb3b   :  { %v3315_v4 = vld [vmem:[#allocation2 + $0xd0] sm:$0xff]  ;;  %v3434_v29 = vld [vmem:[#allocation3 + $0x8] sm:$0xff]  ;;  %v3320_v49 = vld [vmem:[#allocation2 + $0xf8] sm:$0xff] }
 0xb3c   :  { %3348 = vmatpush1.bf16.msra.mxu0 %v3297_v21  ;;  %3389 = vmatpush1.bf16.msra.mxu1 %v3299_v44  ;;  %v3433_v9 = vld [vmem:[#allocation3] sm:$0xff]  ;;  %v3319_v43 = vld [vmem:[#allocation2 + $0xf0] sm:$0xff]  ;;  %v3436_v45 = vld [vmem:[#allocation3 + $0x18] sm:$0xff] }
 0xb3d   :  { %3349 = vmatprep.subr.bf16.mxu0 %v3302_v56  ;;  %3390 = vmatprep.subr.bf16.mxu1 %v3304_v36  ;;  %v3437_v18 = vld [vmem:[#allocation3 + $0x20] sm:$0xff]  ;;  %v3459_v39 = vld [vmem:[#allocation3 + $0xd0] sm:$0xff]  ;;  %v3440_v55 = vld [vmem:[#allocation3 + $0x38] sm:$0xff] }
 0xb3e   :  { %v3435_v25 = vld [vmem:[#allocation3 + $0x10] sm:$0xff]  ;;  %v3462_v2 = vld [vmem:[#allocation3 + $0xe8] sm:$0xff]  ;;  %v3465_v10 = vld [vmem:[#allocation3 + $0x100] sm:$0xff] }
 0xb3f   :  { %v3439_v19 = vld [vmem:[#allocation3 + $0x30] sm:$0xff]  ;;  %v3438_v34 = vld [vmem:[#allocation3 + $0x28] sm:$0xff]  ;;  %v3441_v12 = vld [vmem:[#allocation3 + $0x40] sm:$0xff] }
 0xb40   :  { %3350 = vmatpush1.bf16.msra.mxu0 %v3301_v30  ;;  %3391 = vmatpush1.bf16.msra.mxu1 %v3303_v3  ;;  %v3443_v40 = vld [vmem:[#allocation3 + $0x50] sm:$0xff]  ;;  %v3442_v32 = vld [vmem:[#allocation3 + $0x48] sm:$0xff]  ;;  %v3468_v6 = vld [vmem:[#allocation3 + $0x118] sm:$0xff] }
 0xb41   :  { %3351 = vmatprep.subr.bf16.mxu0 %v3306_v53  ;;  %3392 = vmatprep.subr.bf16.mxu1 %v3308_v54  ;;  %v3446_v8 = vld [vmem:[#allocation3 + $0x68] sm:$0xff]  ;;  %v3445_v42 = vld [vmem:[#allocation3 + $0x60] sm:$0xff]  ;;  %v3444_v41 = vld [vmem:[#allocation3 + $0x58] sm:$0xff] }
 0xb42   :  { %v3449_v14 = vld [vmem:[#allocation3 + $0x80] sm:$0xff]  ;;  %v3471_v33 = vld [vmem:[#allocation3 + $0x130] sm:$0xff]  ;;  %v3448_v24 = vld [vmem:[#allocation3 + $0x78] sm:$0xff] }
 0xb43   :  { %v3452_v23 = vld [vmem:[#allocation3 + $0x98] sm:$0xff]  ;;  %v3447_v15 = vld [vmem:[#allocation3 + $0x70] sm:$0xff]  ;;  %v3474_v38 = vld [vmem:[#allocation3 + $0x148] sm:$0xff] }
 0xb44   :  { %3352 = vmatpush1.bf16.msra.mxu0 %v3305_v11  ;;  %3393 = vmatpush1.bf16.msra.mxu1 %v3307_v62  ;;  %v3451_v0 = vld [vmem:[#allocation3 + $0x90] sm:$0xff]  ;;  %v3450_v16 = vld [vmem:[#allocation3 + $0x88] sm:$0xff]  ;;  %v3457_v47 = vld [vmem:[#allocation3 + $0xc0] sm:$0xff] }
 0xb45   :  { %3353 = vmatprep.subr.bf16.mxu0 %v3310_v52  ;;  %3394 = vmatprep.subr.bf16.mxu1 %v3312_v17  ;;  %v3455_v58 = vld [vmem:[#allocation3 + $0xb0] sm:$0xff]  ;;  %v3454_v28 = vld [vmem:[#allocation3 + $0xa8] sm:$0xff]  ;;  %v3461_v22 = vld [vmem:[#allocation3 + $0xe0] sm:$0xff] }
 0xb46   :  { %v3458_v37 = vld [vmem:[#allocation3 + $0xc8] sm:$0xff]  ;;  %v3460_v57 = vld [vmem:[#allocation3 + $0xd8] sm:$0xff]  ;;  %v3463_v48 = vld [vmem:[#allocation3 + $0xf0] sm:$0xff] }
 0xb47   :  { %v3464_v1 = vld [vmem:[#allocation3 + $0xf8] sm:$0xff]  ;;  %v3467_v63 = vld [vmem:[#allocation3 + $0x110] sm:$0xff]  ;;  %v3466_v13 = vld [vmem:[#allocation3 + $0x108] sm:$0xff] }
 0xb48   :  { %3354 = vmatpush1.bf16.msra.mxu0 %v3309_v27  ;;  %3395 = vmatpush1.bf16.msra.mxu1 %v3311_v59  ;;  %v3470_v35 = vld [vmem:[#allocation3 + $0x128] sm:$0xff]  ;;  %v3469_v60 = vld [vmem:[#allocation3 + $0x120] sm:$0xff]  ;;  %v3472_v21 = vld [vmem:[#allocation3 + $0x138] sm:$0xff] }
 0xb49   :  { %3355 = vmatprep.subr.bf16.mxu0 %v3314_v20  ;;  %3396 = vmatprep.subr.bf16.mxu1 %v3316_v26  ;;  %v3473_v51 = vld [vmem:[#allocation3 + $0x140] sm:$0xff]  ;;  %v3476_v56 = vld [vmem:[#allocation3 + $0x158] sm:$0xff]  ;;  %v3475_v50 = vld [vmem:[#allocation3 + $0x150] sm:$0xff] }
 0xb4a   :  { %v3477_v5 = vld [vmem:[#allocation3 + $0x160] sm:$0xff]  ;;  %v3479_v53 = vld [vmem:[#allocation3 + $0x170] sm:$0xff]  ;;  %v3480_v44 = vld [vmem:[#allocation3 + $0x178] sm:$0xff] }
 0xb4b   :  { %v3453_v30 = vld [vmem:[#allocation3 + $0xa0] sm:$0xff]  ;;  %v3478_v36 = vld [vmem:[#allocation3 + $0x168] sm:$0xff]  ;;  %v3456_v11 = vld [vmem:[#allocation3 + $0xb8] sm:$0xff] }
 0xb4c   :  { %3356 = vmatpush1.bf16.msra.mxu0 %v3313_v31  ;;  %3397 = vmatpush1.bf16.msra.mxu1 %v3315_v4  ;;  %v3482_v52 = vld [vmem:[#allocation3 + $0x188] sm:$0xff]  ;;  %v3507_v3 = vld [vmem:[#allocation3 + $0x250] sm:$0xff]  ;;  %v6162_v54 = vld [vmem:[%s6198_s5] sm:$0xf] }
 0xb4d   :  { %3357 = vmatprep.subr.bf16.mxu0 %v3318_v7  ;;  %3398 = vmatprep.subr.bf16.mxu1 %v3320_v49  ;;  %v7122_v27 = vld [vmem:[#allocation64_spill] sm:$0xff] }
 0xb4e   :  { %v3326_v20 = vrot.slane %v6162_v54, %v7122_v27  ;;  %v7123_v62 = vld [vmem:[#allocation32_spill] sm:$0xff] }
 0xb4f   :  { %v3330_v17 = vrot.slane %v6162_v54, %v7123_v62 }
 0xb50   :  { %3358 = vmatpush1.bf16.msra.mxu0 %v3317_v61  ;;  %3399 = vmatpush1.bf16.msra.mxu1 %v3319_v43 }
 0xb51   :  { %3546 = vmatprep.subr.bf16.mxu0 %v3434_v29  ;;  %4117 = vmatprep.subr.bf16.mxu1 %v3459_v39 }
 0xb53   :  { %3376 = vmatmul.mubr.bf16.vlgmr.msra.gmra.mrb[64].mxu0 %v3288_v46  ;;  %3417 = vmatmul.mubr.bf16.vlgmr.msra.gmra.mrb[64].mxu1 %v3288_v46  ;;  %v7124_v46 = vld [vmem:[#allocation66_spill] sm:$0xff] }
 0xb54   :  { %3547 = vmatpush1.bf16.msra.mxu0 %v3433_v9  ;;  %4118 = vmatpush3.bf16.msra.mxu1 %v3435_v25  ;;  %v3338_v49 = vrot.slane %v6162_v54, %v7124_v46  ;;  %v3483_v25 = vld [vmem:[#allocation3 + $0x190] sm:$0xff]  ;;  %v3526_v46 = vld [vmem:[#allocation3 + $0x2e8] sm:$0xff] }
 0xb55   :  { %3548 = vmatprep.subr.bf16.mxu0 %v3437_v18  ;;  %4119 = vmatprep.subr.bf16.mxu1 %v3462_v2 }
 0xb58   :  { %3549 = vmatpush1.bf16.msra.mxu0 %v3436_v45  ;;  %4120 = vmatpush3.bf16.msra.mxu1 %v3438_v34  ;;  %v3510_v34 = vld [vmem:[#allocation3 + $0x268] sm:$0xff] }
 0xb59   :  { %3550 = vmatprep.subr.bf16.mxu0 %v3440_v55  ;;  %4121 = vmatprep.subr.bf16.mxu1 %v3465_v10  ;;  %v3481_v55 = vld [vmem:[#allocation3 + $0x180] sm:$0xff] }
 0xb5c   :  { %3551 = vmatpush1.bf16.msra.mxu0 %v3439_v19  ;;  %4122 = vmatpush3.bf16.msra.mxu1 %v3441_v12  ;;  %v3486_v12 = vld [vmem:[#allocation3 + $0x1a8] sm:$0xff] }
 0xb5d   :  { %3552 = vmatprep.subr.bf16.mxu0 %v3443_v40  ;;  %4123 = vmatprep.subr.bf16.mxu1 %v3468_v6  ;;  %v3485_v40 = vld [vmem:[#allocation3 + $0x1a0] sm:$0xff] }
 0xb60   :  { %3553 = vmatpush1.bf16.msra.mxu0 %v3442_v32  ;;  %4124 = vmatpush3.bf16.msra.mxu1 %v3444_v41  ;;  %v3487_v41 = vld [vmem:[#allocation3 + $0x1b0] sm:$0xff] }
 0xb61   :  { %3554 = vmatprep.subr.bf16.mxu0 %v3446_v8  ;;  %4125 = vmatprep.subr.bf16.mxu1 %v3471_v33  ;;  %v3484_v8 = vld [vmem:[#allocation3 + $0x198] sm:$0xff]  ;;  %v3489_v33 = vld [vmem:[#allocation3 + $0x1c0] sm:$0xff] }
 0xb64   :  { %3555 = vmatpush1.bf16.msra.mxu0 %v3445_v42  ;;  %4126 = vmatpush3.bf16.msra.mxu1 %v3447_v15  ;;  %v3488_v42 = vld [vmem:[#allocation3 + $0x1b8] sm:$0xff]  ;;  %v3490_v15 = vld [vmem:[#allocation3 + $0x1c8] sm:$0xff] }
 0xb65   :  { %3556 = vmatprep.subr.bf16.mxu0 %v3449_v14  ;;  %4127 = vmatprep.subr.bf16.mxu1 %v3474_v38  ;;  %v3513_v14 = vld [vmem:[#allocation3 + $0x280] sm:$0xff]  ;;  %v3492_v38 = vld [vmem:[#allocation3 + $0x1d8] sm:$0xff] }
 0xb68   :  { %3557 = vmatpush1.bf16.msra.mxu0 %v3448_v24  ;;  %4128 = vmatpush3.bf16.msra.mxu1 %v3450_v16  ;;  %v3491_v24 = vld [vmem:[#allocation3 + $0x1d0] sm:$0xff]  ;;  %v3493_v16 = vld [vmem:[#allocation3 + $0x1e0] sm:$0xff] }
 0xb69   :  { %3558 = vmatprep.subr.bf16.mxu0 %v3452_v23  ;;  %4129 = vmatprep.subr.bf16.mxu1 %v3477_v5  ;;  %v3516_v23 = vld [vmem:[#allocation3 + $0x298] sm:$0xff] }
 0xb6c   :  { %3559 = vmatpush1.bf16.msra.mxu0 %v3451_v0  ;;  %4130 = vmatpush3.bf16.msra.mxu1 %v3453_v30  ;;  %v3494_v0 = vld [vmem:[#allocation3 + $0x1e8] sm:$0xff]  ;;  %v3504_v30 = vld [vmem:[#allocation3 + $0x238] sm:$0xff] }
 0xb6d   :  { %3560 = vmatprep.subr.bf16.mxu0 %v3455_v58  ;;  %4131 = vmatprep.subr.bf16.mxu1 %v3480_v44  ;;  %v3519_v58 = vld [vmem:[#allocation3 + $0x2b0] sm:$0xff] }
 0xb70   :  { %3561 = vmatpush1.bf16.msra.mxu0 %v3454_v28  ;;  %4132 = vmatpush3.bf16.msra.mxu1 %v3456_v11  ;;  %v3495_v28 = vld [vmem:[#allocation3 + $0x1f0] sm:$0xff]  ;;  %v3509_v11 = vld [vmem:[#allocation3 + $0x260] sm:$0xff] }
 0xb71   :  { %3562 = vmatprep.subr.bf16.mxu0 %v3458_v37  ;;  %4139 = vmatprep.subr.bf16.mxu1 %v3507_v3  ;;  %v3497_v37 = vld [vmem:[#allocation3 + $0x200] sm:$0xff]  ;;  %v3512_v3 = vld [vmem:[#allocation3 + $0x278] sm:$0xff] }
 0xb74   :  { %3563 = vmatpush1.bf16.msra.mxu0 %v3457_v47  ;;  %v3522_v47 = vld [vmem:[#allocation3 + $0x2c8] sm:$0xff] }
 0xb75   :  { %3564 = vmatprep.subr.bf16.mxu0 %v3461_v22  ;;  %v7125_v22 = vld [vmem:[#allocation65_spill] sm:$0xff] }
 0xb78   :  { %3565 = vmatpush1.bf16.msra.mxu0 %v3460_v57  ;;  %v3334_v57 = vrot.slane %v6162_v54, %v7125_v22  ;;  %v3511_v54 = vld [vmem:[#allocation3 + $0x270] sm:$0xff] }
 0xb79   :  { %3566 = vmatprep.subr.bf16.mxu0 %v3464_v1  ;;  %v3496_v1 = vld [vmem:[#allocation3 + $0x1f8] sm:$0xff] }
 0xb7c   :  { %3567 = vmatpush1.bf16.msra.mxu0 %v3463_v48  ;;  %v3498_v48 = vld [vmem:[#allocation3 + $0x208] sm:$0xff] }
 0xb7d   :  { %3568 = vmatprep.subr.bf16.mxu0 %v3467_v63  ;;  %v3500_v63 = vld [vmem:[#allocation3 + $0x218] sm:$0xff] }
 0xb80   :  { %3569 = vmatpush1.bf16.msra.mxu0 %v3466_v13  ;;  %v3525_v13 = vld [vmem:[#allocation3 + $0x2e0] sm:$0xff] }
 0xb81   :  { %3570 = vmatprep.subr.bf16.mxu0 %v3470_v35 }
 0xb84   :  { %3571 = vmatpush1.bf16.msra.mxu0 %v3469_v60  ;;  %v3499_v60 = vld [vmem:[#allocation3 + $0x210] sm:$0xff] }
 0xb85   :  { %3572 = vmatprep.subr.bf16.mxu0 %v3473_v51  ;;  %v3501_v51 = vld [vmem:[#allocation3 + $0x220] sm:$0xff] }
 0xb88   :  { %3573 = vmatpush1.bf16.msra.mxu0 %v3472_v21  ;;  %v3503_v21 = vld [vmem:[#allocation3 + $0x230] sm:$0xff] }
 0xb89   :  { %3574 = vmatprep.subr.bf16.mxu0 %v3476_v56  ;;  %v3528_v56 = vld [vmem:[#allocation3 + $0x2f8] sm:$0xff] }
 0xb8c   :  { %3575 = vmatpush1.bf16.msra.mxu0 %v3475_v50  ;;  %v3502_v50 = vld [vmem:[#allocation3 + $0x228] sm:$0xff] }
 0xb8d   :  { %3576 = vmatprep.subr.bf16.mxu0 %v3479_v53  ;;  %v3506_v53 = vld [vmem:[#allocation3 + $0x248] sm:$0xff] }
 0xb90   :  { %3577 = vmatpush1.bf16.msra.mxu0 %v3478_v36  ;;  %v3505_v36 = vld [vmem:[#allocation3 + $0x240] sm:$0xff] }
 0xb91   :  { %3587 = vmatprep.subr.bf16.mxu0 %v3482_v52  ;;  %v3508_v52 = vld [vmem:[#allocation3 + $0x258] sm:$0xff] }
 0xc26   :  { %v3377_v31 = vpop.f32.mrb[64].mxu0  ;;  %v3418_v43 = vpop.f32.mrb[64].mxu1 }
 0xc27   :  { %v3378_v7 = vadd.f32 %v3377_v31, %v3326_v20  ;;  %v3379_v59 = vpop.f32.mrb[65].mxu0  ;;  %v3420_v39 = vpop.f32.mrb[65].mxu1  ;;  %v3419_v35 = vadd.f32 %v3418_v43, %v3334_v57  ;;  %v3515_v20 = vld [vmem:[#allocation3 + $0x290] sm:$0xff]  ;;  %v3518_v31 = vld [vmem:[#allocation3 + $0x2a8] sm:$0xff] }
 0xc28   :  { %v3380_v26 = vadd.f32 %v3379_v59, %v3330_v17  ;;  %v3381_v61 = vpop.f32.mrb[66].mxu0  ;;  %v3421_v2 = vadd.f32 %v3420_v39, %v3338_v49  ;;  %v3422_v19 = vpop.f32.mrb[66].mxu1  ;;  %v3514_v17 = vld [vmem:[#allocation3 + $0x288] sm:$0xff]  ;;  %v3521_v59 = vld [vmem:[#allocation3 + $0x2c0] sm:$0xff]  ;;  %v3724_v39 = vld [vmem:[#allocation4 + $0x50] sm:$0xff] }
 0xc29   :  { %v3425_v4 = vmax.f32 %v3378_v7, 0.0  ;;  %v3382_v29 = vpop.f32.mrb[67].mxu0  ;;  %v3423_v10 = vpop.f32.mrb[67].mxu1  ;;  %v3427_v5 = vmax.f32 %v3419_v35, 0.0  ;;  %v3517_v7 = vld [vmem:[#allocation3 + $0x2a0] sm:$0xff]  ;;  %v3524_v61 = vld [vmem:[#allocation3 + $0x2d8] sm:$0xff] }
 0xc2a   :  { %v3426_v9 = vmax.f32 %v3380_v26, 0.0  ;;  %v3428_v32 = vmax.f32 %v3421_v2, 0.0  ;;  %v3520_v26 = vld [vmem:[#allocation3 + $0x2b8] sm:$0xff]  ;;  %v3527_v29 = vld [vmem:[#allocation3 + $0x2f0] sm:$0xff]  ;;  %v3722_v49 = vld [vmem:[#allocation4 + $0x40] sm:$0xff] }
 0xc2b   :  { %v3429_v45 = vpack.c.bf16 %v3425_v4, %v3425_v4  ;;  %v3431_v44 = vpack.c.bf16 %v3427_v5, %v3427_v5  ;;  %v3523_v4 = vld [vmem:[#allocation3 + $0x2d0] sm:$0xff]  ;;  %v3723_v43 = vld [vmem:[#allocation4 + $0x48] sm:$0xff]  ;;  %v3726_v2 = vld [vmem:[#allocation4 + $0x60] sm:$0xff] }
 0xc2c   :  { %v3430_v18 = vpack.c.bf16 %v3426_v9, %v3426_v9  ;;  %v3432_v6 = vpack.c.bf16 %v3428_v32, %v3428_v32  ;;  %v3714_v9 = vld [vmem:[#allocation4] sm:$0xff]  ;;  %v3728_v10 = vld [vmem:[#allocation4 + $0x70] sm:$0xff] }
 0xc2d   :  { %v3718_v19 = vld [vmem:[#allocation4 + $0x20] sm:$0xff]  ;;  %v3720_v32 = vld [vmem:[#allocation4 + $0x30] sm:$0xff] }
 0xc2e   :  { %3578 = vmatprep.mubr.bf16.mxu0 %v3430_v18  ;;  %3660 = vmatprep.mubr.bf16.mxu1 %v3430_v18  ;;  %v3715_v18 = vld [vmem:[#allocation4 + $0x8] sm:$0xff] }
 0xc2f   :  { %3579 = vmatmul.mubr.bf16.vlgmr.msra.gmra.mrb[68].mxu0 %v3429_v45  ;;  %3661 = vmatmul.mubr.bf16.vlgmr.msra.gmra.mrb[68].mxu1 %v3429_v45  ;;  %v3716_v45 = vld [vmem:[#allocation4 + $0x10] sm:$0xff] }
 0xc30   :  { %3588 = vmatpush1.bf16.msra.mxu0 %v3481_v55  ;;  %4140 = vmatpush3.bf16.msra.mxu1 %v3483_v25  ;;  %v3725_v55 = vld [vmem:[#allocation4 + $0x58] sm:$0xff] }
 0xc31   :  { %3589 = vmatprep.subr.bf16.mxu0 %v3485_v40  ;;  %4141 = vmatprep.subr.bf16.mxu1 %v3510_v34  ;;  %v3717_v25 = vld [vmem:[#allocation4 + $0x18] sm:$0xff]  ;;  %v3727_v40 = vld [vmem:[#allocation4 + $0x68] sm:$0xff] }
 0xc32   :  { %3700 = vmatprep.mubr.bf16.mxu1 %v3432_v6  ;;  %3619 = vmatprep.mubr.bf16.mxu0 %v3432_v6  ;;  %v3719_v34 = vld [vmem:[#allocation4 + $0x28] sm:$0xff]  ;;  %v4644_v6 = vmov 0.0  }
 0xc34   :  { %3590 = vmatpush1.bf16.msra.mxu0 %v3484_v8  ;;  %4142 = vmatpush3.bf16.msra.mxu1 %v3486_v12  ;;  %v3729_v8 = vld [vmem:[#allocation4 + $0x78] sm:$0xff] }
 0xc35   :  { %3591 = vmatprep.subr.bf16.mxu0 %v3488_v42  ;;  %4143 = vmatprep.subr.bf16.mxu1 %v3513_v14  ;;  %v3721_v12 = vld [vmem:[#allocation4 + $0x38] sm:$0xff] }
 0xc38   :  { %3592 = vmatpush1.bf16.msra.mxu0 %v3487_v41  ;;  %4144 = vmatpush3.bf16.msra.mxu1 %v3489_v33 }
 0xc39   :  { %3593 = vmatprep.subr.bf16.mxu0 %v3491_v24  ;;  %4145 = vmatprep.subr.bf16.mxu1 %v3516_v23  ;;  %v3529_v23 = vld [vmem:[%s6199_s6] sm:$0x7] }
 0xc3a   :  { %v3534_v57 = vrot.slane %v3529_v23, %v7122_v27  ;;  %v3731_v27 = vld [vmem:[#allocation4 + $0x88] sm:$0xff] }
 0xc3c   :  { %3594 = vmatpush1.bf16.msra.mxu0 %v3490_v15  ;;  %4146 = vmatpush3.bf16.msra.mxu1 %v3492_v38  ;;  %v3542_v15 = vrot.slane %v3529_v23, %v7125_v22 }
 0xc3d   :  { %3595 = vmatprep.subr.bf16.mxu0 %v3494_v0  ;;  %4147 = vmatprep.subr.bf16.mxu1 %v3519_v58 }
 0xc40   :  { %3596 = vmatpush1.bf16.msra.mxu0 %v3493_v16  ;;  %4148 = vmatpush3.bf16.msra.mxu1 %v3495_v28 }
 0xc41   :  { %3597 = vmatprep.subr.bf16.mxu0 %v3497_v37  ;;  %4149 = vmatprep.subr.bf16.mxu1 %v3522_v47 }
 0xc44   :  { %3598 = vmatpush1.bf16.msra.mxu0 %v3496_v1  ;;  %4150 = vmatpush3.bf16.msra.mxu1 %v3498_v48  ;;  %v3538_v1 = vrot.slane %v3529_v23, %v7123_v62  ;;  %v3732_v62 = vld [vmem:[#allocation4 + $0x90] sm:$0xff] }
 0xc45   :  { %3599 = vmatprep.subr.bf16.mxu0 %v3500_v63  ;;  %4151 = vmatprep.subr.bf16.mxu1 %v3525_v13 }
 0xc48   :  { %3600 = vmatpush1.bf16.msra.mxu0 %v3499_v60  ;;  %4152 = vmatpush3.bf16.msra.mxu1 %v3501_v51 }
 0xc49   :  { %3601 = vmatprep.subr.bf16.mxu0 %v3503_v21  ;;  %4153 = vmatprep.subr.bf16.mxu1 %v3528_v56 }
 0xc4c   :  { %3602 = vmatpush1.bf16.msra.mxu0 %v3502_v50  ;;  %4154 = vmatpush3.bf16.msra.mxu1 %v3504_v30  ;;  %v3730_v50 = vld [vmem:[#allocation4 + $0x80] sm:$0xff]  ;;  %v3733_v30 = vld [vmem:[#allocation4 + $0x98] sm:$0xff] }
 0xc4d   :  { %3603 = vmatprep.subr.bf16.mxu0 %v3506_v53  ;;  %4161 = vmatprep.subr.bf16.mxu1 %v3722_v49  ;;  %v3734_v53 = vld [vmem:[#allocation4 + $0xa0] sm:$0xff] }
 0xc4f   :  { %3701 = vmatmul.mubr.bf16.vlgmr.msra.gmra.mrb[72].mxu1 %v3431_v44 }
 0xc50   :  { %3604 = vmatpush1.bf16.msra.mxu0 %v3505_v36  ;;  %4162 = vmatpush3.bf16.msra.mxu1 %v3714_v9  ;;  %v3736_v36 = vld [vmem:[#allocation4 + $0xb0] sm:$0xff] }
 0xc51   :  { %3605 = vmatprep.subr.bf16.mxu0 %v3509_v11  ;;  %4163 = vmatprep.subr.bf16.mxu1 %v3723_v43 }
 0xc54   :  { %3606 = vmatpush1.bf16.msra.mxu0 %v3508_v52  ;;  %4164 = vmatpush3.bf16.msra.mxu1 %v3715_v18  ;;  %v3737_v52 = vld [vmem:[#allocation4 + $0xb8] sm:$0xff] }
 0xc55   :  { %3607 = vmatprep.subr.bf16.mxu0 %v3512_v3  ;;  %4165 = vmatprep.subr.bf16.mxu1 %v3724_v39 }
 0xc58   :  { %3608 = vmatpush1.bf16.msra.mxu0 %v3511_v54  ;;  %4166 = vmatpush3.bf16.msra.mxu1 %v3716_v45 }
 0xc59   :  { %3609 = vmatprep.subr.bf16.mxu0 %v3515_v20  ;;  %4167 = vmatprep.subr.bf16.mxu1 %v3725_v55 }
 0xc5c   :  { %3610 = vmatpush1.bf16.msra.mxu0 %v3514_v17  ;;  %4168 = vmatpush3.bf16.msra.mxu1 %v3717_v25 }
 0xc5d   :  { %3611 = vmatprep.subr.bf16.mxu0 %v3518_v31  ;;  %4169 = vmatprep.subr.bf16.mxu1 %v3726_v2 }
 0xc60   :  { %3612 = vmatpush1.bf16.msra.mxu0 %v3517_v7  ;;  %4170 = vmatpush3.bf16.msra.mxu1 %v3718_v19 }
 0xc61   :  { %3613 = vmatprep.subr.bf16.mxu0 %v3521_v59  ;;  %4171 = vmatprep.subr.bf16.mxu1 %v3727_v40  ;;  %v4113_v59 = vld [vmem:[%s6200_s7] ss:$0 sm:$0xff] }
 0xc64   :  { %3614 = vmatpush1.bf16.msra.mxu0 %v3520_v26  ;;  %4172 = vmatpush3.bf16.msra.mxu1 %v3719_v34 }
 0xc65   :  { %3615 = vmatprep.subr.bf16.mxu0 %v3524_v61  ;;  %4173 = vmatprep.subr.bf16.mxu1 %v3728_v10 }
 0xc68   :  { %3616 = vmatpush1.bf16.msra.mxu0 %v3523_v4  ;;  %4174 = vmatpush3.bf16.msra.mxu1 %v3720_v32 }
 0xc69   :  { %3617 = vmatprep.subr.bf16.mxu0 %v3527_v29  ;;  %4175 = vmatprep.subr.bf16.mxu1 %v3729_v8 }
 0xc6c   :  { %3618 = vmatpush1.bf16.msra.mxu0 %v3526_v46  ;;  %4176 = vmatpush3.bf16.msra.mxu1 %v3721_v12 }
 0xc6d   :  { %4192 = vmatprep.subr.bf16.mxu1 %v4644_v6 }
 0xc6f   :  { %3620 = vmatmul.mubr.bf16.vlgmr.msra.gmra.mrb[68].mxu0 %v3431_v44  ;;  %v3735_v44 = vld [vmem:[#allocation4 + $0xa8] sm:$0xff] }
 0xd02   :  { %v4133_v42 = vpop.f32.mrb[68].mxu1 }
 0xd03   :  { %v4134_v14 = vpop.f32.mrb[69].mxu1 }
 0xd04   :  { %v4135_v41 = vadd.f32 %v4134_v14, %v4133_v42  ;;  %v4136_v33 = vpop.f32.mrb[70].mxu1 }
 0xd05   :  { %v4137_v24 = vpop.f32.mrb[71].mxu1 }
 0xd06   :  { %v3663_v58 = vadd.f32 %v4135_v41, %v3542_v15 }
 0xd22   :  { %v4155_v38 = vpop.f32.mrb[72].mxu1 }
 0xd23   :  { %v4156_v0 = vpop.f32.mrb[73].mxu1 }
 0xd24   :  { %v4157_v16 = vadd.f32 %v4156_v0, %v4155_v38  ;;  %v4158_v28 = vpop.f32.mrb[74].mxu1 }
 0xd25   :  { %v4159_v37 = vpop.f32.mrb[75].mxu1 }
 0xd26   :  { %v3703_v47 = vadd.f32 %v4157_v16, %v3663_v58 }
 0xd28   :  { %v3710_v11 = vmax.f32 %v3703_v47, 0.0 }
 0xd2a   :  { %v3713_v3 = vpack.c.bf16 %v3710_v11, %v3710_v11 }
 0xd42   :  { %v3621_v48 = vpop.f32.mrb[68].mxu0 }
 0xd43   :  { %v4212_v63 = vadd.f32 %v3621_v48, %v3534_v57  ;;  %v3623_v13 = vpop.f32.mrb[69].mxu0 }
 0xd44   :  { %v4213_v35 = vadd.f32 %v3623_v13, %v3538_v1  ;;  %v3625_v60 = vpop.f32.mrb[70].mxu0 }
 0xd45   :  { %v3708_v51 = vmax.f32 %v4212_v63, 0.0  ;;  %v3626_v21 = vpop.f32.mrb[71].mxu0 }
 0xd46   :  { %v3709_v56 = vmax.f32 %v4213_v35, 0.0 }
 0xd47   :  { %v3711_v5 = vpack.c.bf16 %v3708_v51, %v3708_v51 }
 0xd48   :  { %v3712_v22 = vpack.c.bf16 %v3709_v56, %v3709_v56 }
 0xd4a   :  { %3777 = vmatprep.mubr.bf16.mxu1 %v3712_v22 }
 0xd4b   :  { %3778 = vmatmul.mubr.bf16.vlgmr.msra.gmra.mrb[76].mxu1 %v3711_v5 }
 0xd4c   :  { %4193 = vmatpush3.bf16.msra.mxu1 %v3730_v50  ;;  %4208 = vmatprep.mubr.msk.bf16.mxu1 %vm4645_vm1, %v4644_v6 }
 0xd4d   :  { %4194 = vmatprep.subr.bf16.mxu1 %v4644_v6 }
 0xd50   :  { %4195 = vmatpush3.bf16.msra.mxu1 %v3731_v27 }
 0xd51   :  { %4196 = vmatprep.subr.bf16.mxu1 %v4644_v6 }
 0xd54   :  { %4197 = vmatpush3.bf16.msra.mxu1 %v3732_v62 }
 0xd55   :  { %4198 = vmatprep.subr.bf16.mxu1 %v4644_v6 }
 0xd58   :  { %4199 = vmatpush3.bf16.msra.mxu1 %v3733_v30 }
 0xd59   :  { %4200 = vmatprep.subr.bf16.mxu1 %v4644_v6 }
 0xd5c   :  { %4201 = vmatpush3.bf16.msra.mxu1 %v3734_v53 }
 0xd5d   :  { %4202 = vmatprep.subr.bf16.mxu1 %v4644_v6 }
 0xd60   :  { %4203 = vmatpush3.bf16.msra.mxu1 %v3735_v44 }
 0xd61   :  { %4204 = vmatprep.subr.bf16.mxu1 %v4644_v6 }
 0xd64   :  { %4205 = vmatpush3.bf16.msra.mxu1 %v3736_v36 }
 0xd65   :  { %4206 = vmatprep.subr.bf16.mxu1 %v4644_v6 }
 0xd68   :  { %4207 = vmatpush3.bf16.msra.mxu1 %v3737_v52 }
 0xd6b   :  { %4209 = vmatmul.mubr.bf16.vlgmr.msra.gmra.mrb[80].mxu1 %v3713_v3 }
 0xe1e   :  { %v4177_v54 = vpop.f32.mrb[76].mxu1 }
 0xe1f   :  { %v4178_v20 = vpop.f32.mrb[77].mxu1 }
 0xe20   :  { %v4179_v17 = vadd.f32 %v4178_v20, %v4177_v54  ;;  %v4180_v31 = vpop.f32.mrb[78].mxu1 }
 0xe21   :  { %v4181_v7 = vpop.f32.mrb[79].mxu1 }
 0xe22   :  { %v3780_v26 = vadd.f32 %v4179_v17, %v4113_v59 }
 0xe3e   :  { %v3819_v61 = vpop.f32.mrb[80].mxu1 }
 0xe3f   :  { %v3820_v4 = vadd.f32 %v3819_v61, %v3780_v26  ;;  %v4210_v29 = vpop.f32.mrb[81].mxu1 }
 0xe40   :  { %v3822_v46 = vpop.f32.mrb[82].mxu1 }
 0xe41   :  { %4498 = vtanh.f32 %v3820_v4  ;;  %v4211_v49 = vpop.f32.mrb[83].mxu1 }
 0xe4b   :  { %v4499_v9 = vpop.eup %4498 }
 0xe4c   :  { %v3826_v43 = vmul.f32 2.0, %v4499_v9 }
 0xe4e   :  { %3827 = vst [vmem:[#allocation12] sm:$0x3] %v3826_v43 }
 0xe4f   :  { %4599 = shalt.err (!%p4596_p8)
}
 0xe50   :  { %s4600_s8 = scalar_lea.hbm %s6204_s11, 32 }
 0xe51   :  { %p4601_p9 = scmp.ne.s32.totalorder %s6204_s11, %s4600_s8  ;;  %p4604_p10 = scmp.lt.u32.totalorder %s4600_s8, %s6204_s11 }
 0xe53   :  { %p4606_p11 = pnand %p4604_p10, %p4601_p9 }
 0xe55   :  { %4609 = shalt.err (!%p4606_p11)
}
 0xe56   :  { %3837 = dma.vmem_to_hbm [thread:$0]  %s3835_s16, 32, %s6204_s11, [#allocation8]  }
 0xe57   :  { %4620 = dma.done.wait [#allocation8], 32  }
 0xe58   :  { %4621 = vsyncadd [#allocation8], 4294967264 }
 0xe59   :  { %3841 = vsyncpa [#allocation7], 1 }
 0xe5a   :  { %3842 = vsyncpa [#allocation10], 1 }
 0xe5b   :  { %3843 = vsyncpa [#allocation8], 1 }
 0xe5c   :  { %3844 = vsyncmov [#allocation5] }
 0xe5f   :  { %s3845_s2 = vpop.sfrf %3844 }
 0xe60   :  { %p4114_p12 = scmp.ne.s32.totalorder %s3845_s2, 0 }
 0xe62   :  { %3849 = shalt.err (%p4114_p12)  }
 0xe63   :  { %3851 = vsyncmov [#allocation5 + $0x1] }
 0xe66   :  { %s3852_s20 = vpop.sfrf %3851 }
 0xe67   :  { %p4115_p13 = scmp.ne.s32.totalorder %s3852_s20, 0 }
 0xe69   :  { %3856 = shalt.err (%p4115_p13)  }
 0xe6a   :  { %3858 = vsyncmov [#allocation5 + $0x2] }
 0xe6d   :  { %s3859_s21 = vpop.sfrf %3858 }
 0xe6e   :  { %p4116_p0 = scmp.ne.s32.totalorder %s3859_s21, 0 }
 0xe70   :  { %3863 = shalt.err (%p4116_p0)  }

</bundles_post_ra>
